<compile_context>
chip_gen: v7x
topology: tpu7x:2x2x1
jax: 0.10.0
libtpu: 0.0.40
codegen_flags: <defaults>
</compile_context>

<pallas_src>
import functools

import jax
import jax.numpy as jnp
from jax.experimental import pallas as pl
from jax.experimental.pallas import tpu as pltpu

# ---------------- synthetic config (small shapes) ----------------
HIDDEN = 32
NUM_HEADS = 4
INTER = 4 * HIDDEN
NUM_FUSION_LAYERS = 2   # config.num_hidden_layers (UNITER fusion)
NUM_VIT_LAYERS = 2      # ViT encoder depth (synthetic)
VOCAB = 64              # len(tokenizer) (synthetic)
MAX_POS = 64            # config.max_position_embeddings
NUM_CLASSES = 3
PATCH = 16
LN_EPS = 1e-12

STACK_NAMES = ("w_qkv", "b_qkv", "wo", "bo", "ln1g", "ln1b",
               "wi", "bi", "wo2", "bo2", "ln2g", "ln2b")


# ---------------- in-kernel helpers ----------------
def _layernorm(x, g, b):
    mu = jnp.mean(x, axis=-1, keepdims=True)
    var = jnp.mean(jnp.square(x - mu), axis=-1, keepdims=True)
    return (x - mu) * jax.lax.rsqrt(var + LN_EPS) * g + b


def _gelu(x):
    # TODO(synk): original GELU is the exact erf form; erf lowering in Mosaic is not
    # guaranteed, so the tanh approximation is used here.
    c = jnp.float32(0.7978845608028654)  # sqrt(2/pi)
    return 0.5 * x * (1.0 + jnp.tanh(c * (x + 0.044715 * x * x * x)))


def _mm(a, w):
    """MXU matmul: bf16 operands, f32 accumulation."""
    return jnp.dot(a.astype(jnp.bfloat16), w.astype(jnp.bfloat16),
                   preferred_element_type=jnp.float32)


def _encoder_layer(x, add_mask, lp, *, num_heads, pre_ln):
    """One transformer encoder layer on a [S, H] slab (pre-LN ViT or post-LN BERT)."""
    (w_qkv, b_qkv, wo, bo, ln1g, ln1b, wi, bi, wo2, bo2, ln2g, ln2b) = lp
    S, H = x.shape
    hd = H // num_heads
    scale = 1.0 / float(hd) ** 0.5

    h_in = _layernorm(x, ln1g, ln1b) if pre_ln else x
    qkv = _mm(h_in, w_qkv) + b_qkv            # fused QKV: one MXU push
    q = qkv[:, 0:H] * scale                   # scale folded into q, hoisted out of head loop
    k = qkv[:, H:2 * H]
    v = qkv[:, 2 * H:3 * H]
    q_b = q.astype(jnp.bfloat16)
    k_b = k.astype(jnp.bfloat16)

    mask_rows = None
    if add_mask is not None:
        mask_rows = jnp.broadcast_to(add_mask, (S, S))   # broadcast hoisted out of head loop

    lane = jax.lax.broadcasted_iota(jnp.int32, (1, H), 1)
    ctx = jnp.zeros((S, H), jnp.float32)
    for h in range(num_heads):
        lo, hi = h * hd, (h + 1) * hd
        s = jax.lax.dot_general(q_b[:, lo:hi], k_b[:, lo:hi],
                                (((1,), (1,)), ((), ())),
                                preferred_element_type=jnp.float32)   # [S, S]
        if mask_rows is not None:
            s = s + mask_rows
        s = s - jnp.max(s, axis=-1, keepdims=True)
        e = jnp.exp(s)
        probs = e * pl.reciprocal(jnp.sum(e, axis=-1, keepdims=True), approx=True)
        # Zero all lanes of V outside this head's block so per-head contexts land in
        # disjoint lane blocks of `ctx`; allows a single output projection below.
        v_h = jnp.where((lane >= lo) & (lane < hi), v, 0.0)
        ctx = ctx + _mm(probs, v_h)
    attn_out = _mm(ctx, wo) + bo              # single output projection

    if pre_ln:                                # ViT-style layer
        x1 = x + attn_out
        h2 = _layernorm(x1, ln2g, ln2b)
        mlp = _mm(_gelu(_mm(h2, wi) + bi), wo2) + bo2
        return x1 + mlp
    else:                                     # BERT/UNITER post-LN layer
        x1 = _layernorm(x + attn_out, ln1g, ln1b)
        ffn = _mm(_gelu(_mm(x1, wi) + bi), wo2) + bo2
        return _layernorm(x1 + ffn, ln2g, ln2b)


# ---------------- Pallas kernels ----------------
def _vit_encoder_kernel(patches_ref, base_ref, patch_w_ref,
                        w_qkv_ref, b_qkv_ref, wo_ref, bo_ref, ln1g_ref, ln1b_ref,
                        wi_ref, bi_ref, wo2_ref, bo2_ref, ln2g_ref, ln2b_ref,
                        fin_g_ref, fin_b_ref, o_ref, *, num_layers, num_heads):
    # Patch projection; row 0 of `patches` is zero (CLS slot), CLS token / patch bias /
    # position embeddings are pre-folded into `base`.
    x = _mm(patches_ref[0], patch_w_ref[...]) + base_ref[0]          # [P+1, H] f32
    for l in range(num_layers):
        lp = (w_qkv_ref[l], b_qkv_ref[l], wo_ref[l], bo_ref[l], ln1g_ref[l], ln1b_ref[l],
              wi_ref[l], bi_ref[l], wo2_ref[l], bo2_ref[l], ln2g_ref[l], ln2b_ref[l])
        x = _encoder_layer(x, None, lp, num_heads=num_heads, pre_ln=True)
    o_ref[0] = _layernorm(x, fin_g_ref[...], fin_b_ref[...]).astype(o_ref.dtype)


def _fusion_head_kernel(x_ref, mask_ref, emb_g_ref, emb_b_ref,
                        w_qkv_ref, b_qkv_ref, wo_ref, bo_ref, ln1g_ref, ln1b_ref,
                        wi_ref, bi_ref, wo2_ref, bo2_ref, ln2g_ref, ln2b_ref,
                        pool_w_ref, pool_b_ref, cls_w1_ref, cls_b1_ref,
                        cls_ln_g_ref, cls_ln_b_ref, cls_w2_ref, cls_b2_ref,
                        o_ref, *, num_layers, num_heads, img_len):
    x_raw = x_ref[0]                       # [S, H]  rows: [img_feat | txt embedding sum]
    mask = mask_ref[0]                     # [1, S] additive attention mask
    S = x_raw.shape[0]
    # BertEmbeddings LayerNorm applies only to the text rows (img rows already LN'd by ViT).
    row = jax.lax.broadcasted_iota(jnp.int32, (S, 1), 0)
    x_ln = _layernorm(x_raw, emb_g_ref[...], emb_b_ref[...])
    x = jnp.where(row >= img_len, x_ln, x_raw)
    # dropout: eval mode -> identity
    for l in range(num_layers):
        lp = (w_qkv_ref[l], b_qkv_ref[l], wo_ref[l], bo_ref[l], ln1g_ref[l], ln1b_ref[l],
              wi_ref[l], bi_ref[l], wo2_ref[l], bo2_ref[l], ln2g_ref[l], ln2b_ref[l])
        x = _encoder_layer(x, mask, lp, num_heads=num_heads, pre_ln=False)
    # BertPooler: first token -> dense -> tanh
    pooled = jnp.tanh(_mm(x[0:1, :], pool_w_ref[...]) + pool_b_ref[...])
    # Classifier: Linear -> GELU -> LayerNorm -> Linear
    hcls = _gelu(_mm(pooled, cls_w1_ref[...]) + cls_b1_ref[...])
    hcls = _layernorm(hcls, cls_ln_g_ref[...], cls_ln_b_ref[...])
    logits = _mm(hcls, cls_w2_ref[...]) + cls_b2_ref[...]
    o_ref[0] = logits.astype(o_ref.dtype)


# ---------------- kernel wrappers ----------------
def _const_spec(shape):
    nd = len(shape)
    return pl.BlockSpec(shape, lambda b, _nd=nd: (0,) * _nd)


def run_vit_encoder(patches, base, params):
    B, P1, CPP = patches.shape
    H = HIDDEN
    stack = params["vit_stack"]
    weights = [stack[n] for n in STACK_NAMES]
    extras = [params["vit_ln_g"], params["vit_ln_b"]]
    kernel = functools.partial(_vit_encoder_kernel,
                               num_layers=NUM_VIT_LAYERS, num_heads=NUM_HEADS)
    in_specs = [pl.BlockSpec((1, P1, CPP), lambda b: (b, 0, 0)),
                _const_spec(base.shape),
                _const_spec(params["patch_w"].shape)]
    in_specs += [_const_spec(w.shape) for w in weights + extras]
    return pl.pallas_call(
        kernel,
        out_shape=jax.ShapeDtypeStruct((B, P1, H), jnp.float32),
        grid=(B,),
        in_specs=in_specs,
        out_specs=pl.BlockSpec((1, P1, H), lambda b: (b, 0, 0)),
        compiler_params=pltpu.CompilerParams(dimension_semantics=("parallel",)),
    )(patches, base, params["patch_w"], *weights, *extras)


def run_fusion_head(mm_raw, add_mask, params, *, img_len):
    B, S, H = mm_raw.shape
    stack = params["fusion_stack"]
    weights = [stack[n] for n in STACK_NAMES]
    head = [params["pool_w"], params["pool_b"],
            params["cls_w1"], params["cls_b1"],
            params["cls_ln_g"], params["cls_ln_b"],
            params["cls_w2"], params["cls_b2"]]
    kernel = functools.partial(_fusion_head_kernel, num_layers=NUM_FUSION_LAYERS,
                               num_heads=NUM_HEADS, img_len=img_len)
    in_specs = [pl.BlockSpec((1, S, H), lambda b: (b, 0, 0)),
                pl.BlockSpec((1, 1, S), lambda b: (b, 0, 0)),
                _const_spec(params["emb_ln_g"].shape),
                _const_spec(params["emb_ln_b"].shape)]
    in_specs += [_const_spec(w.shape) for w in weights + head]
    out = pl.pallas_call(
        kernel,
        out_shape=jax.ShapeDtypeStruct((B, 1, NUM_CLASSES), jnp.float32),
        grid=(B,),
        in_specs=in_specs,
        out_specs=pl.BlockSpec((1, 1, NUM_CLASSES), lambda b: (b, 0, 0)),
        compiler_params=pltpu.CompilerParams(dimension_semantics=("parallel",)),
    )(mm_raw, add_mask, params["emb_ln_g"], params["emb_ln_b"], *weights, *head)
    return out[:, 0, :]


# ---------------- parameter init (deterministic, synthetic) ----------------
def init_layer_stack(key, num_layers):
    H, I = HIDDEN, INTER
    ks = jax.random.split(key, 4 * num_layers)
    nrm = lambda k, s: jax.random.normal(k, s, jnp.float32) * 0.02
    w_qkv = jnp.stack([nrm(ks[4 * l + 0], (H, 3 * H)) for l in range(num_layers)])
    wo = jnp.stack([nrm(ks[4 * l + 1], (H, H)) for l in range(num_layers)])
    wi = jnp.stack([nrm(ks[4 * l + 2], (H, I)) for l in range(num_layers)])
    wo2 = jnp.stack([nrm(ks[4 * l + 3], (I, H)) for l in range(num_layers)])
    zeros = lambda n: jnp.zeros((num_layers, 1, n), jnp.float32)
    ones = lambda n: jnp.ones((num_layers, 1, n), jnp.float32)
    return {"w_qkv": w_qkv.astype(jnp.bfloat16), "b_qkv": zeros(3 * H),
            "wo": wo.astype(jnp.bfloat16), "bo": zeros(H),
            "ln1g": ones(H), "ln1b": zeros(H),
            "wi": wi.astype(jnp.bfloat16), "bi": zeros(I),
            "wo2": wo2.astype(jnp.bfloat16), "bo2": zeros(H),
            "ln2g": ones(H), "ln2b": zeros(H)}


def init_params(key):
    keys = jax.random.split(key, 12)
    nrm = lambda k, s: jax.random.normal(k, s, jnp.float32) * 0.02
    H = HIDDEN
    return {
        # BertEmbeddings
        "word_emb": nrm(keys[0], (VOCAB, H)).at[0].set(0.0),      # padding_idx=0
        "pos_emb": nrm(keys[1], (MAX_POS, H)),
        "tok_type_emb": nrm(keys[2], (VOCAB, H)),
        "emb_ln_g": jnp.ones((1, H), jnp.float32),
        "emb_ln_b": jnp.zeros((1, H), jnp.float32),
        # ViT encoder
        "patch_w": nrm(keys[3], (3 * PATCH * PATCH, H)).astype(jnp.bfloat16),
        "patch_b": jnp.zeros((1, H), jnp.float32),
        "vit_cls": nrm(keys[4], (1, 1, H)),
        "vit_pos_emb": nrm(keys[5], (1, MAX_POS, H)),
        "vit_ln_g": jnp.ones((1, H), jnp.float32),
        "vit_ln_b": jnp.zeros((1, H), jnp.float32),
        "vit_stack": init_layer_stack(keys[6], NUM_VIT_LAYERS),
        # UNITER fusion
        "fusion_stack": init_layer_stack(keys[7], NUM_FUSION_LAYERS),
        # Pooler + Classifier
        "pool_w": nrm(keys[8], (H, H)).astype(jnp.bfloat16),
        "pool_b": jnp.zeros((1, H), jnp.float32),
        "cls_w1": nrm(keys[9], (H, 2 * H)).astype(jnp.bfloat16),
        "cls_b1": jnp.zeros((1, 2 * H), jnp.float32),
        "cls_ln_g": jnp.ones((1, 2 * H), jnp.float32),
        "cls_ln_b": jnp.zeros((1, 2 * H), jnp.float32),
        "cls_w2": nrm(keys[10], (2 * H, NUM_CLASSES)).astype(jnp.bfloat16),
        "cls_b2": jnp.zeros((1, NUM_CLASSES), jnp.float32),
    }


# ---------------- forward pass ----------------
def chartfc_forward(params, img, input_ids, txt_attention_mask):
    B, T = input_ids.shape
    H = HIDDEN

    # ---- txt_encoder (BertEmbeddings) — gathers in JAX; LayerNorm fused into the fusion kernel ----
    # TODO(synk): BertTokenizer.batch_encode_plus has no Pallas equivalent; token ids
    # and the attention mask are taken as precomputed inputs.
    we = jnp.take(params["word_emb"], input_ids, axis=0)                       # [B,T,H]
    pe = jnp.broadcast_to(params["pos_emb"][:T][None], (B, T, H))              # arange positions
    te = jnp.take(params["tok_type_emb"], jnp.zeros_like(input_ids), axis=0)   # token_type_ids = 0
    txt_sum = (we + pe + te).astype(jnp.float32)

    # ---- img_encoder (ViTEncoder) ----
    # TODO(synk): ViTFeatureExtractor resize-to-224 is host preprocessing and is not
    # implemented; the mean/std=0.5 normalization is applied here.
    x = (img.astype(jnp.float32) - 0.5) / 0.5
    _, C, Hh, Ww = x.shape
    nph, npw = Hh // PATCH, Ww // PATCH
    P = nph * npw
    P1 = P + 1
    CPP = C * PATCH * PATCH
    patches = x.reshape(B, C, nph, PATCH, npw, PATCH)
    patches = patches.transpose(0, 2, 4, 1, 3, 5).reshape(B, P, CPP)
    # Prepend a zero row (CLS slot) so the in-kernel patch projection covers all P+1 rows;
    # CLS token, patch bias and position embeddings are folded into `base` (parameter-only).
    patches = jnp.concatenate(
        [jnp.zeros((B, 1, CPP), patches.dtype), patches], axis=1).astype(jnp.bfloat16)
    base = params["vit_pos_emb"][:, :P1, :] + jnp.concatenate(
        [params["vit_cls"],
         jnp.broadcast_to(params["patch_b"][None, :, :], (1, P, H))], axis=1)
    img_feat = run_vit_encoder(patches, base, params)                          # [B, P1, H]

    # ---- multimodal fusion + pooler + classifier (single fused kernel) ----
    mm_raw = jnp.concatenate([img_feat, txt_sum], axis=1)                      # [B, P1+T, H]
    # NOTE: mask concatenation order (txt, img) vs feature order (img, txt) is
    # reproduced exactly as in the PyTorch module.
    attention_mask = jnp.concatenate(
        [txt_attention_mask.astype(jnp.float32),
         jnp.ones((B, P1), jnp.float32)], axis=1)
    extended = ((1.0 - attention_mask) * -10000.0)[:, None, :]                 # [B, 1, S]
    return run_fusion_head(mm_raw, extended, params, img_len=P1)


if __name__ == "__main__":
    key = jax.random.PRNGKey(0)
    pkey, ikey, tkey = jax.random.split(key, 3)
    params = init_params(pkey)

    B, T = 2, 8
    img = jax.random.uniform(ikey, (B, 3, 32, 32), jnp.float32)
    input_ids = jax.random.randint(tkey, (B, T), 1, VOCAB)
    txt_len = jnp.array([8, 5], jnp.int32)
    txt_mask = (jnp.arange(T)[None, :] < txt_len[:, None]).astype(jnp.int32)
    input_ids = input_ids * txt_mask    # pad tokens -> id 0 (padding_idx)

    out = jax.jit(chartfc_forward)(params, img, input_ids, txt_mask)
    jax.block_until_ready(out)
    assert out.shape == (B, NUM_CLASSES) and out.dtype == jnp.float32
    print("KERNEL_OK")
</pallas_src>

<mosaic_0001>
module attributes {stable_mosaic.version = 11 : i64} {
  func.func @_vit_encoder_kernel(%arg0: i32, %arg1: memref<1x5x768xbf16, #tpu.memory_space<vmem>>, %arg2: memref<1x5x32xf32, #tpu.memory_space<vmem>>, %arg3: memref<768x32xbf16, #tpu.memory_space<vmem>>, %arg4: memref<2x32x96xbf16, #tpu.memory_space<vmem>>, %arg5: memref<2x1x96xf32, #tpu.memory_space<vmem>>, %arg6: memref<2x32x32xbf16, #tpu.memory_space<vmem>>, %arg7: memref<2x1x32xf32, #tpu.memory_space<vmem>>, %arg8: memref<2x1x32xf32, #tpu.memory_space<vmem>>, %arg9: memref<2x1x32xf32, #tpu.memory_space<vmem>>, %arg10: memref<2x32x128xbf16, #tpu.memory_space<vmem>>, %arg11: memref<2x1x128xf32, #tpu.memory_space<vmem>>, %arg12: memref<2x128x32xbf16, #tpu.memory_space<vmem>>, %arg13: memref<2x1x32xf32, #tpu.memory_space<vmem>>, %arg14: memref<2x1x32xf32, #tpu.memory_space<vmem>>, %arg15: memref<2x1x32xf32, #tpu.memory_space<vmem>>, %arg16: memref<1x32xf32, #tpu.memory_space<vmem>>, %arg17: memref<1x32xf32, #tpu.memory_space<vmem>>, %arg18: memref<1x5x32xf32, #tpu.memory_space<vmem>>) attributes {dimension_semantics = [#tpu.dimension_semantics<parallel>], iteration_bounds = array<i64: 2>, scalar_prefetch = 0 : i64, scratch_operands = 0 : i64, tpu.core_type = #tpu.core_type<tc>, window_params = [{transform_indices = @transform_0, window_bounds = array<i64: 1, 5, 768>}, {pipeline_mode = #tpu.pipeline_mode<synchronous>, transform_indices = @transform_1, window_bounds = array<i64: 1, 5, 32>}, {pipeline_mode = #tpu.pipeline_mode<synchronous>, transform_indices = @transform_2, window_bounds = array<i64: 768, 32>}, {pipeline_mode = #tpu.pipeline_mode<synchronous>, transform_indices = @transform_3, window_bounds = array<i64: 2, 32, 96>}, {pipeline_mode = #tpu.pipeline_mode<synchronous>, transform_indices = @transform_4, window_bounds = array<i64: 2, 1, 96>}, {pipeline_mode = #tpu.pipeline_mode<synchronous>, transform_indices = @transform_5, window_bounds = array<i64: 2, 32, 32>}, {pipeline_mode = #tpu.pipeline_mode<synchronous>, transform_indices = @transform_6, window_bounds = array<i64: 2, 1, 32>}, {pipeline_mode = #tpu.pipeline_mode<synchronous>, transform_indices = @transform_7, window_bounds = array<i64: 2, 1, 32>}, {pipeline_mode = #tpu.pipeline_mode<synchronous>, transform_indices = @transform_8, window_bounds = array<i64: 2, 1, 32>}, {pipeline_mode = #tpu.pipeline_mode<synchronous>, transform_indices = @transform_9, window_bounds = array<i64: 2, 32, 128>}, {pipeline_mode = #tpu.pipeline_mode<synchronous>, transform_indices = @transform_10, window_bounds = array<i64: 2, 1, 128>}, {pipeline_mode = #tpu.pipeline_mode<synchronous>, transform_indices = @transform_11, window_bounds = array<i64: 2, 128, 32>}, {pipeline_mode = #tpu.pipeline_mode<synchronous>, transform_indices = @transform_12, window_bounds = array<i64: 2, 1, 32>}, {pipeline_mode = #tpu.pipeline_mode<synchronous>, transform_indices = @transform_13, window_bounds = array<i64: 2, 1, 32>}, {pipeline_mode = #tpu.pipeline_mode<synchronous>, transform_indices = @transform_14, window_bounds = array<i64: 2, 1, 32>}, {pipeline_mode = #tpu.pipeline_mode<synchronous>, transform_indices = @transform_15, window_bounds = array<i64: 1, 32>}, {pipeline_mode = #tpu.pipeline_mode<synchronous>, transform_indices = @transform_16, window_bounds = array<i64: 1, 32>}, {transform_indices = @transform_17, window_bounds = array<i64: 1, 5, 32>}]} {
    %c0 = arith.constant 0 : index
    %c0_0 = arith.constant 0 : index
    %c0_1 = arith.constant 0 : index
    %0 = vector.load %arg1[%c0, %c0_0, %c0_1] : memref<1x5x768xbf16, #tpu.memory_space<vmem>>, vector<1x5x768xbf16>
    %1 = vector.shape_cast %0 : vector<1x5x768xbf16> to vector<5x768xbf16>
    %c0_2 = arith.constant 0 : index
    %c0_3 = arith.constant 0 : index
    %2 = vector.load %arg3[%c0_2, %c0_3] : memref<768x32xbf16, #tpu.memory_space<vmem>>, vector<768x32xbf16>
    %cst = arith.constant dense<0.000000e+00> : vector<5x32xf32>
    %3 = tpu.matmul %1, %2, %cst {dimension_numbers = #tpu.dot_dimension_numbers<[1], [0], [0], [1], [0, 0, 1, 1], [], []>} : vector<5x768xbf16>, vector<768x32xbf16>, vector<5x32xf32> -> vector<5x32xf32>
    %c0_4 = arith.constant 0 : index
    %c0_5 = arith.constant 0 : index
    %c0_6 = arith.constant 0 : index
    %4 = vector.load %arg2[%c0_4, %c0_5, %c0_6] : memref<1x5x32xf32, #tpu.memory_space<vmem>>, vector<1x5x32xf32>
    %5 = vector.shape_cast %4 : vector<1x5x32xf32> to vector<5x32xf32>
    %6 = arith.addf %3, %5 : vector<5x32xf32>
    %c0_7 = arith.constant 0 : index
    %c0_8 = arith.constant 0 : index
    %c0_9 = arith.constant 0 : index
    %7 = vector.load %arg4[%c0_7, %c0_8, %c0_9] : memref<2x32x96xbf16, #tpu.memory_space<vmem>>, vector<1x32x96xbf16>
    %8 = vector.shape_cast %7 : vector<1x32x96xbf16> to vector<32x96xbf16>
    %c0_10 = arith.constant 0 : index
    %c0_11 = arith.constant 0 : index
    %c0_12 = arith.constant 0 : index
    %9 = vector.load %arg5[%c0_10, %c0_11, %c0_12] : memref<2x1x96xf32, #tpu.memory_space<vmem>>, vector<1x1x96xf32>
    %10 = vector.shape_cast %9 : vector<1x1x96xf32> to vector<1x96xf32>
    %c0_13 = arith.constant 0 : index
    %c0_14 = arith.constant 0 : index
    %c0_15 = arith.constant 0 : index
    %11 = vector.load %arg6[%c0_13, %c0_14, %c0_15] : memref<2x32x32xbf16, #tpu.memory_space<vmem>>, vector<1x32x32xbf16>
    %12 = vector.shape_cast %11 : vector<1x32x32xbf16> to vector<32x32xbf16>
    %c0_16 = arith.constant 0 : index
    %c0_17 = arith.constant 0 : index
    %c0_18 = arith.constant 0 : index
    %13 = vector.load %arg7[%c0_16, %c0_17, %c0_18] : memref<2x1x32xf32, #tpu.memory_space<vmem>>, vector<1x1x32xf32>
    %14 = vector.shape_cast %13 : vector<1x1x32xf32> to vector<1x32xf32>
    %c0_19 = arith.constant 0 : index
    %c0_20 = arith.constant 0 : index
    %c0_21 = arith.constant 0 : index
    %15 = vector.load %arg8[%c0_19, %c0_20, %c0_21] : memref<2x1x32xf32, #tpu.memory_space<vmem>>, vector<1x1x32xf32>
    %16 = vector.shape_cast %15 : vector<1x1x32xf32> to vector<1x32xf32>
    %c0_22 = arith.constant 0 : index
    %c0_23 = arith.constant 0 : index
    %c0_24 = arith.constant 0 : index
    %17 = vector.load %arg9[%c0_22, %c0_23, %c0_24] : memref<2x1x32xf32, #tpu.memory_space<vmem>>, vector<1x1x32xf32>
    %18 = vector.shape_cast %17 : vector<1x1x32xf32> to vector<1x32xf32>
    %c0_25 = arith.constant 0 : index
    %c0_26 = arith.constant 0 : index
    %c0_27 = arith.constant 0 : index
    %19 = vector.load %arg10[%c0_25, %c0_26, %c0_27] : memref<2x32x128xbf16, #tpu.memory_space<vmem>>, vector<1x32x128xbf16>
    %20 = vector.shape_cast %19 : vector<1x32x128xbf16> to vector<32x128xbf16>
    %c0_28 = arith.constant 0 : index
    %c0_29 = arith.constant 0 : index
    %c0_30 = arith.constant 0 : index
    %21 = vector.load %arg11[%c0_28, %c0_29, %c0_30] : memref<2x1x128xf32, #tpu.memory_space<vmem>>, vector<1x1x128xf32>
    %22 = vector.shape_cast %21 : vector<1x1x128xf32> to vector<1x128xf32>
    %c0_31 = arith.constant 0 : index
    %c0_32 = arith.constant 0 : index
    %c0_33 = arith.constant 0 : index
    %23 = vector.load %arg12[%c0_31, %c0_32, %c0_33] : memref<2x128x32xbf16, #tpu.memory_space<vmem>>, vector<1x128x32xbf16>
    %24 = vector.shape_cast %23 : vector<1x128x32xbf16> to vector<128x32xbf16>
    %c0_34 = arith.constant 0 : index
    %c0_35 = arith.constant 0 : index
    %c0_36 = arith.constant 0 : index
    %25 = vector.load %arg13[%c0_34, %c0_35, %c0_36] : memref<2x1x32xf32, #tpu.memory_space<vmem>>, vector<1x1x32xf32>
    %26 = vector.shape_cast %25 : vector<1x1x32xf32> to vector<1x32xf32>
    %c0_37 = arith.constant 0 : index
    %c0_38 = arith.constant 0 : index
    %c0_39 = arith.constant 0 : index
    %27 = vector.load %arg14[%c0_37, %c0_38, %c0_39] : memref<2x1x32xf32, #tpu.memory_space<vmem>>, vector<1x1x32xf32>
    %28 = vector.shape_cast %27 : vector<1x1x32xf32> to vector<1x32xf32>
    %c0_40 = arith.constant 0 : index
    %c0_41 = arith.constant 0 : index
    %c0_42 = arith.constant 0 : index
    %29 = vector.load %arg15[%c0_40, %c0_41, %c0_42] : memref<2x1x32xf32, #tpu.memory_space<vmem>>, vector<1x1x32xf32>
    %30 = vector.shape_cast %29 : vector<1x1x32xf32> to vector<1x32xf32>
    %cst_43 = arith.constant dense<0.000000e+00> : vector<5xf32>
    %31 = vector.multi_reduction <add>, %6, %cst_43 [1] : vector<5x32xf32> to vector<5xf32>
    %32 = vector.shape_cast %31 : vector<5xf32> to vector<5x1xf32>
    %cst_44 = arith.constant 3.200000e+01 : f32
    %33 = vector.broadcast %cst_44 : f32 to vector<5x1xf32>
    %34 = arith.divf %32, %33 : vector<5x1xf32>
    %35 = vector.broadcast %34 : vector<5x1xf32> to vector<5x32xf32>
    %36 = arith.subf %6, %35 : vector<5x32xf32>
    %37 = arith.mulf %36, %36 : vector<5x32xf32>
    %cst_45 = arith.constant dense<0.000000e+00> : vector<5xf32>
    %38 = vector.multi_reduction <add>, %37, %cst_45 [1] : vector<5x32xf32> to vector<5xf32>
    %39 = vector.shape_cast %38 : vector<5xf32> to vector<5x1xf32>
    %cst_46 = arith.constant 3.200000e+01 : f32
    %40 = vector.broadcast %cst_46 : f32 to vector<5x1xf32>
    %41 = arith.divf %39, %40 : vector<5x1xf32>
    %42 = vector.broadcast %34 : vector<5x1xf32> to vector<5x32xf32>
    %43 = arith.subf %6, %42 : vector<5x32xf32>
    %cst_47 = arith.constant 9.99999996E-13 : f32
    %44 = vector.broadcast %cst_47 : f32 to vector<5x1xf32>
    %45 = arith.addf %41, %44 : vector<5x1xf32>
    %46 = math.rsqrt %45 : vector<5x1xf32>
    %47 = vector.broadcast %46 : vector<5x1xf32> to vector<5x32xf32>
    %48 = arith.mulf %43, %47 : vector<5x32xf32>
    %49 = vector.broadcast %16 : vector<1x32xf32> to vector<5x32xf32>
    %50 = arith.mulf %48, %49 : vector<5x32xf32>
    %51 = vector.broadcast %18 : vector<1x32xf32> to vector<5x32xf32>
    %52 = arith.addf %50, %51 : vector<5x32xf32>
    %53 = arith.truncf %52 : vector<5x32xf32> to vector<5x32xbf16>
    %cst_48 = arith.constant dense<0.000000e+00> : vector<5x96xf32>
    %54 = tpu.matmul %53, %8, %cst_48 {dimension_numbers = #tpu.dot_dimension_numbers<[1], [0], [0], [1], [0, 0, 1, 1], [], []>} : vector<5x32xbf16>, vector<32x96xbf16>, vector<5x96xf32> -> vector<5x96xf32>
    %55 = vector.broadcast %10 : vector<1x96xf32> to vector<5x96xf32>
    %56 = arith.addf %54, %55 : vector<5x96xf32>
    %57 = vector.extract_strided_slice %56 {offsets = [0, 0], sizes = [5, 32], strides = [1, 1]} : vector<5x96xf32> to vector<5x32xf32>
    %cst_49 = arith.constant 0.353553385 : f32
    %58 = vector.broadcast %cst_49 : f32 to vector<5x32xf32>
    %59 = arith.mulf %57, %58 : vector<5x32xf32>
    %60 = vector.extract_strided_slice %56 {offsets = [0, 32], sizes = [5, 32], strides = [1, 1]} : vector<5x96xf32> to vector<5x32xf32>
    %61 = vector.extract_strided_slice %56 {offsets = [0, 64], sizes = [5, 32], strides = [1, 1]} : vector<5x96xf32> to vector<5x32xf32>
    %62 = arith.truncf %59 : vector<5x32xf32> to vector<5x32xbf16>
    %63 = arith.truncf %60 : vector<5x32xf32> to vector<5x32xbf16>
    %64 = tpu.iota {dimensions = array<i32: 1>} : vector<1x32xi32>
    %cst_50 = arith.constant 0.000000e+00 : f32
    %65 = vector.broadcast %cst_50 : f32 to vector<5x32xf32>
    %66 = vector.extract_strided_slice %62 {offsets = [0, 0], sizes = [5, 8], strides = [1, 1]} : vector<5x32xbf16> to vector<5x8xbf16>
    %67 = vector.extract_strided_slice %63 {offsets = [0, 0], sizes = [5, 8], strides = [1, 1]} : vector<5x32xbf16> to vector<5x8xbf16>
    %cst_51 = arith.constant dense<0.000000e+00> : vector<5x5xf32>
    %68 = tpu.matmul %66, %67, %cst_51 {dimension_numbers = #tpu.dot_dimension_numbers<[1], [1], [0], [0], [0, 0, 1, 0], [], []>} : vector<5x8xbf16>, vector<5x8xbf16>, vector<5x5xf32> -> vector<5x5xf32>
    %cst_52 = arith.constant dense<0xFF800000> : vector<5xf32>
    %69 = vector.multi_reduction <maximumf>, %68, %cst_52 [1] : vector<5x5xf32> to vector<5xf32>
    %70 = vector.shape_cast %69 : vector<5xf32> to vector<5x1xf32>
    %71 = vector.broadcast %70 : vector<5x1xf32> to vector<5x5xf32>
    %72 = arith.subf %68, %71 : vector<5x5xf32>
    %73 = math.exp %72 : vector<5x5xf32>
    %cst_53 = arith.constant dense<0.000000e+00> : vector<5xf32>
    %74 = vector.multi_reduction <add>, %73, %cst_53 [1] : vector<5x5xf32> to vector<5xf32>
    %75 = vector.shape_cast %74 : vector<5xf32> to vector<5x1xf32>
    %76 = tpu.reciprocal %75 {approx = true} : vector<5x1xf32> -> vector<5x1xf32>
    %77 = vector.broadcast %76 : vector<5x1xf32> to vector<5x5xf32>
    %78 = arith.mulf %73, %77 : vector<5x5xf32>
    %c0_i32 = arith.constant 0 : i32
    %79 = vector.broadcast %c0_i32 : i32 to vector<1x32xi32>
    %80 = arith.cmpi sge, %64, %79 : vector<1x32xi32>
    %c8_i32 = arith.constant 8 : i32
    %81 = vector.broadcast %c8_i32 : i32 to vector<1x32xi32>
    %82 = arith.cmpi slt, %64, %81 : vector<1x32xi32>
    %83 = arith.andi %80, %82 : vector<1x32xi1>
    %cst_54 = arith.constant 0.000000e+00 : f32
    %84 = vector.shape_cast %83 : vector<1x32xi1> to vector<1x32xi1>
    %85 = vector.broadcast %84 : vector<1x32xi1> to vector<5x32xi1>
    %86 = vector.broadcast %cst_54 : f32 to vector<5x32xf32>
    %87 = arith.select %85, %61, %86 : vector<5x32xi1>, vector<5x32xf32>
    %88 = arith.truncf %78 : vector<5x5xf32> to vector<5x5xbf16>
    %89 = arith.truncf %87 : vector<5x32xf32> to vector<5x32xbf16>
    %cst_55 = arith.constant dense<0.000000e+00> : vector<5x32xf32>
    %90 = tpu.matmul %88, %89, %cst_55 {dimension_numbers = #tpu.dot_dimension_numbers<[1], [0], [0], [1], [0, 0, 1, 1], [], []>} : vector<5x5xbf16>, vector<5x32xbf16>, vector<5x32xf32> -> vector<5x32xf32>
    %91 = arith.addf %65, %90 : vector<5x32xf32>
    %92 = vector.extract_strided_slice %62 {offsets = [0, 8], sizes = [5, 8], strides = [1, 1]} : vector<5x32xbf16> to vector<5x8xbf16>
    %93 = vector.extract_strided_slice %63 {offsets = [0, 8], sizes = [5, 8], strides = [1, 1]} : vector<5x32xbf16> to vector<5x8xbf16>
    %cst_56 = arith.constant dense<0.000000e+00> : vector<5x5xf32>
    %94 = tpu.matmul %92, %93, %cst_56 {dimension_numbers = #tpu.dot_dimension_numbers<[1], [1], [0], [0], [0, 0, 1, 0], [], []>} : vector<5x8xbf16>, vector<5x8xbf16>, vector<5x5xf32> -> vector<5x5xf32>
    %cst_57 = arith.constant dense<0xFF800000> : vector<5xf32>
    %95 = vector.multi_reduction <maximumf>, %94, %cst_57 [1] : vector<5x5xf32> to vector<5xf32>
    %96 = vector.shape_cast %95 : vector<5xf32> to vector<5x1xf32>
    %97 = vector.broadcast %96 : vector<5x1xf32> to vector<5x5xf32>
    %98 = arith.subf %94, %97 : vector<5x5xf32>
    %99 = math.exp %98 : vector<5x5xf32>
    %cst_58 = arith.constant dense<0.000000e+00> : vector<5xf32>
    %100 = vector.multi_reduction <add>, %99, %cst_58 [1] : vector<5x5xf32> to vector<5xf32>
    %101 = vector.shape_cast %100 : vector<5xf32> to vector<5x1xf32>
    %102 = tpu.reciprocal %101 {approx = true} : vector<5x1xf32> -> vector<5x1xf32>
    %103 = vector.broadcast %102 : vector<5x1xf32> to vector<5x5xf32>
    %104 = arith.mulf %99, %103 : vector<5x5xf32>
    %c8_i32_59 = arith.constant 8 : i32
    %105 = vector.broadcast %c8_i32_59 : i32 to vector<1x32xi32>
    %106 = arith.cmpi sge, %64, %105 : vector<1x32xi32>
    %c16_i32 = arith.constant 16 : i32
    %107 = vector.broadcast %c16_i32 : i32 to vector<1x32xi32>
    %108 = arith.cmpi slt, %64, %107 : vector<1x32xi32>
    %109 = arith.andi %106, %108 : vector<1x32xi1>
    %cst_60 = arith.constant 0.000000e+00 : f32
    %110 = vector.shape_cast %109 : vector<1x32xi1> to vector<1x32xi1>
    %111 = vector.broadcast %110 : vector<1x32xi1> to vector<5x32xi1>
    %112 = vector.broadcast %cst_60 : f32 to vector<5x32xf32>
    %113 = arith.select %111, %61, %112 : vector<5x32xi1>, vector<5x32xf32>
    %114 = arith.truncf %104 : vector<5x5xf32> to vector<5x5xbf16>
    %115 = arith.truncf %113 : vector<5x32xf32> to vector<5x32xbf16>
    %cst_61 = arith.constant dense<0.000000e+00> : vector<5x32xf32>
    %116 = tpu.matmul %114, %115, %cst_61 {dimension_numbers = #tpu.dot_dimension_numbers<[1], [0], [0], [1], [0, 0, 1, 1], [], []>} : vector<5x5xbf16>, vector<5x32xbf16>, vector<5x32xf32> -> vector<5x32xf32>
    %117 = arith.addf %91, %116 : vector<5x32xf32>
    %118 = vector.extract_strided_slice %62 {offsets = [0, 16], sizes = [5, 8], strides = [1, 1]} : vector<5x32xbf16> to vector<5x8xbf16>
    %119 = vector.extract_strided_slice %63 {offsets = [0, 16], sizes = [5, 8], strides = [1, 1]} : vector<5x32xbf16> to vector<5x8xbf16>
    %cst_62 = arith.constant dense<0.000000e+00> : vector<5x5xf32>
    %120 = tpu.matmul %118, %119, %cst_62 {dimension_numbers = #tpu.dot_dimension_numbers<[1], [1], [0], [0], [0, 0, 1, 0], [], []>} : vector<5x8xbf16>, vector<5x8xbf16>, vector<5x5xf32> -> vector<5x5xf32>
    %cst_63 = arith.constant dense<0xFF800000> : vector<5xf32>
    %121 = vector.multi_reduction <maximumf>, %120, %cst_63 [1] : vector<5x5xf32> to vector<5xf32>
    %122 = vector.shape_cast %121 : vector<5xf32> to vector<5x1xf32>
    %123 = vector.broadcast %122 : vector<5x1xf32> to vector<5x5xf32>
    %124 = arith.subf %120, %123 : vector<5x5xf32>
    %125 = math.exp %124 : vector<5x5xf32>
    %cst_64 = arith.constant dense<0.000000e+00> : vector<5xf32>
    %126 = vector.multi_reduction <add>, %125, %cst_64 [1] : vector<5x5xf32> to vector<5xf32>
    %127 = vector.shape_cast %126 : vector<5xf32> to vector<5x1xf32>
    %128 = tpu.reciprocal %127 {approx = true} : vector<5x1xf32> -> vector<5x1xf32>
    %129 = vector.broadcast %128 : vector<5x1xf32> to vector<5x5xf32>
    %130 = arith.mulf %125, %129 : vector<5x5xf32>
    %c16_i32_65 = arith.constant 16 : i32
    %131 = vector.broadcast %c16_i32_65 : i32 to vector<1x32xi32>
    %132 = arith.cmpi sge, %64, %131 : vector<1x32xi32>
    %c24_i32 = arith.constant 24 : i32
    %133 = vector.broadcast %c24_i32 : i32 to vector<1x32xi32>
    %134 = arith.cmpi slt, %64, %133 : vector<1x32xi32>
    %135 = arith.andi %132, %134 : vector<1x32xi1>
    %cst_66 = arith.constant 0.000000e+00 : f32
    %136 = vector.shape_cast %135 : vector<1x32xi1> to vector<1x32xi1>
    %137 = vector.broadcast %136 : vector<1x32xi1> to vector<5x32xi1>
    %138 = vector.broadcast %cst_66 : f32 to vector<5x32xf32>
    %139 = arith.select %137, %61, %138 : vector<5x32xi1>, vector<5x32xf32>
    %140 = arith.truncf %130 : vector<5x5xf32> to vector<5x5xbf16>
    %141 = arith.truncf %139 : vector<5x32xf32> to vector<5x32xbf16>
    %cst_67 = arith.constant dense<0.000000e+00> : vector<5x32xf32>
    %142 = tpu.matmul %140, %141, %cst_67 {dimension_numbers = #tpu.dot_dimension_numbers<[1], [0], [0], [1], [0, 0, 1, 1], [], []>} : vector<5x5xbf16>, vector<5x32xbf16>, vector<5x32xf32> -> vector<5x32xf32>
    %143 = arith.addf %117, %142 : vector<5x32xf32>
    %144 = vector.extract_strided_slice %62 {offsets = [0, 24], sizes = [5, 8], strides = [1, 1]} : vector<5x32xbf16> to vector<5x8xbf16>
    %145 = vector.extract_strided_slice %63 {offsets = [0, 24], sizes = [5, 8], strides = [1, 1]} : vector<5x32xbf16> to vector<5x8xbf16>
    %cst_68 = arith.constant dense<0.000000e+00> : vector<5x5xf32>
    %146 = tpu.matmul %144, %145, %cst_68 {dimension_numbers = #tpu.dot_dimension_numbers<[1], [1], [0], [0], [0, 0, 1, 0], [], []>} : vector<5x8xbf16>, vector<5x8xbf16>, vector<5x5xf32> -> vector<5x5xf32>
    %cst_69 = arith.constant dense<0xFF800000> : vector<5xf32>
    %147 = vector.multi_reduction <maximumf>, %146, %cst_69 [1] : vector<5x5xf32> to vector<5xf32>
    %148 = vector.shape_cast %147 : vector<5xf32> to vector<5x1xf32>
    %149 = vector.broadcast %148 : vector<5x1xf32> to vector<5x5xf32>
    %150 = arith.subf %146, %149 : vector<5x5xf32>
    %151 = math.exp %150 : vector<5x5xf32>
    %cst_70 = arith.constant dense<0.000000e+00> : vector<5xf32>
    %152 = vector.multi_reduction <add>, %151, %cst_70 [1] : vector<5x5xf32> to vector<5xf32>
    %153 = vector.shape_cast %152 : vector<5xf32> to vector<5x1xf32>
    %154 = tpu.reciprocal %153 {approx = true} : vector<5x1xf32> -> vector<5x1xf32>
    %155 = vector.broadcast %154 : vector<5x1xf32> to vector<5x5xf32>
    %156 = arith.mulf %151, %155 : vector<5x5xf32>
    %c24_i32_71 = arith.constant 24 : i32
    %157 = vector.broadcast %c24_i32_71 : i32 to vector<1x32xi32>
    %158 = arith.cmpi sge, %64, %157 : vector<1x32xi32>
    %c32_i32 = arith.constant 32 : i32
    %159 = vector.broadcast %c32_i32 : i32 to vector<1x32xi32>
    %160 = arith.cmpi slt, %64, %159 : vector<1x32xi32>
    %161 = arith.andi %158, %160 : vector<1x32xi1>
    %cst_72 = arith.constant 0.000000e+00 : f32
    %162 = vector.shape_cast %161 : vector<1x32xi1> to vector<1x32xi1>
    %163 = vector.broadcast %162 : vector<1x32xi1> to vector<5x32xi1>
    %164 = vector.broadcast %cst_72 : f32 to vector<5x32xf32>
    %165 = arith.select %163, %61, %164 : vector<5x32xi1>, vector<5x32xf32>
    %166 = arith.truncf %156 : vector<5x5xf32> to vector<5x5xbf16>
    %167 = arith.truncf %165 : vector<5x32xf32> to vector<5x32xbf16>
    %cst_73 = arith.constant dense<0.000000e+00> : vector<5x32xf32>
    %168 = tpu.matmul %166, %167, %cst_73 {dimension_numbers = #tpu.dot_dimension_numbers<[1], [0], [0], [1], [0, 0, 1, 1], [], []>} : vector<5x5xbf16>, vector<5x32xbf16>, vector<5x32xf32> -> vector<5x32xf32>
    %169 = arith.addf %143, %168 : vector<5x32xf32>
    %170 = arith.truncf %169 : vector<5x32xf32> to vector<5x32xbf16>
    %cst_74 = arith.constant dense<0.000000e+00> : vector<5x32xf32>
    %171 = tpu.matmul %170, %12, %cst_74 {dimension_numbers = #tpu.dot_dimension_numbers<[1], [0], [0], [1], [0, 0, 1, 1], [], []>} : vector<5x32xbf16>, vector<32x32xbf16>, vector<5x32xf32> -> vector<5x32xf32>
    %172 = vector.broadcast %14 : vector<1x32xf32> to vector<5x32xf32>
    %173 = arith.addf %171, %172 : vector<5x32xf32>
    %174 = arith.addf %6, %173 : vector<5x32xf32>
    %cst_75 = arith.constant dense<0.000000e+00> : vector<5xf32>
    %175 = vector.multi_reduction <add>, %174, %cst_75 [1] : vector<5x32xf32> to vector<5xf32>
    %176 = vector.shape_cast %175 : vector<5xf32> to vector<5x1xf32>
    %cst_76 = arith.constant 3.200000e+01 : f32
    %177 = vector.broadcast %cst_76 : f32 to vector<5x1xf32>
    %178 = arith.divf %176, %177 : vector<5x1xf32>
    %179 = vector.broadcast %178 : vector<5x1xf32> to vector<5x32xf32>
    %180 = arith.subf %174, %179 : vector<5x32xf32>
    %181 = arith.mulf %180, %180 : vector<5x32xf32>
    %cst_77 = arith.constant dense<0.000000e+00> : vector<5xf32>
    %182 = vector.multi_reduction <add>, %181, %cst_77 [1] : vector<5x32xf32> to vector<5xf32>
    %183 = vector.shape_cast %182 : vector<5xf32> to vector<5x1xf32>
    %cst_78 = arith.constant 3.200000e+01 : f32
    %184 = vector.broadcast %cst_78 : f32 to vector<5x1xf32>
    %185 = arith.divf %183, %184 : vector<5x1xf32>
    %186 = vector.broadcast %178 : vector<5x1xf32> to vector<5x32xf32>
    %187 = arith.subf %174, %186 : vector<5x32xf32>
    %cst_79 = arith.constant 9.99999996E-13 : f32
    %188 = vector.broadcast %cst_79 : f32 to vector<5x1xf32>
    %189 = arith.addf %185, %188 : vector<5x1xf32>
    %190 = math.rsqrt %189 : vector<5x1xf32>
    %191 = vector.broadcast %190 : vector<5x1xf32> to vector<5x32xf32>
    %192 = arith.mulf %187, %191 : vector<5x32xf32>
    %193 = vector.broadcast %28 : vector<1x32xf32> to vector<5x32xf32>
    %194 = arith.mulf %192, %193 : vector<5x32xf32>
    %195 = vector.broadcast %30 : vector<1x32xf32> to vector<5x32xf32>
    %196 = arith.addf %194, %195 : vector<5x32xf32>
    %197 = arith.truncf %196 : vector<5x32xf32> to vector<5x32xbf16>
    %cst_80 = arith.constant dense<0.000000e+00> : vector<5x128xf32>
    %198 = tpu.matmul %197, %20, %cst_80 {dimension_numbers = #tpu.dot_dimension_numbers<[1], [0], [0], [1], [0, 0, 1, 1], [], []>} : vector<5x32xbf16>, vector<32x128xbf16>, vector<5x128xf32> -> vector<5x128xf32>
    %199 = vector.broadcast %22 : vector<1x128xf32> to vector<5x128xf32>
    %200 = arith.addf %198, %199 : vector<5x128xf32>
    %cst_81 = arith.constant 5.000000e-01 : f32
    %201 = vector.broadcast %cst_81 : f32 to vector<5x128xf32>
    %202 = arith.mulf %201, %200 : vector<5x128xf32>
    %cst_82 = arith.constant 4.471500e-02 : f32
    %203 = vector.broadcast %cst_82 : f32 to vector<5x128xf32>
    %204 = arith.mulf %203, %200 : vector<5x128xf32>
    %205 = arith.mulf %204, %200 : vector<5x128xf32>
    %206 = arith.mulf %205, %200 : vector<5x128xf32>
    %207 = arith.addf %200, %206 : vector<5x128xf32>
    %cst_83 = arith.constant 0.797884583 : f32
    %208 = vector.broadcast %cst_83 : f32 to vector<5x128xf32>
    %209 = arith.mulf %208, %207 : vector<5x128xf32>
    %210 = math.tanh %209 : vector<5x128xf32>
    %cst_84 = arith.constant 1.000000e+00 : f32
    %211 = vector.broadcast %cst_84 : f32 to vector<5x128xf32>
    %212 = arith.addf %211, %210 : vector<5x128xf32>
    %213 = arith.mulf %202, %212 : vector<5x128xf32>
    %214 = arith.truncf %213 : vector<5x128xf32> to vector<5x128xbf16>
    %cst_85 = arith.constant dense<0.000000e+00> : vector<5x32xf32>
    %215 = tpu.matmul %214, %24, %cst_85 {dimension_numbers = #tpu.dot_dimension_numbers<[1], [0], [0], [1], [0, 0, 1, 1], [], []>} : vector<5x128xbf16>, vector<128x32xbf16>, vector<5x32xf32> -> vector<5x32xf32>
    %216 = vector.broadcast %26 : vector<1x32xf32> to vector<5x32xf32>
    %217 = arith.addf %215, %216 : vector<5x32xf32>
    %218 = arith.addf %174, %217 : vector<5x32xf32>
    %c1 = arith.constant 1 : index
    %c0_86 = arith.constant 0 : index
    %c0_87 = arith.constant 0 : index
    %219 = vector.load %arg4[%c1, %c0_86, %c0_87] : memref<2x32x96xbf16, #tpu.memory_space<vmem>>, vector<1x32x96xbf16>
    %220 = vector.shape_cast %219 : vector<1x32x96xbf16> to vector<32x96xbf16>
    %c1_88 = arith.constant 1 : index
    %c0_89 = arith.constant 0 : index
    %c0_90 = arith.constant 0 : index
    %221 = vector.load %arg5[%c1_88, %c0_89, %c0_90] : memref<2x1x96xf32, #tpu.memory_space<vmem>>, vector<1x1x96xf32>
    %222 = vector.shape_cast %221 : vector<1x1x96xf32> to vector<1x96xf32>
    %c1_91 = arith.constant 1 : index
    %c0_92 = arith.constant 0 : index
    %c0_93 = arith.constant 0 : index
    %223 = vector.load %arg6[%c1_91, %c0_92, %c0_93] : memref<2x32x32xbf16, #tpu.memory_space<vmem>>, vector<1x32x32xbf16>
    %224 = vector.shape_cast %223 : vector<1x32x32xbf16> to vector<32x32xbf16>
    %c1_94 = arith.constant 1 : index
    %c0_95 = arith.constant 0 : index
    %c0_96 = arith.constant 0 : index
    %225 = vector.load %arg7[%c1_94, %c0_95, %c0_96] : memref<2x1x32xf32, #tpu.memory_space<vmem>>, vector<1x1x32xf32>
    %226 = vector.shape_cast %225 : vector<1x1x32xf32> to vector<1x32xf32>
    %c1_97 = arith.constant 1 : index
    %c0_98 = arith.constant 0 : index
    %c0_99 = arith.constant 0 : index
    %227 = vector.load %arg8[%c1_97, %c0_98, %c0_99] : memref<2x1x32xf32, #tpu.memory_space<vmem>>, vector<1x1x32xf32>
    %228 = vector.shape_cast %227 : vector<1x1x32xf32> to vector<1x32xf32>
    %c1_100 = arith.constant 1 : index
    %c0_101 = arith.constant 0 : index
    %c0_102 = arith.constant 0 : index
    %229 = vector.load %arg9[%c1_100, %c0_101, %c0_102] : memref<2x1x32xf32, #tpu.memory_space<vmem>>, vector<1x1x32xf32>
    %230 = vector.shape_cast %229 : vector<1x1x32xf32> to vector<1x32xf32>
    %c1_103 = arith.constant 1 : index
    %c0_104 = arith.constant 0 : index
    %c0_105 = arith.constant 0 : index
    %231 = vector.load %arg10[%c1_103, %c0_104, %c0_105] : memref<2x32x128xbf16, #tpu.memory_space<vmem>>, vector<1x32x128xbf16>
    %232 = vector.shape_cast %231 : vector<1x32x128xbf16> to vector<32x128xbf16>
    %c1_106 = arith.constant 1 : index
    %c0_107 = arith.constant 0 : index
    %c0_108 = arith.constant 0 : index
    %233 = vector.load %arg11[%c1_106, %c0_107, %c0_108] : memref<2x1x128xf32, #tpu.memory_space<vmem>>, vector<1x1x128xf32>
    %234 = vector.shape_cast %233 : vector<1x1x128xf32> to vector<1x128xf32>
    %c1_109 = arith.constant 1 : index
    %c0_110 = arith.constant 0 : index
    %c0_111 = arith.constant 0 : index
    %235 = vector.load %arg12[%c1_109, %c0_110, %c0_111] : memref<2x128x32xbf16, #tpu.memory_space<vmem>>, vector<1x128x32xbf16>
    %236 = vector.shape_cast %235 : vector<1x128x32xbf16> to vector<128x32xbf16>
    %c1_112 = arith.constant 1 : index
    %c0_113 = arith.constant 0 : index
    %c0_114 = arith.constant 0 : index
    %237 = vector.load %arg13[%c1_112, %c0_113, %c0_114] : memref<2x1x32xf32, #tpu.memory_space<vmem>>, vector<1x1x32xf32>
    %238 = vector.shape_cast %237 : vector<1x1x32xf32> to vector<1x32xf32>
    %c1_115 = arith.constant 1 : index
    %c0_116 = arith.constant 0 : index
    %c0_117 = arith.constant 0 : index
    %239 = vector.load %arg14[%c1_115, %c0_116, %c0_117] : memref<2x1x32xf32, #tpu.memory_space<vmem>>, vector<1x1x32xf32>
    %240 = vector.shape_cast %239 : vector<1x1x32xf32> to vector<1x32xf32>
    %c1_118 = arith.constant 1 : index
    %c0_119 = arith.constant 0 : index
    %c0_120 = arith.constant 0 : index
    %241 = vector.load %arg15[%c1_118, %c0_119, %c0_120] : memref<2x1x32xf32, #tpu.memory_space<vmem>>, vector<1x1x32xf32>
    %242 = vector.shape_cast %241 : vector<1x1x32xf32> to vector<1x32xf32>
    %cst_121 = arith.constant dense<0.000000e+00> : vector<5xf32>
    %243 = vector.multi_reduction <add>, %218, %cst_121 [1] : vector<5x32xf32> to vector<5xf32>
    %244 = vector.shape_cast %243 : vector<5xf32> to vector<5x1xf32>
    %cst_122 = arith.constant 3.200000e+01 : f32
    %245 = vector.broadcast %cst_122 : f32 to vector<5x1xf32>
    %246 = arith.divf %244, %245 : vector<5x1xf32>
    %247 = vector.broadcast %246 : vector<5x1xf32> to vector<5x32xf32>
    %248 = arith.subf %218, %247 : vector<5x32xf32>
    %249 = arith.mulf %248, %248 : vector<5x32xf32>
    %cst_123 = arith.constant dense<0.000000e+00> : vector<5xf32>
    %250 = vector.multi_reduction <add>, %249, %cst_123 [1] : vector<5x32xf32> to vector<5xf32>
    %251 = vector.shape_cast %250 : vector<5xf32> to vector<5x1xf32>
    %cst_124 = arith.constant 3.200000e+01 : f32
    %252 = vector.broadcast %cst_124 : f32 to vector<5x1xf32>
    %253 = arith.divf %251, %252 : vector<5x1xf32>
    %254 = vector.broadcast %246 : vector<5x1xf32> to vector<5x32xf32>
    %255 = arith.subf %218, %254 : vector<5x32xf32>
    %cst_125 = arith.constant 9.99999996E-13 : f32
    %256 = vector.broadcast %cst_125 : f32 to vector<5x1xf32>
    %257 = arith.addf %253, %256 : vector<5x1xf32>
    %258 = math.rsqrt %257 : vector<5x1xf32>
    %259 = vector.broadcast %258 : vector<5x1xf32> to vector<5x32xf32>
    %260 = arith.mulf %255, %259 : vector<5x32xf32>
    %261 = vector.broadcast %228 : vector<1x32xf32> to vector<5x32xf32>
    %262 = arith.mulf %260, %261 : vector<5x32xf32>
    %263 = vector.broadcast %230 : vector<1x32xf32> to vector<5x32xf32>
    %264 = arith.addf %262, %263 : vector<5x32xf32>
    %265 = arith.truncf %264 : vector<5x32xf32> to vector<5x32xbf16>
    %cst_126 = arith.constant dense<0.000000e+00> : vector<5x96xf32>
    %266 = tpu.matmul %265, %220, %cst_126 {dimension_numbers = #tpu.dot_dimension_numbers<[1], [0], [0], [1], [0, 0, 1, 1], [], []>} : vector<5x32xbf16>, vector<32x96xbf16>, vector<5x96xf32> -> vector<5x96xf32>
    %267 = vector.broadcast %222 : vector<1x96xf32> to vector<5x96xf32>
    %268 = arith.addf %266, %267 : vector<5x96xf32>
    %269 = vector.extract_strided_slice %268 {offsets = [0, 0], sizes = [5, 32], strides = [1, 1]} : vector<5x96xf32> to vector<5x32xf32>
    %cst_127 = arith.constant 0.353553385 : f32
    %270 = vector.broadcast %cst_127 : f32 to vector<5x32xf32>
    %271 = arith.mulf %269, %270 : vector<5x32xf32>
    %272 = vector.extract_strided_slice %268 {offsets = [0, 32], sizes = [5, 32], strides = [1, 1]} : vector<5x96xf32> to vector<5x32xf32>
    %273 = vector.extract_strided_slice %268 {offsets = [0, 64], sizes = [5, 32], strides = [1, 1]} : vector<5x96xf32> to vector<5x32xf32>
    %274 = arith.truncf %271 : vector<5x32xf32> to vector<5x32xbf16>
    %275 = arith.truncf %272 : vector<5x32xf32> to vector<5x32xbf16>
    %276 = tpu.iota {dimensions = array<i32: 1>} : vector<1x32xi32>
    %cst_128 = arith.constant 0.000000e+00 : f32
    %277 = vector.broadcast %cst_128 : f32 to vector<5x32xf32>
    %278 = vector.extract_strided_slice %274 {offsets = [0, 0], sizes = [5, 8], strides = [1, 1]} : vector<5x32xbf16> to vector<5x8xbf16>
    %279 = vector.extract_strided_slice %275 {offsets = [0, 0], sizes = [5, 8], strides = [1, 1]} : vector<5x32xbf16> to vector<5x8xbf16>
    %cst_129 = arith.constant dense<0.000000e+00> : vector<5x5xf32>
    %280 = tpu.matmul %278, %279, %cst_129 {dimension_numbers = #tpu.dot_dimension_numbers<[1], [1], [0], [0], [0, 0, 1, 0], [], []>} : vector<5x8xbf16>, vector<5x8xbf16>, vector<5x5xf32> -> vector<5x5xf32>
    %cst_130 = arith.constant dense<0xFF800000> : vector<5xf32>
    %281 = vector.multi_reduction <maximumf>, %280, %cst_130 [1] : vector<5x5xf32> to vector<5xf32>
    %282 = vector.shape_cast %281 : vector<5xf32> to vector<5x1xf32>
    %283 = vector.broadcast %282 : vector<5x1xf32> to vector<5x5xf32>
    %284 = arith.subf %280, %283 : vector<5x5xf32>
    %285 = math.exp %284 : vector<5x5xf32>
    %cst_131 = arith.constant dense<0.000000e+00> : vector<5xf32>
    %286 = vector.multi_reduction <add>, %285, %cst_131 [1] : vector<5x5xf32> to vector<5xf32>
    %287 = vector.shape_cast %286 : vector<5xf32> to vector<5x1xf32>
    %288 = tpu.reciprocal %287 {approx = true} : vector<5x1xf32> -> vector<5x1xf32>
    %289 = vector.broadcast %288 : vector<5x1xf32> to vector<5x5xf32>
    %290 = arith.mulf %285, %289 : vector<5x5xf32>
    %c0_i32_132 = arith.constant 0 : i32
    %291 = vector.broadcast %c0_i32_132 : i32 to vector<1x32xi32>
    %292 = arith.cmpi sge, %276, %291 : vector<1x32xi32>
    %c8_i32_133 = arith.constant 8 : i32
    %293 = vector.broadcast %c8_i32_133 : i32 to vector<1x32xi32>
    %294 = arith.cmpi slt, %276, %293 : vector<1x32xi32>
    %295 = arith.andi %292, %294 : vector<1x32xi1>
    %cst_134 = arith.constant 0.000000e+00 : f32
    %296 = vector.shape_cast %295 : vector<1x32xi1> to vector<1x32xi1>
    %297 = vector.broadcast %296 : vector<1x32xi1> to vector<5x32xi1>
    %298 = vector.broadcast %cst_134 : f32 to vector<5x32xf32>
    %299 = arith.select %297, %273, %298 : vector<5x32xi1>, vector<5x32xf32>
    %300 = arith.truncf %290 : vector<5x5xf32> to vector<5x5xbf16>
    %301 = arith.truncf %299 : vector<5x32xf32> to vector<5x32xbf16>
    %cst_135 = arith.constant dense<0.000000e+00> : vector<5x32xf32>
    %302 = tpu.matmul %300, %301, %cst_135 {dimension_numbers = #tpu.dot_dimension_numbers<[1], [0], [0], [1], [0, 0, 1, 1], [], []>} : vector<5x5xbf16>, vector<5x32xbf16>, vector<5x32xf32> -> vector<5x32xf32>
    %303 = arith.addf %277, %302 : vector<5x32xf32>
    %304 = vector.extract_strided_slice %274 {offsets = [0, 8], sizes = [5, 8], strides = [1, 1]} : vector<5x32xbf16> to vector<5x8xbf16>
    %305 = vector.extract_strided_slice %275 {offsets = [0, 8], sizes = [5, 8], strides = [1, 1]} : vector<5x32xbf16> to vector<5x8xbf16>
    %cst_136 = arith.constant dense<0.000000e+00> : vector<5x5xf32>
    %306 = tpu.matmul %304, %305, %cst_136 {dimension_numbers = #tpu.dot_dimension_numbers<[1], [1], [0], [0], [0, 0, 1, 0], [], []>} : vector<5x8xbf16>, vector<5x8xbf16>, vector<5x5xf32> -> vector<5x5xf32>
    %cst_137 = arith.constant dense<0xFF800000> : vector<5xf32>
    %307 = vector.multi_reduction <maximumf>, %306, %cst_137 [1] : vector<5x5xf32> to vector<5xf32>
    %308 = vector.shape_cast %307 : vector<5xf32> to vector<5x1xf32>
    %309 = vector.broadcast %308 : vector<5x1xf32> to vector<5x5xf32>
    %310 = arith.subf %306, %309 : vector<5x5xf32>
    %311 = math.exp %310 : vector<5x5xf32>
    %cst_138 = arith.constant dense<0.000000e+00> : vector<5xf32>
    %312 = vector.multi_reduction <add>, %311, %cst_138 [1] : vector<5x5xf32> to vector<5xf32>
    %313 = vector.shape_cast %312 : vector<5xf32> to vector<5x1xf32>
    %314 = tpu.reciprocal %313 {approx = true} : vector<5x1xf32> -> vector<5x1xf32>
    %315 = vector.broadcast %314 : vector<5x1xf32> to vector<5x5xf32>
    %316 = arith.mulf %311, %315 : vector<5x5xf32>
    %c8_i32_139 = arith.constant 8 : i32
    %317 = vector.broadcast %c8_i32_139 : i32 to vector<1x32xi32>
    %318 = arith.cmpi sge, %276, %317 : vector<1x32xi32>
    %c16_i32_140 = arith.constant 16 : i32
    %319 = vector.broadcast %c16_i32_140 : i32 to vector<1x32xi32>
    %320 = arith.cmpi slt, %276, %319 : vector<1x32xi32>
    %321 = arith.andi %318, %320 : vector<1x32xi1>
    %cst_141 = arith.constant 0.000000e+00 : f32
    %322 = vector.shape_cast %321 : vector<1x32xi1> to vector<1x32xi1>
    %323 = vector.broadcast %322 : vector<1x32xi1> to vector<5x32xi1>
    %324 = vector.broadcast %cst_141 : f32 to vector<5x32xf32>
    %325 = arith.select %323, %273, %324 : vector<5x32xi1>, vector<5x32xf32>
    %326 = arith.truncf %316 : vector<5x5xf32> to vector<5x5xbf16>
    %327 = arith.truncf %325 : vector<5x32xf32> to vector<5x32xbf16>
    %cst_142 = arith.constant dense<0.000000e+00> : vector<5x32xf32>
    %328 = tpu.matmul %326, %327, %cst_142 {dimension_numbers = #tpu.dot_dimension_numbers<[1], [0], [0], [1], [0, 0, 1, 1], [], []>} : vector<5x5xbf16>, vector<5x32xbf16>, vector<5x32xf32> -> vector<5x32xf32>
    %329 = arith.addf %303, %328 : vector<5x32xf32>
    %330 = vector.extract_strided_slice %274 {offsets = [0, 16], sizes = [5, 8], strides = [1, 1]} : vector<5x32xbf16> to vector<5x8xbf16>
    %331 = vector.extract_strided_slice %275 {offsets = [0, 16], sizes = [5, 8], strides = [1, 1]} : vector<5x32xbf16> to vector<5x8xbf16>
    %cst_143 = arith.constant dense<0.000000e+00> : vector<5x5xf32>
    %332 = tpu.matmul %330, %331, %cst_143 {dimension_numbers = #tpu.dot_dimension_numbers<[1], [1], [0], [0], [0, 0, 1, 0], [], []>} : vector<5x8xbf16>, vector<5x8xbf16>, vector<5x5xf32> -> vector<5x5xf32>
    %cst_144 = arith.constant dense<0xFF800000> : vector<5xf32>
    %333 = vector.multi_reduction <maximumf>, %332, %cst_144 [1] : vector<5x5xf32> to vector<5xf32>
    %334 = vector.shape_cast %333 : vector<5xf32> to vector<5x1xf32>
    %335 = vector.broadcast %334 : vector<5x1xf32> to vector<5x5xf32>
    %336 = arith.subf %332, %335 : vector<5x5xf32>
    %337 = math.exp %336 : vector<5x5xf32>
    %cst_145 = arith.constant dense<0.000000e+00> : vector<5xf32>
    %338 = vector.multi_reduction <add>, %337, %cst_145 [1] : vector<5x5xf32> to vector<5xf32>
    %339 = vector.shape_cast %338 : vector<5xf32> to vector<5x1xf32>
    %340 = tpu.reciprocal %339 {approx = true} : vector<5x1xf32> -> vector<5x1xf32>
    %341 = vector.broadcast %340 : vector<5x1xf32> to vector<5x5xf32>
    %342 = arith.mulf %337, %341 : vector<5x5xf32>
    %c16_i32_146 = arith.constant 16 : i32
    %343 = vector.broadcast %c16_i32_146 : i32 to vector<1x32xi32>
    %344 = arith.cmpi sge, %276, %343 : vector<1x32xi32>
    %c24_i32_147 = arith.constant 24 : i32
    %345 = vector.broadcast %c24_i32_147 : i32 to vector<1x32xi32>
    %346 = arith.cmpi slt, %276, %345 : vector<1x32xi32>
    %347 = arith.andi %344, %346 : vector<1x32xi1>
    %cst_148 = arith.constant 0.000000e+00 : f32
    %348 = vector.shape_cast %347 : vector<1x32xi1> to vector<1x32xi1>
    %349 = vector.broadcast %348 : vector<1x32xi1> to vector<5x32xi1>
    %350 = vector.broadcast %cst_148 : f32 to vector<5x32xf32>
    %351 = arith.select %349, %273, %350 : vector<5x32xi1>, vector<5x32xf32>
    %352 = arith.truncf %342 : vector<5x5xf32> to vector<5x5xbf16>
    %353 = arith.truncf %351 : vector<5x32xf32> to vector<5x32xbf16>
    %cst_149 = arith.constant dense<0.000000e+00> : vector<5x32xf32>
    %354 = tpu.matmul %352, %353, %cst_149 {dimension_numbers = #tpu.dot_dimension_numbers<[1], [0], [0], [1], [0, 0, 1, 1], [], []>} : vector<5x5xbf16>, vector<5x32xbf16>, vector<5x32xf32> -> vector<5x32xf32>
    %355 = arith.addf %329, %354 : vector<5x32xf32>
    %356 = vector.extract_strided_slice %274 {offsets = [0, 24], sizes = [5, 8], strides = [1, 1]} : vector<5x32xbf16> to vector<5x8xbf16>
    %357 = vector.extract_strided_slice %275 {offsets = [0, 24], sizes = [5, 8], strides = [1, 1]} : vector<5x32xbf16> to vector<5x8xbf16>
    %cst_150 = arith.constant dense<0.000000e+00> : vector<5x5xf32>
    %358 = tpu.matmul %356, %357, %cst_150 {dimension_numbers = #tpu.dot_dimension_numbers<[1], [1], [0], [0], [0, 0, 1, 0], [], []>} : vector<5x8xbf16>, vector<5x8xbf16>, vector<5x5xf32> -> vector<5x5xf32>
    %cst_151 = arith.constant dense<0xFF800000> : vector<5xf32>
    %359 = vector.multi_reduction <maximumf>, %358, %cst_151 [1] : vector<5x5xf32> to vector<5xf32>
    %360 = vector.shape_cast %359 : vector<5xf32> to vector<5x1xf32>
    %361 = vector.broadcast %360 : vector<5x1xf32> to vector<5x5xf32>
    %362 = arith.subf %358, %361 : vector<5x5xf32>
    %363 = math.exp %362 : vector<5x5xf32>
    %cst_152 = arith.constant dense<0.000000e+00> : vector<5xf32>
    %364 = vector.multi_reduction <add>, %363, %cst_152 [1] : vector<5x5xf32> to vector<5xf32>
    %365 = vector.shape_cast %364 : vector<5xf32> to vector<5x1xf32>
    %366 = tpu.reciprocal %365 {approx = true} : vector<5x1xf32> -> vector<5x1xf32>
    %367 = vector.broadcast %366 : vector<5x1xf32> to vector<5x5xf32>
    %368 = arith.mulf %363, %367 : vector<5x5xf32>
    %c24_i32_153 = arith.constant 24 : i32
    %369 = vector.broadcast %c24_i32_153 : i32 to vector<1x32xi32>
    %370 = arith.cmpi sge, %276, %369 : vector<1x32xi32>
    %c32_i32_154 = arith.constant 32 : i32
    %371 = vector.broadcast %c32_i32_154 : i32 to vector<1x32xi32>
    %372 = arith.cmpi slt, %276, %371 : vector<1x32xi32>
    %373 = arith.andi %370, %372 : vector<1x32xi1>
    %cst_155 = arith.constant 0.000000e+00 : f32
    %374 = vector.shape_cast %373 : vector<1x32xi1> to vector<1x32xi1>
    %375 = vector.broadcast %374 : vector<1x32xi1> to vector<5x32xi1>
    %376 = vector.broadcast %cst_155 : f32 to vector<5x32xf32>
    %377 = arith.select %375, %273, %376 : vector<5x32xi1>, vector<5x32xf32>
    %378 = arith.truncf %368 : vector<5x5xf32> to vector<5x5xbf16>
    %379 = arith.truncf %377 : vector<5x32xf32> to vector<5x32xbf16>
    %cst_156 = arith.constant dense<0.000000e+00> : vector<5x32xf32>
    %380 = tpu.matmul %378, %379, %cst_156 {dimension_numbers = #tpu.dot_dimension_numbers<[1], [0], [0], [1], [0, 0, 1, 1], [], []>} : vector<5x5xbf16>, vector<5x32xbf16>, vector<5x32xf32> -> vector<5x32xf32>
    %381 = arith.addf %355, %380 : vector<5x32xf32>
    %382 = arith.truncf %381 : vector<5x32xf32> to vector<5x32xbf16>
    %cst_157 = arith.constant dense<0.000000e+00> : vector<5x32xf32>
    %383 = tpu.matmul %382, %224, %cst_157 {dimension_numbers = #tpu.dot_dimension_numbers<[1], [0], [0], [1], [0, 0, 1, 1], [], []>} : vector<5x32xbf16>, vector<32x32xbf16>, vector<5x32xf32> -> vector<5x32xf32>
    %384 = vector.broadcast %226 : vector<1x32xf32> to vector<5x32xf32>
    %385 = arith.addf %383, %384 : vector<5x32xf32>
    %386 = arith.addf %218, %385 : vector<5x32xf32>
    %cst_158 = arith.constant dense<0.000000e+00> : vector<5xf32>
    %387 = vector.multi_reduction <add>, %386, %cst_158 [1] : vector<5x32xf32> to vector<5xf32>
    %388 = vector.shape_cast %387 : vector<5xf32> to vector<5x1xf32>
    %cst_159 = arith.constant 3.200000e+01 : f32
    %389 = vector.broadcast %cst_159 : f32 to vector<5x1xf32>
    %390 = arith.divf %388, %389 : vector<5x1xf32>
    %391 = vector.broadcast %390 : vector<5x1xf32> to vector<5x32xf32>
    %392 = arith.subf %386, %391 : vector<5x32xf32>
    %393 = arith.mulf %392, %392 : vector<5x32xf32>
    %cst_160 = arith.constant dense<0.000000e+00> : vector<5xf32>
    %394 = vector.multi_reduction <add>, %393, %cst_160 [1] : vector<5x32xf32> to vector<5xf32>
    %395 = vector.shape_cast %394 : vector<5xf32> to vector<5x1xf32>
    %cst_161 = arith.constant 3.200000e+01 : f32
    %396 = vector.broadcast %cst_161 : f32 to vector<5x1xf32>
    %397 = arith.divf %395, %396 : vector<5x1xf32>
    %398 = vector.broadcast %390 : vector<5x1xf32> to vector<5x32xf32>
    %399 = arith.subf %386, %398 : vector<5x32xf32>
    %cst_162 = arith.constant 9.99999996E-13 : f32
    %400 = vector.broadcast %cst_162 : f32 to vector<5x1xf32>
    %401 = arith.addf %397, %400 : vector<5x1xf32>
    %402 = math.rsqrt %401 : vector<5x1xf32>
    %403 = vector.broadcast %402 : vector<5x1xf32> to vector<5x32xf32>
    %404 = arith.mulf %399, %403 : vector<5x32xf32>
    %405 = vector.broadcast %240 : vector<1x32xf32> to vector<5x32xf32>
    %406 = arith.mulf %404, %405 : vector<5x32xf32>
    %407 = vector.broadcast %242 : vector<1x32xf32> to vector<5x32xf32>
    %408 = arith.addf %406, %407 : vector<5x32xf32>
    %409 = arith.truncf %408 : vector<5x32xf32> to vector<5x32xbf16>
    %cst_163 = arith.constant dense<0.000000e+00> : vector<5x128xf32>
    %410 = tpu.matmul %409, %232, %cst_163 {dimension_numbers = #tpu.dot_dimension_numbers<[1], [0], [0], [1], [0, 0, 1, 1], [], []>} : vector<5x32xbf16>, vector<32x128xbf16>, vector<5x128xf32> -> vector<5x128xf32>
    %411 = vector.broadcast %234 : vector<1x128xf32> to vector<5x128xf32>
    %412 = arith.addf %410, %411 : vector<5x128xf32>
    %cst_164 = arith.constant 5.000000e-01 : f32
    %413 = vector.broadcast %cst_164 : f32 to vector<5x128xf32>
    %414 = arith.mulf %413, %412 : vector<5x128xf32>
    %cst_165 = arith.constant 4.471500e-02 : f32
    %415 = vector.broadcast %cst_165 : f32 to vector<5x128xf32>
    %416 = arith.mulf %415, %412 : vector<5x128xf32>
    %417 = arith.mulf %416, %412 : vector<5x128xf32>
    %418 = arith.mulf %417, %412 : vector<5x128xf32>
    %419 = arith.addf %412, %418 : vector<5x128xf32>
    %cst_166 = arith.constant 0.797884583 : f32
    %420 = vector.broadcast %cst_166 : f32 to vector<5x128xf32>
    %421 = arith.mulf %420, %419 : vector<5x128xf32>
    %422 = math.tanh %421 : vector<5x128xf32>
    %cst_167 = arith.constant 1.000000e+00 : f32
    %423 = vector.broadcast %cst_167 : f32 to vector<5x128xf32>
    %424 = arith.addf %423, %422 : vector<5x128xf32>
    %425 = arith.mulf %414, %424 : vector<5x128xf32>
    %426 = arith.truncf %425 : vector<5x128xf32> to vector<5x128xbf16>
    %cst_168 = arith.constant dense<0.000000e+00> : vector<5x32xf32>
    %427 = tpu.matmul %426, %236, %cst_168 {dimension_numbers = #tpu.dot_dimension_numbers<[1], [0], [0], [1], [0, 0, 1, 1], [], []>} : vector<5x128xbf16>, vector<128x32xbf16>, vector<5x32xf32> -> vector<5x32xf32>
    %428 = vector.broadcast %238 : vector<1x32xf32> to vector<5x32xf32>
    %429 = arith.addf %427, %428 : vector<5x32xf32>
    %430 = arith.addf %386, %429 : vector<5x32xf32>
    %c0_169 = arith.constant 0 : index
    %c0_170 = arith.constant 0 : index
    %431 = vector.load %arg16[%c0_169, %c0_170] : memref<1x32xf32, #tpu.memory_space<vmem>>, vector<1x32xf32>
    %c0_171 = arith.constant 0 : index
    %c0_172 = arith.constant 0 : index
    %432 = vector.load %arg17[%c0_171, %c0_172] : memref<1x32xf32, #tpu.memory_space<vmem>>, vector<1x32xf32>
    %cst_173 = arith.constant dense<0.000000e+00> : vector<5xf32>
    %433 = vector.multi_reduction <add>, %430, %cst_173 [1] : vector<5x32xf32> to vector<5xf32>
    %434 = vector.shape_cast %433 : vector<5xf32> to vector<5x1xf32>
    %cst_174 = arith.constant 3.200000e+01 : f32
    %435 = vector.broadcast %cst_174 : f32 to vector<5x1xf32>
    %436 = arith.divf %434, %435 : vector<5x1xf32>
    %437 = vector.broadcast %436 : vector<5x1xf32> to vector<5x32xf32>
    %438 = arith.subf %430, %437 : vector<5x32xf32>
    %439 = arith.mulf %438, %438 : vector<5x32xf32>
    %cst_175 = arith.constant dense<0.000000e+00> : vector<5xf32>
    %440 = vector.multi_reduction <add>, %439, %cst_175 [1] : vector<5x32xf32> to vector<5xf32>
    %441 = vector.shape_cast %440 : vector<5xf32> to vector<5x1xf32>
    %cst_176 = arith.constant 3.200000e+01 : f32
    %442 = vector.broadcast %cst_176 : f32 to vector<5x1xf32>
    %443 = arith.divf %441, %442 : vector<5x1xf32>
    %444 = vector.broadcast %436 : vector<5x1xf32> to vector<5x32xf32>
    %445 = arith.subf %430, %444 : vector<5x32xf32>
    %cst_177 = arith.constant 9.99999996E-13 : f32
    %446 = vector.broadcast %cst_177 : f32 to vector<5x1xf32>
    %447 = arith.addf %443, %446 : vector<5x1xf32>
    %448 = math.rsqrt %447 : vector<5x1xf32>
    %449 = vector.broadcast %448 : vector<5x1xf32> to vector<5x32xf32>
    %450 = arith.mulf %445, %449 : vector<5x32xf32>
    %451 = vector.broadcast %431 : vector<1x32xf32> to vector<5x32xf32>
    %452 = arith.mulf %450, %451 : vector<5x32xf32>
    %453 = vector.broadcast %432 : vector<1x32xf32> to vector<5x32xf32>
    %454 = arith.addf %452, %453 : vector<5x32xf32>
    %c0_178 = arith.constant 0 : index
    %c0_179 = arith.constant 0 : index
    %c0_180 = arith.constant 0 : index
    %455 = vector.load %arg18[%c0_178, %c0_179, %c0_180] : memref<1x5x32xf32, #tpu.memory_space<vmem>>, vector<1x5x32xf32>
    %456 = vector.shape_cast %455 : vector<1x5x32xf32> to vector<5x32xf32>
    %457 = vector.shape_cast %454 : vector<5x32xf32> to vector<1x5x32xf32>
    tpu.vector_store %arg18[%c0_178, %c0_179, %c0_180], %457 {strides = array<i32>} : memref<1x5x32xf32, #tpu.memory_space<vmem>>, vector<1x5x32xf32>,
    return
  }
  func.func @transform_0(%arg0: i32) -> (i32, i32, i32) {
    %c0_i32 = arith.constant 0 : i32
    %c0_i32_0 = arith.constant 0 : i32
    %c0_i32_1 = arith.constant 0 : i32
    return %arg0, %c0_i32, %c0_i32_0 : i32, i32, i32
  }
  func.func @transform_1(%arg0: i32) -> (i32, i32, i32) {
    %c0_i32 = arith.constant 0 : i32
    %c0_i32_0 = arith.constant 0 : i32
    %c0_i32_1 = arith.constant 0 : i32
    %c0_i32_2 = arith.constant 0 : i32
    return %c0_i32, %c0_i32_0, %c0_i32_1 : i32, i32, i32
  }
  func.func @transform_2(%arg0: i32) -> (i32, i32) {
    %c0_i32 = arith.constant 0 : i32
    %c0_i32_0 = arith.constant 0 : i32
    %c0_i32_1 = arith.constant 0 : i32
    return %c0_i32, %c0_i32_0 : i32, i32
  }
  func.func @transform_3(%arg0: i32) -> (i32, i32, i32) {
    %c0_i32 = arith.constant 0 : i32
    %c0_i32_0 = arith.constant 0 : i32
    %c0_i32_1 = arith.constant 0 : i32
    %c0_i32_2 = arith.constant 0 : i32
    return %c0_i32, %c0_i32_0, %c0_i32_1 : i32, i32, i32
  }
  func.func @transform_4(%arg0: i32) -> (i32, i32, i32) {
    %c0_i32 = arith.constant 0 : i32
    %c0_i32_0 = arith.constant 0 : i32
    %c0_i32_1 = arith.constant 0 : i32
    %c0_i32_2 = arith.constant 0 : i32
    return %c0_i32, %c0_i32_0, %c0_i32_1 : i32, i32, i32
  }
  func.func @transform_5(%arg0: i32) -> (i32, i32, i32) {
    %c0_i32 = arith.constant 0 : i32
    %c0_i32_0 = arith.constant 0 : i32
    %c0_i32_1 = arith.constant 0 : i32
    %c0_i32_2 = arith.constant 0 : i32
    return %c0_i32, %c0_i32_0, %c0_i32_1 : i32, i32, i32
  }
  func.func @transform_6(%arg0: i32) -> (i32, i32, i32) {
    %c0_i32 = arith.constant 0 : i32
    %c0_i32_0 = arith.constant 0 : i32
    %c0_i32_1 = arith.constant 0 : i32
    %c0_i32_2 = arith.constant 0 : i32
    return %c0_i32, %c0_i32_0, %c0_i32_1 : i32, i32, i32
  }
  func.func @transform_7(%arg0: i32) -> (i32, i32, i32) {
    %c0_i32 = arith.constant 0 : i32
    %c0_i32_0 = arith.constant 0 : i32
    %c0_i32_1 = arith.constant 0 : i32
    %c0_i32_2 = arith.constant 0 : i32
    return %c0_i32, %c0_i32_0, %c0_i32_1 : i32, i32, i32
  }
  func.func @transform_8(%arg0: i32) -> (i32, i32, i32) {
    %c0_i32 = arith.constant 0 : i32
    %c0_i32_0 = arith.constant 0 : i32
    %c0_i32_1 = arith.constant 0 : i32
    %c0_i32_2 = arith.constant 0 : i32
    return %c0_i32, %c0_i32_0, %c0_i32_1 : i32, i32, i32
  }
  func.func @transform_9(%arg0: i32) -> (i32, i32, i32) {
    %c0_i32 = arith.constant 0 : i32
    %c0_i32_0 = arith.constant 0 : i32
    %c0_i32_1 = arith.constant 0 : i32
    %c0_i32_2 = arith.constant 0 : i32
    return %c0_i32, %c0_i32_0, %c0_i32_1 : i32, i32, i32
  }
  func.func @transform_10(%arg0: i32) -> (i32, i32, i32) {
    %c0_i32 = arith.constant 0 : i32
    %c0_i32_0 = arith.constant 0 : i32
    %c0_i32_1 = arith.constant 0 : i32
    %c0_i32_2 = arith.constant 0 : i32
    return %c0_i32, %c0_i32_0, %c0_i32_1 : i32, i32, i32
  }
  func.func @transform_11(%arg0: i32) -> (i32, i32, i32) {
    %c0_i32 = arith.constant 0 : i32
    %c0_i32_0 = arith.constant 0 : i32
    %c0_i32_1 = arith.constant 0 : i32
    %c0_i32_2 = arith.constant 0 : i32
    return %c0_i32, %c0_i32_0, %c0_i32_1 : i32, i32, i32
  }
  func.func @transform_12(%arg0: i32) -> (i32, i32, i32) {
    %c0_i32 = arith.constant 0 : i32
    %c0_i32_0 = arith.constant 0 : i32
    %c0_i32_1 = arith.constant 0 : i32
    %c0_i32_2 = arith.constant 0 : i32
    return %c0_i32, %c0_i32_0, %c0_i32_1 : i32, i32, i32
  }
  func.func @transform_13(%arg0: i32) -> (i32, i32, i32) {
    %c0_i32 = arith.constant 0 : i32
    %c0_i32_0 = arith.constant 0 : i32
    %c0_i32_1 = arith.constant 0 : i32
    %c0_i32_2 = arith.constant 0 : i32
    return %c0_i32, %c0_i32_0, %c0_i32_1 : i32, i32, i32
  }
  func.func @transform_14(%arg0: i32) -> (i32, i32, i32) {
    %c0_i32 = arith.constant 0 : i32
    %c0_i32_0 = arith.constant 0 : i32
    %c0_i32_1 = arith.constant 0 : i32
    %c0_i32_2 = arith.constant 0 : i32
    return %c0_i32, %c0_i32_0, %c0_i32_1 : i32, i32, i32
  }
  func.func @transform_15(%arg0: i32) -> (i32, i32) {
    %c0_i32 = arith.constant 0 : i32
    %c0_i32_0 = arith.constant 0 : i32
    %c0_i32_1 = arith.constant 0 : i32
    return %c0_i32, %c0_i32_0 : i32, i32
  }
  func.func @transform_16(%arg0: i32) -> (i32, i32) {
    %c0_i32 = arith.constant 0 : i32
    %c0_i32_0 = arith.constant 0 : i32
    %c0_i32_1 = arith.constant 0 : i32
    return %c0_i32, %c0_i32_0 : i32, i32
  }
  func.func @transform_17(%arg0: i32) -> (i32, i32, i32) {
    %c0_i32 = arith.constant 0 : i32
    %c0_i32_0 = arith.constant 0 : i32
    %c0_i32_1 = arith.constant 0 : i32
    return %arg0, %c0_i32, %c0_i32_0 : i32, i32, i32
  }
}

module attributes {stable_mosaic.version = 11 : i64} {
  func.func @_fusion_head_kernel(%arg0: i32, %arg1: memref<1x13x32xf32, #tpu.memory_space<vmem>>, %arg2: memref<1x1x13xf32, #tpu.memory_space<vmem>>, %arg3: memref<1x32xf32, #tpu.memory_space<vmem>>, %arg4: memref<1x32xf32, #tpu.memory_space<vmem>>, %arg5: memref<2x32x96xbf16, #tpu.memory_space<vmem>>, %arg6: memref<2x1x96xf32, #tpu.memory_space<vmem>>, %arg7: memref<2x32x32xbf16, #tpu.memory_space<vmem>>, %arg8: memref<2x1x32xf32, #tpu.memory_space<vmem>>, %arg9: memref<2x1x32xf32, #tpu.memory_space<vmem>>, %arg10: memref<2x1x32xf32, #tpu.memory_space<vmem>>, %arg11: memref<2x32x128xbf16, #tpu.memory_space<vmem>>, %arg12: memref<2x1x128xf32, #tpu.memory_space<vmem>>, %arg13: memref<2x128x32xbf16, #tpu.memory_space<vmem>>, %arg14: memref<2x1x32xf32, #tpu.memory_space<vmem>>, %arg15: memref<2x1x32xf32, #tpu.memory_space<vmem>>, %arg16: memref<2x1x32xf32, #tpu.memory_space<vmem>>, %arg17: memref<32x32xbf16, #tpu.memory_space<vmem>>, %arg18: memref<1x32xf32, #tpu.memory_space<vmem>>, %arg19: memref<32x64xbf16, #tpu.memory_space<vmem>>, %arg20: memref<1x64xf32, #tpu.memory_space<vmem>>, %arg21: memref<1x64xf32, #tpu.memory_space<vmem>>, %arg22: memref<1x64xf32, #tpu.memory_space<vmem>>, %arg23: memref<64x3xbf16, #tpu.memory_space<vmem>>, %arg24: memref<1x3xf32, #tpu.memory_space<vmem>>, %arg25: memref<1x1x3xf32, #tpu.memory_space<vmem>>) attributes {dimension_semantics = [#tpu.dimension_semantics<parallel>], iteration_bounds = array<i64: 2>, scalar_prefetch = 0 : i64, scratch_operands = 0 : i64, tpu.core_type = #tpu.core_type<tc>, window_params = [{transform_indices = @transform_0, window_bounds = array<i64: 1, 13, 32>}, {transform_indices = @transform_1, window_bounds = array<i64: 1, 1, 13>}, {pipeline_mode = #tpu.pipeline_mode<synchronous>, transform_indices = @transform_2, window_bounds = array<i64: 1, 32>}, {pipeline_mode = #tpu.pipeline_mode<synchronous>, transform_indices = @transform_3, window_bounds = array<i64: 1, 32>}, {pipeline_mode = #tpu.pipeline_mode<synchronous>, transform_indices = @transform_4, window_bounds = array<i64: 2, 32, 96>}, {pipeline_mode = #tpu.pipeline_mode<synchronous>, transform_indices = @transform_5, window_bounds = array<i64: 2, 1, 96>}, {pipeline_mode = #tpu.pipeline_mode<synchronous>, transform_indices = @transform_6, window_bounds = array<i64: 2, 32, 32>}, {pipeline_mode = #tpu.pipeline_mode<synchronous>, transform_indices = @transform_7, window_bounds = array<i64: 2, 1, 32>}, {pipeline_mode = #tpu.pipeline_mode<synchronous>, transform_indices = @transform_8, window_bounds = array<i64: 2, 1, 32>}, {pipeline_mode = #tpu.pipeline_mode<synchronous>, transform_indices = @transform_9, window_bounds = array<i64: 2, 1, 32>}, {pipeline_mode = #tpu.pipeline_mode<synchronous>, transform_indices = @transform_10, window_bounds = array<i64: 2, 32, 128>}, {pipeline_mode = #tpu.pipeline_mode<synchronous>, transform_indices = @transform_11, window_bounds = array<i64: 2, 1, 128>}, {pipeline_mode = #tpu.pipeline_mode<synchronous>, transform_indices = @transform_12, window_bounds = array<i64: 2, 128, 32>}, {pipeline_mode = #tpu.pipeline_mode<synchronous>, transform_indices = @transform_13, window_bounds = array<i64: 2, 1, 32>}, {pipeline_mode = #tpu.pipeline_mode<synchronous>, transform_indices = @transform_14, window_bounds = array<i64: 2, 1, 32>}, {pipeline_mode = #tpu.pipeline_mode<synchronous>, transform_indices = @transform_15, window_bounds = array<i64: 2, 1, 32>}, {pipeline_mode = #tpu.pipeline_mode<synchronous>, transform_indices = @transform_16, window_bounds = array<i64: 32, 32>}, {pipeline_mode = #tpu.pipeline_mode<synchronous>, transform_indices = @transform_17, window_bounds = array<i64: 1, 32>}, {pipeline_mode = #tpu.pipeline_mode<synchronous>, transform_indices = @transform_18, window_bounds = array<i64: 32, 64>}, {pipeline_mode = #tpu.pipeline_mode<synchronous>, transform_indices = @transform_19, window_bounds = array<i64: 1, 64>}, {pipeline_mode = #tpu.pipeline_mode<synchronous>, transform_indices = @transform_20, window_bounds = array<i64: 1, 64>}, {pipeline_mode = #tpu.pipeline_mode<synchronous>, transform_indices = @transform_21, window_bounds = array<i64: 1, 64>}, {pipeline_mode = #tpu.pipeline_mode<synchronous>, transform_indices = @transform_22, window_bounds = array<i64: 64, 3>}, {pipeline_mode = #tpu.pipeline_mode<synchronous>, transform_indices = @transform_23, window_bounds = array<i64: 1, 3>}, {transform_indices = @transform_24, window_bounds = array<i64: 1, 1, 3>}]} {
    %c0 = arith.constant 0 : index
    %c0_0 = arith.constant 0 : index
    %c0_1 = arith.constant 0 : index
    %0 = vector.load %arg1[%c0, %c0_0, %c0_1] : memref<1x13x32xf32, #tpu.memory_space<vmem>>, vector<1x13x32xf32>
    %1 = vector.shape_cast %0 : vector<1x13x32xf32> to vector<13x32xf32>
    %c0_2 = arith.constant 0 : index
    %c0_3 = arith.constant 0 : index
    %c0_4 = arith.constant 0 : index
    %2 = vector.load %arg2[%c0_2, %c0_3, %c0_4] : memref<1x1x13xf32, #tpu.memory_space<vmem>>, vector<1x1x13xf32>
    %3 = vector.shape_cast %2 : vector<1x1x13xf32> to vector<1x13xf32>
    %4 = tpu.iota {dimensions = array<i32: 0>} : vector<13x1xi32>
    %c0_5 = arith.constant 0 : index
    %c0_6 = arith.constant 0 : index
    %5 = vector.load %arg3[%c0_5, %c0_6] : memref<1x32xf32, #tpu.memory_space<vmem>>, vector<1x32xf32>
    %c0_7 = arith.constant 0 : index
    %c0_8 = arith.constant 0 : index
    %6 = vector.load %arg4[%c0_7, %c0_8] : memref<1x32xf32, #tpu.memory_space<vmem>>, vector<1x32xf32>
    %cst = arith.constant dense<0.000000e+00> : vector<13xf32>
    %7 = vector.multi_reduction <add>, %1, %cst [1] : vector<13x32xf32> to vector<13xf32>
    %8 = vector.shape_cast %7 : vector<13xf32> to vector<13x1xf32>
    %cst_9 = arith.constant 3.200000e+01 : f32
    %9 = vector.broadcast %cst_9 : f32 to vector<13x1xf32>
    %10 = arith.divf %8, %9 : vector<13x1xf32>
    %11 = vector.broadcast %10 : vector<13x1xf32> to vector<13x32xf32>
    %12 = arith.subf %1, %11 : vector<13x32xf32>
    %13 = arith.mulf %12, %12 : vector<13x32xf32>
    %cst_10 = arith.constant dense<0.000000e+00> : vector<13xf32>
    %14 = vector.multi_reduction <add>, %13, %cst_10 [1] : vector<13x32xf32> to vector<13xf32>
    %15 = vector.shape_cast %14 : vector<13xf32> to vector<13x1xf32>
    %cst_11 = arith.constant 3.200000e+01 : f32
    %16 = vector.broadcast %cst_11 : f32 to vector<13x1xf32>
    %17 = arith.divf %15, %16 : vector<13x1xf32>
    %18 = vector.broadcast %10 : vector<13x1xf32> to vector<13x32xf32>
    %19 = arith.subf %1, %18 : vector<13x32xf32>
    %cst_12 = arith.constant 9.99999996E-13 : f32
    %20 = vector.broadcast %cst_12 : f32 to vector<13x1xf32>
    %21 = arith.addf %17, %20 : vector<13x1xf32>
    %22 = math.rsqrt %21 : vector<13x1xf32>
    %23 = vector.broadcast %22 : vector<13x1xf32> to vector<13x32xf32>
    %24 = arith.mulf %19, %23 : vector<13x32xf32>
    %25 = vector.broadcast %5 : vector<1x32xf32> to vector<13x32xf32>
    %26 = arith.mulf %24, %25 : vector<13x32xf32>
    %27 = vector.broadcast %6 : vector<1x32xf32> to vector<13x32xf32>
    %28 = arith.addf %26, %27 : vector<13x32xf32>
    %c5_i32 = arith.constant 5 : i32
    %29 = vector.broadcast %c5_i32 : i32 to vector<13x1xi32>
    %30 = arith.cmpi sge, %4, %29 : vector<13x1xi32>
    %31 = vector.shape_cast %30 : vector<13x1xi1> to vector<13x1xi1>
    %32 = vector.broadcast %31 : vector<13x1xi1> to vector<13x32xi1>
    %33 = arith.select %32, %28, %1 : vector<13x32xi1>, vector<13x32xf32>
    %c0_13 = arith.constant 0 : index
    %c0_14 = arith.constant 0 : index
    %c0_15 = arith.constant 0 : index
    %34 = vector.load %arg5[%c0_13, %c0_14, %c0_15] : memref<2x32x96xbf16, #tpu.memory_space<vmem>>, vector<1x32x96xbf16>
    %35 = vector.shape_cast %34 : vector<1x32x96xbf16> to vector<32x96xbf16>
    %c0_16 = arith.constant 0 : index
    %c0_17 = arith.constant 0 : index
    %c0_18 = arith.constant 0 : index
    %36 = vector.load %arg6[%c0_16, %c0_17, %c0_18] : memref<2x1x96xf32, #tpu.memory_space<vmem>>, vector<1x1x96xf32>
    %37 = vector.shape_cast %36 : vector<1x1x96xf32> to vector<1x96xf32>
    %c0_19 = arith.constant 0 : index
    %c0_20 = arith.constant 0 : index
    %c0_21 = arith.constant 0 : index
    %38 = vector.load %arg7[%c0_19, %c0_20, %c0_21] : memref<2x32x32xbf16, #tpu.memory_space<vmem>>, vector<1x32x32xbf16>
    %39 = vector.shape_cast %38 : vector<1x32x32xbf16> to vector<32x32xbf16>
    %c0_22 = arith.constant 0 : index
    %c0_23 = arith.constant 0 : index
    %c0_24 = arith.constant 0 : index
    %40 = vector.load %arg8[%c0_22, %c0_23, %c0_24] : memref<2x1x32xf32, #tpu.memory_space<vmem>>, vector<1x1x32xf32>
    %41 = vector.shape_cast %40 : vector<1x1x32xf32> to vector<1x32xf32>
    %c0_25 = arith.constant 0 : index
    %c0_26 = arith.constant 0 : index
    %c0_27 = arith.constant 0 : index
    %42 = vector.load %arg9[%c0_25, %c0_26, %c0_27] : memref<2x1x32xf32, #tpu.memory_space<vmem>>, vector<1x1x32xf32>
    %43 = vector.shape_cast %42 : vector<1x1x32xf32> to vector<1x32xf32>
    %c0_28 = arith.constant 0 : index
    %c0_29 = arith.constant 0 : index
    %c0_30 = arith.constant 0 : index
    %44 = vector.load %arg10[%c0_28, %c0_29, %c0_30] : memref<2x1x32xf32, #tpu.memory_space<vmem>>, vector<1x1x32xf32>
    %45 = vector.shape_cast %44 : vector<1x1x32xf32> to vector<1x32xf32>
    %c0_31 = arith.constant 0 : index
    %c0_32 = arith.constant 0 : index
    %c0_33 = arith.constant 0 : index
    %46 = vector.load %arg11[%c0_31, %c0_32, %c0_33] : memref<2x32x128xbf16, #tpu.memory_space<vmem>>, vector<1x32x128xbf16>
    %47 = vector.shape_cast %46 : vector<1x32x128xbf16> to vector<32x128xbf16>
    %c0_34 = arith.constant 0 : index
    %c0_35 = arith.constant 0 : index
    %c0_36 = arith.constant 0 : index
    %48 = vector.load %arg12[%c0_34, %c0_35, %c0_36] : memref<2x1x128xf32, #tpu.memory_space<vmem>>, vector<1x1x128xf32>
    %49 = vector.shape_cast %48 : vector<1x1x128xf32> to vector<1x128xf32>
    %c0_37 = arith.constant 0 : index
    %c0_38 = arith.constant 0 : index
    %c0_39 = arith.constant 0 : index
    %50 = vector.load %arg13[%c0_37, %c0_38, %c0_39] : memref<2x128x32xbf16, #tpu.memory_space<vmem>>, vector<1x128x32xbf16>
    %51 = vector.shape_cast %50 : vector<1x128x32xbf16> to vector<128x32xbf16>
    %c0_40 = arith.constant 0 : index
    %c0_41 = arith.constant 0 : index
    %c0_42 = arith.constant 0 : index
    %52 = vector.load %arg14[%c0_40, %c0_41, %c0_42] : memref<2x1x32xf32, #tpu.memory_space<vmem>>, vector<1x1x32xf32>
    %53 = vector.shape_cast %52 : vector<1x1x32xf32> to vector<1x32xf32>
    %c0_43 = arith.constant 0 : index
    %c0_44 = arith.constant 0 : index
    %c0_45 = arith.constant 0 : index
    %54 = vector.load %arg15[%c0_43, %c0_44, %c0_45] : memref<2x1x32xf32, #tpu.memory_space<vmem>>, vector<1x1x32xf32>
    %55 = vector.shape_cast %54 : vector<1x1x32xf32> to vector<1x32xf32>
    %c0_46 = arith.constant 0 : index
    %c0_47 = arith.constant 0 : index
    %c0_48 = arith.constant 0 : index
    %56 = vector.load %arg16[%c0_46, %c0_47, %c0_48] : memref<2x1x32xf32, #tpu.memory_space<vmem>>, vector<1x1x32xf32>
    %57 = vector.shape_cast %56 : vector<1x1x32xf32> to vector<1x32xf32>
    %58 = arith.truncf %33 : vector<13x32xf32> to vector<13x32xbf16>
    %cst_49 = arith.constant dense<0.000000e+00> : vector<13x96xf32>
    %59 = tpu.matmul %58, %35, %cst_49 {dimension_numbers = #tpu.dot_dimension_numbers<[1], [0], [0], [1], [0, 0, 1, 1], [], []>} : vector<13x32xbf16>, vector<32x96xbf16>, vector<13x96xf32> -> vector<13x96xf32>
    %60 = vector.broadcast %37 : vector<1x96xf32> to vector<13x96xf32>
    %61 = arith.addf %59, %60 : vector<13x96xf32>
    %62 = vector.extract_strided_slice %61 {offsets = [0, 0], sizes = [13, 32], strides = [1, 1]} : vector<13x96xf32> to vector<13x32xf32>
    %cst_50 = arith.constant 0.353553385 : f32
    %63 = vector.broadcast %cst_50 : f32 to vector<13x32xf32>
    %64 = arith.mulf %62, %63 : vector<13x32xf32>
    %65 = vector.extract_strided_slice %61 {offsets = [0, 32], sizes = [13, 32], strides = [1, 1]} : vector<13x96xf32> to vector<13x32xf32>
    %66 = vector.extract_strided_slice %61 {offsets = [0, 64], sizes = [13, 32], strides = [1, 1]} : vector<13x96xf32> to vector<13x32xf32>
    %67 = arith.truncf %64 : vector<13x32xf32> to vector<13x32xbf16>
    %68 = arith.truncf %65 : vector<13x32xf32> to vector<13x32xbf16>
    %69 = vector.shape_cast %3 : vector<1x13xf32> to vector<1x13xf32>
    %70 = vector.broadcast %69 : vector<1x13xf32> to vector<13x13xf32>
    %71 = tpu.iota {dimensions = array<i32: 1>} : vector<1x32xi32>
    %cst_51 = arith.constant 0.000000e+00 : f32
    %72 = vector.broadcast %cst_51 : f32 to vector<13x32xf32>
    %73 = vector.extract_strided_slice %67 {offsets = [0, 0], sizes = [13, 8], strides = [1, 1]} : vector<13x32xbf16> to vector<13x8xbf16>
    %74 = vector.extract_strided_slice %68 {offsets = [0, 0], sizes = [13, 8], strides = [1, 1]} : vector<13x32xbf16> to vector<13x8xbf16>
    %cst_52 = arith.constant dense<0.000000e+00> : vector<13x13xf32>
    %75 = tpu.matmul %73, %74, %cst_52 {dimension_numbers = #tpu.dot_dimension_numbers<[1], [1], [0], [0], [0, 0, 1, 0], [], []>} : vector<13x8xbf16>, vector<13x8xbf16>, vector<13x13xf32> -> vector<13x13xf32>
    %76 = arith.addf %75, %70 : vector<13x13xf32>
    %cst_53 = arith.constant dense<0xFF800000> : vector<13xf32>
    %77 = vector.multi_reduction <maximumf>, %76, %cst_53 [1] : vector<13x13xf32> to vector<13xf32>
    %78 = vector.shape_cast %77 : vector<13xf32> to vector<13x1xf32>
    %79 = vector.broadcast %78 : vector<13x1xf32> to vector<13x13xf32>
    %80 = arith.subf %76, %79 : vector<13x13xf32>
    %81 = math.exp %80 : vector<13x13xf32>
    %cst_54 = arith.constant dense<0.000000e+00> : vector<13xf32>
    %82 = vector.multi_reduction <add>, %81, %cst_54 [1] : vector<13x13xf32> to vector<13xf32>
    %83 = vector.shape_cast %82 : vector<13xf32> to vector<13x1xf32>
    %84 = tpu.reciprocal %83 {approx = true} : vector<13x1xf32> -> vector<13x1xf32>
    %85 = vector.broadcast %84 : vector<13x1xf32> to vector<13x13xf32>
    %86 = arith.mulf %81, %85 : vector<13x13xf32>
    %c0_i32 = arith.constant 0 : i32
    %87 = vector.broadcast %c0_i32 : i32 to vector<1x32xi32>
    %88 = arith.cmpi sge, %71, %87 : vector<1x32xi32>
    %c8_i32 = arith.constant 8 : i32
    %89 = vector.broadcast %c8_i32 : i32 to vector<1x32xi32>
    %90 = arith.cmpi slt, %71, %89 : vector<1x32xi32>
    %91 = arith.andi %88, %90 : vector<1x32xi1>
    %cst_55 = arith.constant 0.000000e+00 : f32
    %92 = vector.shape_cast %91 : vector<1x32xi1> to vector<1x32xi1>
    %93 = vector.broadcast %92 : vector<1x32xi1> to vector<13x32xi1>
    %94 = vector.broadcast %cst_55 : f32 to vector<13x32xf32>
    %95 = arith.select %93, %66, %94 : vector<13x32xi1>, vector<13x32xf32>
    %96 = arith.truncf %86 : vector<13x13xf32> to vector<13x13xbf16>
    %97 = arith.truncf %95 : vector<13x32xf32> to vector<13x32xbf16>
    %cst_56 = arith.constant dense<0.000000e+00> : vector<13x32xf32>
    %98 = tpu.matmul %96, %97, %cst_56 {dimension_numbers = #tpu.dot_dimension_numbers<[1], [0], [0], [1], [0, 0, 1, 1], [], []>} : vector<13x13xbf16>, vector<13x32xbf16>, vector<13x32xf32> -> vector<13x32xf32>
    %99 = arith.addf %72, %98 : vector<13x32xf32>
    %100 = vector.extract_strided_slice %67 {offsets = [0, 8], sizes = [13, 8], strides = [1, 1]} : vector<13x32xbf16> to vector<13x8xbf16>
    %101 = vector.extract_strided_slice %68 {offsets = [0, 8], sizes = [13, 8], strides = [1, 1]} : vector<13x32xbf16> to vector<13x8xbf16>
    %cst_57 = arith.constant dense<0.000000e+00> : vector<13x13xf32>
    %102 = tpu.matmul %100, %101, %cst_57 {dimension_numbers = #tpu.dot_dimension_numbers<[1], [1], [0], [0], [0, 0, 1, 0], [], []>} : vector<13x8xbf16>, vector<13x8xbf16>, vector<13x13xf32> -> vector<13x13xf32>
    %103 = arith.addf %102, %70 : vector<13x13xf32>
    %cst_58 = arith.constant dense<0xFF800000> : vector<13xf32>
    %104 = vector.multi_reduction <maximumf>, %103, %cst_58 [1] : vector<13x13xf32> to vector<13xf32>
    %105 = vector.shape_cast %104 : vector<13xf32> to vector<13x1xf32>
    %106 = vector.broadcast %105 : vector<13x1xf32> to vector<13x13xf32>
    %107 = arith.subf %103, %106 : vector<13x13xf32>
    %108 = math.exp %107 : vector<13x13xf32>
    %cst_59 = arith.constant dense<0.000000e+00> : vector<13xf32>
    %109 = vector.multi_reduction <add>, %108, %cst_59 [1] : vector<13x13xf32> to vector<13xf32>
    %110 = vector.shape_cast %109 : vector<13xf32> to vector<13x1xf32>
    %111 = tpu.reciprocal %110 {approx = true} : vector<13x1xf32> -> vector<13x1xf32>
    %112 = vector.broadcast %111 : vector<13x1xf32> to vector<13x13xf32>
    %113 = arith.mulf %108, %112 : vector<13x13xf32>
    %c8_i32_60 = arith.constant 8 : i32
    %114 = vector.broadcast %c8_i32_60 : i32 to vector<1x32xi32>
    %115 = arith.cmpi sge, %71, %114 : vector<1x32xi32>
    %c16_i32 = arith.constant 16 : i32
    %116 = vector.broadcast %c16_i32 : i32 to vector<1x32xi32>
    %117 = arith.cmpi slt, %71, %116 : vector<1x32xi32>
    %118 = arith.andi %115, %117 : vector<1x32xi1>
    %cst_61 = arith.constant 0.000000e+00 : f32
    %119 = vector.shape_cast %118 : vector<1x32xi1> to vector<1x32xi1>
    %120 = vector.broadcast %119 : vector<1x32xi1> to vector<13x32xi1>
    %121 = vector.broadcast %cst_61 : f32 to vector<13x32xf32>
    %122 = arith.select %120, %66, %121 : vector<13x32xi1>, vector<13x32xf32>
    %123 = arith.truncf %113 : vector<13x13xf32> to vector<13x13xbf16>
    %124 = arith.truncf %122 : vector<13x32xf32> to vector<13x32xbf16>
    %cst_62 = arith.constant dense<0.000000e+00> : vector<13x32xf32>
    %125 = tpu.matmul %123, %124, %cst_62 {dimension_numbers = #tpu.dot_dimension_numbers<[1], [0], [0], [1], [0, 0, 1, 1], [], []>} : vector<13x13xbf16>, vector<13x32xbf16>, vector<13x32xf32> -> vector<13x32xf32>
    %126 = arith.addf %99, %125 : vector<13x32xf32>
    %127 = vector.extract_strided_slice %67 {offsets = [0, 16], sizes = [13, 8], strides = [1, 1]} : vector<13x32xbf16> to vector<13x8xbf16>
    %128 = vector.extract_strided_slice %68 {offsets = [0, 16], sizes = [13, 8], strides = [1, 1]} : vector<13x32xbf16> to vector<13x8xbf16>
    %cst_63 = arith.constant dense<0.000000e+00> : vector<13x13xf32>
    %129 = tpu.matmul %127, %128, %cst_63 {dimension_numbers = #tpu.dot_dimension_numbers<[1], [1], [0], [0], [0, 0, 1, 0], [], []>} : vector<13x8xbf16>, vector<13x8xbf16>, vector<13x13xf32> -> vector<13x13xf32>
    %130 = arith.addf %129, %70 : vector<13x13xf32>
    %cst_64 = arith.constant dense<0xFF800000> : vector<13xf32>
    %131 = vector.multi_reduction <maximumf>, %130, %cst_64 [1] : vector<13x13xf32> to vector<13xf32>
    %132 = vector.shape_cast %131 : vector<13xf32> to vector<13x1xf32>
    %133 = vector.broadcast %132 : vector<13x1xf32> to vector<13x13xf32>
    %134 = arith.subf %130, %133 : vector<13x13xf32>
    %135 = math.exp %134 : vector<13x13xf32>
    %cst_65 = arith.constant dense<0.000000e+00> : vector<13xf32>
    %136 = vector.multi_reduction <add>, %135, %cst_65 [1] : vector<13x13xf32> to vector<13xf32>
    %137 = vector.shape_cast %136 : vector<13xf32> to vector<13x1xf32>
    %138 = tpu.reciprocal %137 {approx = true} : vector<13x1xf32> -> vector<13x1xf32>
    %139 = vector.broadcast %138 : vector<13x1xf32> to vector<13x13xf32>
    %140 = arith.mulf %135, %139 : vector<13x13xf32>
    %c16_i32_66 = arith.constant 16 : i32
    %141 = vector.broadcast %c16_i32_66 : i32 to vector<1x32xi32>
    %142 = arith.cmpi sge, %71, %141 : vector<1x32xi32>
    %c24_i32 = arith.constant 24 : i32
    %143 = vector.broadcast %c24_i32 : i32 to vector<1x32xi32>
    %144 = arith.cmpi slt, %71, %143 : vector<1x32xi32>
    %145 = arith.andi %142, %144 : vector<1x32xi1>
    %cst_67 = arith.constant 0.000000e+00 : f32
    %146 = vector.shape_cast %145 : vector<1x32xi1> to vector<1x32xi1>
    %147 = vector.broadcast %146 : vector<1x32xi1> to vector<13x32xi1>
    %148 = vector.broadcast %cst_67 : f32 to vector<13x32xf32>
    %149 = arith.select %147, %66, %148 : vector<13x32xi1>, vector<13x32xf32>
    %150 = arith.truncf %140 : vector<13x13xf32> to vector<13x13xbf16>
    %151 = arith.truncf %149 : vector<13x32xf32> to vector<13x32xbf16>
    %cst_68 = arith.constant dense<0.000000e+00> : vector<13x32xf32>
    %152 = tpu.matmul %150, %151, %cst_68 {dimension_numbers = #tpu.dot_dimension_numbers<[1], [0], [0], [1], [0, 0, 1, 1], [], []>} : vector<13x13xbf16>, vector<13x32xbf16>, vector<13x32xf32> -> vector<13x32xf32>
    %153 = arith.addf %126, %152 : vector<13x32xf32>
    %154 = vector.extract_strided_slice %67 {offsets = [0, 24], sizes = [13, 8], strides = [1, 1]} : vector<13x32xbf16> to vector<13x8xbf16>
    %155 = vector.extract_strided_slice %68 {offsets = [0, 24], sizes = [13, 8], strides = [1, 1]} : vector<13x32xbf16> to vector<13x8xbf16>
    %cst_69 = arith.constant dense<0.000000e+00> : vector<13x13xf32>
    %156 = tpu.matmul %154, %155, %cst_69 {dimension_numbers = #tpu.dot_dimension_numbers<[1], [1], [0], [0], [0, 0, 1, 0], [], []>} : vector<13x8xbf16>, vector<13x8xbf16>, vector<13x13xf32> -> vector<13x13xf32>
    %157 = arith.addf %156, %70 : vector<13x13xf32>
    %cst_70 = arith.constant dense<0xFF800000> : vector<13xf32>
    %158 = vector.multi_reduction <maximumf>, %157, %cst_70 [1] : vector<13x13xf32> to vector<13xf32>
    %159 = vector.shape_cast %158 : vector<13xf32> to vector<13x1xf32>
    %160 = vector.broadcast %159 : vector<13x1xf32> to vector<13x13xf32>
    %161 = arith.subf %157, %160 : vector<13x13xf32>
    %162 = math.exp %161 : vector<13x13xf32>
    %cst_71 = arith.constant dense<0.000000e+00> : vector<13xf32>
    %163 = vector.multi_reduction <add>, %162, %cst_71 [1] : vector<13x13xf32> to vector<13xf32>
    %164 = vector.shape_cast %163 : vector<13xf32> to vector<13x1xf32>
    %165 = tpu.reciprocal %164 {approx = true} : vector<13x1xf32> -> vector<13x1xf32>
    %166 = vector.broadcast %165 : vector<13x1xf32> to vector<13x13xf32>
    %167 = arith.mulf %162, %166 : vector<13x13xf32>
    %c24_i32_72 = arith.constant 24 : i32
    %168 = vector.broadcast %c24_i32_72 : i32 to vector<1x32xi32>
    %169 = arith.cmpi sge, %71, %168 : vector<1x32xi32>
    %c32_i32 = arith.constant 32 : i32
    %170 = vector.broadcast %c32_i32 : i32 to vector<1x32xi32>
    %171 = arith.cmpi slt, %71, %170 : vector<1x32xi32>
    %172 = arith.andi %169, %171 : vector<1x32xi1>
    %cst_73 = arith.constant 0.000000e+00 : f32
    %173 = vector.shape_cast %172 : vector<1x32xi1> to vector<1x32xi1>
    %174 = vector.broadcast %173 : vector<1x32xi1> to vector<13x32xi1>
    %175 = vector.broadcast %cst_73 : f32 to vector<13x32xf32>
    %176 = arith.select %174, %66, %175 : vector<13x32xi1>, vector<13x32xf32>
    %177 = arith.truncf %167 : vector<13x13xf32> to vector<13x13xbf16>
    %178 = arith.truncf %176 : vector<13x32xf32> to vector<13x32xbf16>
    %cst_74 = arith.constant dense<0.000000e+00> : vector<13x32xf32>
    %179 = tpu.matmul %177, %178, %cst_74 {dimension_numbers = #tpu.dot_dimension_numbers<[1], [0], [0], [1], [0, 0, 1, 1], [], []>} : vector<13x13xbf16>, vector<13x32xbf16>, vector<13x32xf32> -> vector<13x32xf32>
    %180 = arith.addf %153, %179 : vector<13x32xf32>
    %181 = arith.truncf %180 : vector<13x32xf32> to vector<13x32xbf16>
    %cst_75 = arith.constant dense<0.000000e+00> : vector<13x32xf32>
    %182 = tpu.matmul %181, %39, %cst_75 {dimension_numbers = #tpu.dot_dimension_numbers<[1], [0], [0], [1], [0, 0, 1, 1], [], []>} : vector<13x32xbf16>, vector<32x32xbf16>, vector<13x32xf32> -> vector<13x32xf32>
    %183 = vector.broadcast %41 : vector<1x32xf32> to vector<13x32xf32>
    %184 = arith.addf %182, %183 : vector<13x32xf32>
    %185 = arith.addf %33, %184 : vector<13x32xf32>
    %cst_76 = arith.constant dense<0.000000e+00> : vector<13xf32>
    %186 = vector.multi_reduction <add>, %185, %cst_76 [1] : vector<13x32xf32> to vector<13xf32>
    %187 = vector.shape_cast %186 : vector<13xf32> to vector<13x1xf32>
    %cst_77 = arith.constant 3.200000e+01 : f32
    %188 = vector.broadcast %cst_77 : f32 to vector<13x1xf32>
    %189 = arith.divf %187, %188 : vector<13x1xf32>
    %190 = vector.broadcast %189 : vector<13x1xf32> to vector<13x32xf32>
    %191 = arith.subf %185, %190 : vector<13x32xf32>
    %192 = arith.mulf %191, %191 : vector<13x32xf32>
    %cst_78 = arith.constant dense<0.000000e+00> : vector<13xf32>
    %193 = vector.multi_reduction <add>, %192, %cst_78 [1] : vector<13x32xf32> to vector<13xf32>
    %194 = vector.shape_cast %193 : vector<13xf32> to vector<13x1xf32>
    %cst_79 = arith.constant 3.200000e+01 : f32
    %195 = vector.broadcast %cst_79 : f32 to vector<13x1xf32>
    %196 = arith.divf %194, %195 : vector<13x1xf32>
    %197 = vector.broadcast %189 : vector<13x1xf32> to vector<13x32xf32>
    %198 = arith.subf %185, %197 : vector<13x32xf32>
    %cst_80 = arith.constant 9.99999996E-13 : f32
    %199 = vector.broadcast %cst_80 : f32 to vector<13x1xf32>
    %200 = arith.addf %196, %199 : vector<13x1xf32>
    %201 = math.rsqrt %200 : vector<13x1xf32>
    %202 = vector.broadcast %201 : vector<13x1xf32> to vector<13x32xf32>
    %203 = arith.mulf %198, %202 : vector<13x32xf32>
    %204 = vector.broadcast %43 : vector<1x32xf32> to vector<13x32xf32>
    %205 = arith.mulf %203, %204 : vector<13x32xf32>
    %206 = vector.broadcast %45 : vector<1x32xf32> to vector<13x32xf32>
    %207 = arith.addf %205, %206 : vector<13x32xf32>
    %208 = arith.truncf %207 : vector<13x32xf32> to vector<13x32xbf16>
    %cst_81 = arith.constant dense<0.000000e+00> : vector<13x128xf32>
    %209 = tpu.matmul %208, %47, %cst_81 {dimension_numbers = #tpu.dot_dimension_numbers<[1], [0], [0], [1], [0, 0, 1, 1], [], []>} : vector<13x32xbf16>, vector<32x128xbf16>, vector<13x128xf32> -> vector<13x128xf32>
    %210 = vector.broadcast %49 : vector<1x128xf32> to vector<13x128xf32>
    %211 = arith.addf %209, %210 : vector<13x128xf32>
    %cst_82 = arith.constant 5.000000e-01 : f32
    %212 = vector.broadcast %cst_82 : f32 to vector<13x128xf32>
    %213 = arith.mulf %212, %211 : vector<13x128xf32>
    %cst_83 = arith.constant 4.471500e-02 : f32
    %214 = vector.broadcast %cst_83 : f32 to vector<13x128xf32>
    %215 = arith.mulf %214, %211 : vector<13x128xf32>
    %216 = arith.mulf %215, %211 : vector<13x128xf32>
    %217 = arith.mulf %216, %211 : vector<13x128xf32>
    %218 = arith.addf %211, %217 : vector<13x128xf32>
    %cst_84 = arith.constant 0.797884583 : f32
    %219 = vector.broadcast %cst_84 : f32 to vector<13x128xf32>
    %220 = arith.mulf %219, %218 : vector<13x128xf32>
    %221 = math.tanh %220 : vector<13x128xf32>
    %cst_85 = arith.constant 1.000000e+00 : f32
    %222 = vector.broadcast %cst_85 : f32 to vector<13x128xf32>
    %223 = arith.addf %222, %221 : vector<13x128xf32>
    %224 = arith.mulf %213, %223 : vector<13x128xf32>
    %225 = arith.truncf %224 : vector<13x128xf32> to vector<13x128xbf16>
    %cst_86 = arith.constant dense<0.000000e+00> : vector<13x32xf32>
    %226 = tpu.matmul %225, %51, %cst_86 {dimension_numbers = #tpu.dot_dimension_numbers<[1], [0], [0], [1], [0, 0, 1, 1], [], []>} : vector<13x128xbf16>, vector<128x32xbf16>, vector<13x32xf32> -> vector<13x32xf32>
    %227 = vector.broadcast %53 : vector<1x32xf32> to vector<13x32xf32>
    %228 = arith.addf %226, %227 : vector<13x32xf32>
    %229 = arith.addf %207, %228 : vector<13x32xf32>
    %cst_87 = arith.constant dense<0.000000e+00> : vector<13xf32>
    %230 = vector.multi_reduction <add>, %229, %cst_87 [1] : vector<13x32xf32> to vector<13xf32>
    %231 = vector.shape_cast %230 : vector<13xf32> to vector<13x1xf32>
    %cst_88 = arith.constant 3.200000e+01 : f32
    %232 = vector.broadcast %cst_88 : f32 to vector<13x1xf32>
    %233 = arith.divf %231, %232 : vector<13x1xf32>
    %234 = vector.broadcast %233 : vector<13x1xf32> to vector<13x32xf32>
    %235 = arith.subf %229, %234 : vector<13x32xf32>
    %236 = arith.mulf %235, %235 : vector<13x32xf32>
    %cst_89 = arith.constant dense<0.000000e+00> : vector<13xf32>
    %237 = vector.multi_reduction <add>, %236, %cst_89 [1] : vector<13x32xf32> to vector<13xf32>
    %238 = vector.shape_cast %237 : vector<13xf32> to vector<13x1xf32>
    %cst_90 = arith.constant 3.200000e+01 : f32
    %239 = vector.broadcast %cst_90 : f32 to vector<13x1xf32>
    %240 = arith.divf %238, %239 : vector<13x1xf32>
    %241 = vector.broadcast %233 : vector<13x1xf32> to vector<13x32xf32>
    %242 = arith.subf %229, %241 : vector<13x32xf32>
    %cst_91 = arith.constant 9.99999996E-13 : f32
    %243 = vector.broadcast %cst_91 : f32 to vector<13x1xf32>
    %244 = arith.addf %240, %243 : vector<13x1xf32>
    %245 = math.rsqrt %244 : vector<13x1xf32>
    %246 = vector.broadcast %245 : vector<13x1xf32> to vector<13x32xf32>
    %247 = arith.mulf %242, %246 : vector<13x32xf32>
    %248 = vector.broadcast %55 : vector<1x32xf32> to vector<13x32xf32>
    %249 = arith.mulf %247, %248 : vector<13x32xf32>
    %250 = vector.broadcast %57 : vector<1x32xf32> to vector<13x32xf32>
    %251 = arith.addf %249, %250 : vector<13x32xf32>
    %c1 = arith.constant 1 : index
    %c0_92 = arith.constant 0 : index
    %c0_93 = arith.constant 0 : index
    %252 = vector.load %arg5[%c1, %c0_92, %c0_93] : memref<2x32x96xbf16, #tpu.memory_space<vmem>>, vector<1x32x96xbf16>
    %253 = vector.shape_cast %252 : vector<1x32x96xbf16> to vector<32x96xbf16>
    %c1_94 = arith.constant 1 : index
    %c0_95 = arith.constant 0 : index
    %c0_96 = arith.constant 0 : index
    %254 = vector.load %arg6[%c1_94, %c0_95, %c0_96] : memref<2x1x96xf32, #tpu.memory_space<vmem>>, vector<1x1x96xf32>
    %255 = vector.shape_cast %254 : vector<1x1x96xf32> to vector<1x96xf32>
    %c1_97 = arith.constant 1 : index
    %c0_98 = arith.constant 0 : index
    %c0_99 = arith.constant 0 : index
    %256 = vector.load %arg7[%c1_97, %c0_98, %c0_99] : memref<2x32x32xbf16, #tpu.memory_space<vmem>>, vector<1x32x32xbf16>
    %257 = vector.shape_cast %256 : vector<1x32x32xbf16> to vector<32x32xbf16>
    %c1_100 = arith.constant 1 : index
    %c0_101 = arith.constant 0 : index
    %c0_102 = arith.constant 0 : index
    %258 = vector.load %arg8[%c1_100, %c0_101, %c0_102] : memref<2x1x32xf32, #tpu.memory_space<vmem>>, vector<1x1x32xf32>
    %259 = vector.shape_cast %258 : vector<1x1x32xf32> to vector<1x32xf32>
    %c1_103 = arith.constant 1 : index
    %c0_104 = arith.constant 0 : index
    %c0_105 = arith.constant 0 : index
    %260 = vector.load %arg9[%c1_103, %c0_104, %c0_105] : memref<2x1x32xf32, #tpu.memory_space<vmem>>, vector<1x1x32xf32>
    %261 = vector.shape_cast %260 : vector<1x1x32xf32> to vector<1x32xf32>
    %c1_106 = arith.constant 1 : index
    %c0_107 = arith.constant 0 : index
    %c0_108 = arith.constant 0 : index
    %262 = vector.load %arg10[%c1_106, %c0_107, %c0_108] : memref<2x1x32xf32, #tpu.memory_space<vmem>>, vector<1x1x32xf32>
    %263 = vector.shape_cast %262 : vector<1x1x32xf32> to vector<1x32xf32>
    %c1_109 = arith.constant 1 : index
    %c0_110 = arith.constant 0 : index
    %c0_111 = arith.constant 0 : index
    %264 = vector.load %arg11[%c1_109, %c0_110, %c0_111] : memref<2x32x128xbf16, #tpu.memory_space<vmem>>, vector<1x32x128xbf16>
    %265 = vector.shape_cast %264 : vector<1x32x128xbf16> to vector<32x128xbf16>
    %c1_112 = arith.constant 1 : index
    %c0_113 = arith.constant 0 : index
    %c0_114 = arith.constant 0 : index
    %266 = vector.load %arg12[%c1_112, %c0_113, %c0_114] : memref<2x1x128xf32, #tpu.memory_space<vmem>>, vector<1x1x128xf32>
    %267 = vector.shape_cast %266 : vector<1x1x128xf32> to vector<1x128xf32>
    %c1_115 = arith.constant 1 : index
    %c0_116 = arith.constant 0 : index
    %c0_117 = arith.constant 0 : index
    %268 = vector.load %arg13[%c1_115, %c0_116, %c0_117] : memref<2x128x32xbf16, #tpu.memory_space<vmem>>, vector<1x128x32xbf16>
    %269 = vector.shape_cast %268 : vector<1x128x32xbf16> to vector<128x32xbf16>
    %c1_118 = arith.constant 1 : index
    %c0_119 = arith.constant 0 : index
    %c0_120 = arith.constant 0 : index
    %270 = vector.load %arg14[%c1_118, %c0_119, %c0_120] : memref<2x1x32xf32, #tpu.memory_space<vmem>>, vector<1x1x32xf32>
    %271 = vector.shape_cast %270 : vector<1x1x32xf32> to vector<1x32xf32>
    %c1_121 = arith.constant 1 : index
    %c0_122 = arith.constant 0 : index
    %c0_123 = arith.constant 0 : index
    %272 = vector.load %arg15[%c1_121, %c0_122, %c0_123] : memref<2x1x32xf32, #tpu.memory_space<vmem>>, vector<1x1x32xf32>
    %273 = vector.shape_cast %272 : vector<1x1x32xf32> to vector<1x32xf32>
    %c1_124 = arith.constant 1 : index
    %c0_125 = arith.constant 0 : index
    %c0_126 = arith.constant 0 : index
    %274 = vector.load %arg16[%c1_124, %c0_125, %c0_126] : memref<2x1x32xf32, #tpu.memory_space<vmem>>, vector<1x1x32xf32>
    %275 = vector.shape_cast %274 : vector<1x1x32xf32> to vector<1x32xf32>
    %276 = arith.truncf %251 : vector<13x32xf32> to vector<13x32xbf16>
    %cst_127 = arith.constant dense<0.000000e+00> : vector<13x96xf32>
    %277 = tpu.matmul %276, %253, %cst_127 {dimension_numbers = #tpu.dot_dimension_numbers<[1], [0], [0], [1], [0, 0, 1, 1], [], []>} : vector<13x32xbf16>, vector<32x96xbf16>, vector<13x96xf32> -> vector<13x96xf32>
    %278 = vector.broadcast %255 : vector<1x96xf32> to vector<13x96xf32>
    %279 = arith.addf %277, %278 : vector<13x96xf32>
    %280 = vector.extract_strided_slice %279 {offsets = [0, 0], sizes = [13, 32], strides = [1, 1]} : vector<13x96xf32> to vector<13x32xf32>
    %cst_128 = arith.constant 0.353553385 : f32
    %281 = vector.broadcast %cst_128 : f32 to vector<13x32xf32>
    %282 = arith.mulf %280, %281 : vector<13x32xf32>
    %283 = vector.extract_strided_slice %279 {offsets = [0, 32], sizes = [13, 32], strides = [1, 1]} : vector<13x96xf32> to vector<13x32xf32>
    %284 = vector.extract_strided_slice %279 {offsets = [0, 64], sizes = [13, 32], strides = [1, 1]} : vector<13x96xf32> to vector<13x32xf32>
    %285 = arith.truncf %282 : vector<13x32xf32> to vector<13x32xbf16>
    %286 = arith.truncf %283 : vector<13x32xf32> to vector<13x32xbf16>
    %287 = vector.shape_cast %3 : vector<1x13xf32> to vector<1x13xf32>
    %288 = vector.broadcast %287 : vector<1x13xf32> to vector<13x13xf32>
    %289 = tpu.iota {dimensions = array<i32: 1>} : vector<1x32xi32>
    %cst_129 = arith.constant 0.000000e+00 : f32
    %290 = vector.broadcast %cst_129 : f32 to vector<13x32xf32>
    %291 = vector.extract_strided_slice %285 {offsets = [0, 0], sizes = [13, 8], strides = [1, 1]} : vector<13x32xbf16> to vector<13x8xbf16>
    %292 = vector.extract_strided_slice %286 {offsets = [0, 0], sizes = [13, 8], strides = [1, 1]} : vector<13x32xbf16> to vector<13x8xbf16>
    %cst_130 = arith.constant dense<0.000000e+00> : vector<13x13xf32>
    %293 = tpu.matmul %291, %292, %cst_130 {dimension_numbers = #tpu.dot_dimension_numbers<[1], [1], [0], [0], [0, 0, 1, 0], [], []>} : vector<13x8xbf16>, vector<13x8xbf16>, vector<13x13xf32> -> vector<13x13xf32>
    %294 = arith.addf %293, %288 : vector<13x13xf32>
    %cst_131 = arith.constant dense<0xFF800000> : vector<13xf32>
    %295 = vector.multi_reduction <maximumf>, %294, %cst_131 [1] : vector<13x13xf32> to vector<13xf32>
    %296 = vector.shape_cast %295 : vector<13xf32> to vector<13x1xf32>
    %297 = vector.broadcast %296 : vector<13x1xf32> to vector<13x13xf32>
    %298 = arith.subf %294, %297 : vector<13x13xf32>
    %299 = math.exp %298 : vector<13x13xf32>
    %cst_132 = arith.constant dense<0.000000e+00> : vector<13xf32>
    %300 = vector.multi_reduction <add>, %299, %cst_132 [1] : vector<13x13xf32> to vector<13xf32>
    %301 = vector.shape_cast %300 : vector<13xf32> to vector<13x1xf32>
    %302 = tpu.reciprocal %301 {approx = true} : vector<13x1xf32> -> vector<13x1xf32>
    %303 = vector.broadcast %302 : vector<13x1xf32> to vector<13x13xf32>
    %304 = arith.mulf %299, %303 : vector<13x13xf32>
    %c0_i32_133 = arith.constant 0 : i32
    %305 = vector.broadcast %c0_i32_133 : i32 to vector<1x32xi32>
    %306 = arith.cmpi sge, %289, %305 : vector<1x32xi32>
    %c8_i32_134 = arith.constant 8 : i32
    %307 = vector.broadcast %c8_i32_134 : i32 to vector<1x32xi32>
    %308 = arith.cmpi slt, %289, %307 : vector<1x32xi32>
    %309 = arith.andi %306, %308 : vector<1x32xi1>
    %cst_135 = arith.constant 0.000000e+00 : f32
    %310 = vector.shape_cast %309 : vector<1x32xi1> to vector<1x32xi1>
    %311 = vector.broadcast %310 : vector<1x32xi1> to vector<13x32xi1>
    %312 = vector.broadcast %cst_135 : f32 to vector<13x32xf32>
    %313 = arith.select %311, %284, %312 : vector<13x32xi1>, vector<13x32xf32>
    %314 = arith.truncf %304 : vector<13x13xf32> to vector<13x13xbf16>
    %315 = arith.truncf %313 : vector<13x32xf32> to vector<13x32xbf16>
    %cst_136 = arith.constant dense<0.000000e+00> : vector<13x32xf32>
    %316 = tpu.matmul %314, %315, %cst_136 {dimension_numbers = #tpu.dot_dimension_numbers<[1], [0], [0], [1], [0, 0, 1, 1], [], []>} : vector<13x13xbf16>, vector<13x32xbf16>, vector<13x32xf32> -> vector<13x32xf32>
    %317 = arith.addf %290, %316 : vector<13x32xf32>
    %318 = vector.extract_strided_slice %285 {offsets = [0, 8], sizes = [13, 8], strides = [1, 1]} : vector<13x32xbf16> to vector<13x8xbf16>
    %319 = vector.extract_strided_slice %286 {offsets = [0, 8], sizes = [13, 8], strides = [1, 1]} : vector<13x32xbf16> to vector<13x8xbf16>
    %cst_137 = arith.constant dense<0.000000e+00> : vector<13x13xf32>
    %320 = tpu.matmul %318, %319, %cst_137 {dimension_numbers = #tpu.dot_dimension_numbers<[1], [1], [0], [0], [0, 0, 1, 0], [], []>} : vector<13x8xbf16>, vector<13x8xbf16>, vector<13x13xf32> -> vector<13x13xf32>
    %321 = arith.addf %320, %288 : vector<13x13xf32>
    %cst_138 = arith.constant dense<0xFF800000> : vector<13xf32>
    %322 = vector.multi_reduction <maximumf>, %321, %cst_138 [1] : vector<13x13xf32> to vector<13xf32>
    %323 = vector.shape_cast %322 : vector<13xf32> to vector<13x1xf32>
    %324 = vector.broadcast %323 : vector<13x1xf32> to vector<13x13xf32>
    %325 = arith.subf %321, %324 : vector<13x13xf32>
    %326 = math.exp %325 : vector<13x13xf32>
    %cst_139 = arith.constant dense<0.000000e+00> : vector<13xf32>
    %327 = vector.multi_reduction <add>, %326, %cst_139 [1] : vector<13x13xf32> to vector<13xf32>
    %328 = vector.shape_cast %327 : vector<13xf32> to vector<13x1xf32>
    %329 = tpu.reciprocal %328 {approx = true} : vector<13x1xf32> -> vector<13x1xf32>
    %330 = vector.broadcast %329 : vector<13x1xf32> to vector<13x13xf32>
    %331 = arith.mulf %326, %330 : vector<13x13xf32>
    %c8_i32_140 = arith.constant 8 : i32
    %332 = vector.broadcast %c8_i32_140 : i32 to vector<1x32xi32>
    %333 = arith.cmpi sge, %289, %332 : vector<1x32xi32>
    %c16_i32_141 = arith.constant 16 : i32
    %334 = vector.broadcast %c16_i32_141 : i32 to vector<1x32xi32>
    %335 = arith.cmpi slt, %289, %334 : vector<1x32xi32>
    %336 = arith.andi %333, %335 : vector<1x32xi1>
    %cst_142 = arith.constant 0.000000e+00 : f32
    %337 = vector.shape_cast %336 : vector<1x32xi1> to vector<1x32xi1>
    %338 = vector.broadcast %337 : vector<1x32xi1> to vector<13x32xi1>
    %339 = vector.broadcast %cst_142 : f32 to vector<13x32xf32>
    %340 = arith.select %338, %284, %339 : vector<13x32xi1>, vector<13x32xf32>
    %341 = arith.truncf %331 : vector<13x13xf32> to vector<13x13xbf16>
    %342 = arith.truncf %340 : vector<13x32xf32> to vector<13x32xbf16>
    %cst_143 = arith.constant dense<0.000000e+00> : vector<13x32xf32>
    %343 = tpu.matmul %341, %342, %cst_143 {dimension_numbers = #tpu.dot_dimension_numbers<[1], [0], [0], [1], [0, 0, 1, 1], [], []>} : vector<13x13xbf16>, vector<13x32xbf16>, vector<13x32xf32> -> vector<13x32xf32>
    %344 = arith.addf %317, %343 : vector<13x32xf32>
    %345 = vector.extract_strided_slice %285 {offsets = [0, 16], sizes = [13, 8], strides = [1, 1]} : vector<13x32xbf16> to vector<13x8xbf16>
    %346 = vector.extract_strided_slice %286 {offsets = [0, 16], sizes = [13, 8], strides = [1, 1]} : vector<13x32xbf16> to vector<13x8xbf16>
    %cst_144 = arith.constant dense<0.000000e+00> : vector<13x13xf32>
    %347 = tpu.matmul %345, %346, %cst_144 {dimension_numbers = #tpu.dot_dimension_numbers<[1], [1], [0], [0], [0, 0, 1, 0], [], []>} : vector<13x8xbf16>, vector<13x8xbf16>, vector<13x13xf32> -> vector<13x13xf32>
    %348 = arith.addf %347, %288 : vector<13x13xf32>
    %cst_145 = arith.constant dense<0xFF800000> : vector<13xf32>
    %349 = vector.multi_reduction <maximumf>, %348, %cst_145 [1] : vector<13x13xf32> to vector<13xf32>
    %350 = vector.shape_cast %349 : vector<13xf32> to vector<13x1xf32>
    %351 = vector.broadcast %350 : vector<13x1xf32> to vector<13x13xf32>
    %352 = arith.subf %348, %351 : vector<13x13xf32>
    %353 = math.exp %352 : vector<13x13xf32>
    %cst_146 = arith.constant dense<0.000000e+00> : vector<13xf32>
    %354 = vector.multi_reduction <add>, %353, %cst_146 [1] : vector<13x13xf32> to vector<13xf32>
    %355 = vector.shape_cast %354 : vector<13xf32> to vector<13x1xf32>
    %356 = tpu.reciprocal %355 {approx = true} : vector<13x1xf32> -> vector<13x1xf32>
    %357 = vector.broadcast %356 : vector<13x1xf32> to vector<13x13xf32>
    %358 = arith.mulf %353, %357 : vector<13x13xf32>
    %c16_i32_147 = arith.constant 16 : i32
    %359 = vector.broadcast %c16_i32_147 : i32 to vector<1x32xi32>
    %360 = arith.cmpi sge, %289, %359 : vector<1x32xi32>
    %c24_i32_148 = arith.constant 24 : i32
    %361 = vector.broadcast %c24_i32_148 : i32 to vector<1x32xi32>
    %362 = arith.cmpi slt, %289, %361 : vector<1x32xi32>
    %363 = arith.andi %360, %362 : vector<1x32xi1>
    %cst_149 = arith.constant 0.000000e+00 : f32
    %364 = vector.shape_cast %363 : vector<1x32xi1> to vector<1x32xi1>
    %365 = vector.broadcast %364 : vector<1x32xi1> to vector<13x32xi1>
    %366 = vector.broadcast %cst_149 : f32 to vector<13x32xf32>
    %367 = arith.select %365, %284, %366 : vector<13x32xi1>, vector<13x32xf32>
    %368 = arith.truncf %358 : vector<13x13xf32> to vector<13x13xbf16>
    %369 = arith.truncf %367 : vector<13x32xf32> to vector<13x32xbf16>
    %cst_150 = arith.constant dense<0.000000e+00> : vector<13x32xf32>
    %370 = tpu.matmul %368, %369, %cst_150 {dimension_numbers = #tpu.dot_dimension_numbers<[1], [0], [0], [1], [0, 0, 1, 1], [], []>} : vector<13x13xbf16>, vector<13x32xbf16>, vector<13x32xf32> -> vector<13x32xf32>
    %371 = arith.addf %344, %370 : vector<13x32xf32>
    %372 = vector.extract_strided_slice %285 {offsets = [0, 24], sizes = [13, 8], strides = [1, 1]} : vector<13x32xbf16> to vector<13x8xbf16>
    %373 = vector.extract_strided_slice %286 {offsets = [0, 24], sizes = [13, 8], strides = [1, 1]} : vector<13x32xbf16> to vector<13x8xbf16>
    %cst_151 = arith.constant dense<0.000000e+00> : vector<13x13xf32>
    %374 = tpu.matmul %372, %373, %cst_151 {dimension_numbers = #tpu.dot_dimension_numbers<[1], [1], [0], [0], [0, 0, 1, 0], [], []>} : vector<13x8xbf16>, vector<13x8xbf16>, vector<13x13xf32> -> vector<13x13xf32>
    %375 = arith.addf %374, %288 : vector<13x13xf32>
    %cst_152 = arith.constant dense<0xFF800000> : vector<13xf32>
    %376 = vector.multi_reduction <maximumf>, %375, %cst_152 [1] : vector<13x13xf32> to vector<13xf32>
    %377 = vector.shape_cast %376 : vector<13xf32> to vector<13x1xf32>
    %378 = vector.broadcast %377 : vector<13x1xf32> to vector<13x13xf32>
    %379 = arith.subf %375, %378 : vector<13x13xf32>
    %380 = math.exp %379 : vector<13x13xf32>
    %cst_153 = arith.constant dense<0.000000e+00> : vector<13xf32>
    %381 = vector.multi_reduction <add>, %380, %cst_153 [1] : vector<13x13xf32> to vector<13xf32>
    %382 = vector.shape_cast %381 : vector<13xf32> to vector<13x1xf32>
    %383 = tpu.reciprocal %382 {approx = true} : vector<13x1xf32> -> vector<13x1xf32>
    %384 = vector.broadcast %383 : vector<13x1xf32> to vector<13x13xf32>
    %385 = arith.mulf %380, %384 : vector<13x13xf32>
    %c24_i32_154 = arith.constant 24 : i32
    %386 = vector.broadcast %c24_i32_154 : i32 to vector<1x32xi32>
    %387 = arith.cmpi sge, %289, %386 : vector<1x32xi32>
    %c32_i32_155 = arith.constant 32 : i32
    %388 = vector.broadcast %c32_i32_155 : i32 to vector<1x32xi32>
    %389 = arith.cmpi slt, %289, %388 : vector<1x32xi32>
    %390 = arith.andi %387, %389 : vector<1x32xi1>
    %cst_156 = arith.constant 0.000000e+00 : f32
    %391 = vector.shape_cast %390 : vector<1x32xi1> to vector<1x32xi1>
    %392 = vector.broadcast %391 : vector<1x32xi1> to vector<13x32xi1>
    %393 = vector.broadcast %cst_156 : f32 to vector<13x32xf32>
    %394 = arith.select %392, %284, %393 : vector<13x32xi1>, vector<13x32xf32>
    %395 = arith.truncf %385 : vector<13x13xf32> to vector<13x13xbf16>
    %396 = arith.truncf %394 : vector<13x32xf32> to vector<13x32xbf16>
    %cst_157 = arith.constant dense<0.000000e+00> : vector<13x32xf32>
    %397 = tpu.matmul %395, %396, %cst_157 {dimension_numbers = #tpu.dot_dimension_numbers<[1], [0], [0], [1], [0, 0, 1, 1], [], []>} : vector<13x13xbf16>, vector<13x32xbf16>, vector<13x32xf32> -> vector<13x32xf32>
    %398 = arith.addf %371, %397 : vector<13x32xf32>
    %399 = arith.truncf %398 : vector<13x32xf32> to vector<13x32xbf16>
    %cst_158 = arith.constant dense<0.000000e+00> : vector<13x32xf32>
    %400 = tpu.matmul %399, %257, %cst_158 {dimension_numbers = #tpu.dot_dimension_numbers<[1], [0], [0], [1], [0, 0, 1, 1], [], []>} : vector<13x32xbf16>, vector<32x32xbf16>, vector<13x32xf32> -> vector<13x32xf32>
    %401 = vector.broadcast %259 : vector<1x32xf32> to vector<13x32xf32>
    %402 = arith.addf %400, %401 : vector<13x32xf32>
    %403 = arith.addf %251, %402 : vector<13x32xf32>
    %cst_159 = arith.constant dense<0.000000e+00> : vector<13xf32>
    %404 = vector.multi_reduction <add>, %403, %cst_159 [1] : vector<13x32xf32> to vector<13xf32>
    %405 = vector.shape_cast %404 : vector<13xf32> to vector<13x1xf32>
    %cst_160 = arith.constant 3.200000e+01 : f32
    %406 = vector.broadcast %cst_160 : f32 to vector<13x1xf32>
    %407 = arith.divf %405, %406 : vector<13x1xf32>
    %408 = vector.broadcast %407 : vector<13x1xf32> to vector<13x32xf32>
    %409 = arith.subf %403, %408 : vector<13x32xf32>
    %410 = arith.mulf %409, %409 : vector<13x32xf32>
    %cst_161 = arith.constant dense<0.000000e+00> : vector<13xf32>
    %411 = vector.multi_reduction <add>, %410, %cst_161 [1] : vector<13x32xf32> to vector<13xf32>
    %412 = vector.shape_cast %411 : vector<13xf32> to vector<13x1xf32>
    %cst_162 = arith.constant 3.200000e+01 : f32
    %413 = vector.broadcast %cst_162 : f32 to vector<13x1xf32>
    %414 = arith.divf %412, %413 : vector<13x1xf32>
    %415 = vector.broadcast %407 : vector<13x1xf32> to vector<13x32xf32>
    %416 = arith.subf %403, %415 : vector<13x32xf32>
    %cst_163 = arith.constant 9.99999996E-13 : f32
    %417 = vector.broadcast %cst_163 : f32 to vector<13x1xf32>
    %418 = arith.addf %414, %417 : vector<13x1xf32>
    %419 = math.rsqrt %418 : vector<13x1xf32>
    %420 = vector.broadcast %419 : vector<13x1xf32> to vector<13x32xf32>
    %421 = arith.mulf %416, %420 : vector<13x32xf32>
    %422 = vector.broadcast %261 : vector<1x32xf32> to vector<13x32xf32>
    %423 = arith.mulf %421, %422 : vector<13x32xf32>
    %424 = vector.broadcast %263 : vector<1x32xf32> to vector<13x32xf32>
    %425 = arith.addf %423, %424 : vector<13x32xf32>
    %426 = arith.truncf %425 : vector<13x32xf32> to vector<13x32xbf16>
    %cst_164 = arith.constant dense<0.000000e+00> : vector<13x128xf32>
    %427 = tpu.matmul %426, %265, %cst_164 {dimension_numbers = #tpu.dot_dimension_numbers<[1], [0], [0], [1], [0, 0, 1, 1], [], []>} : vector<13x32xbf16>, vector<32x128xbf16>, vector<13x128xf32> -> vector<13x128xf32>
    %428 = vector.broadcast %267 : vector<1x128xf32> to vector<13x128xf32>
    %429 = arith.addf %427, %428 : vector<13x128xf32>
    %cst_165 = arith.constant 5.000000e-01 : f32
    %430 = vector.broadcast %cst_165 : f32 to vector<13x128xf32>
    %431 = arith.mulf %430, %429 : vector<13x128xf32>
    %cst_166 = arith.constant 4.471500e-02 : f32
    %432 = vector.broadcast %cst_166 : f32 to vector<13x128xf32>
    %433 = arith.mulf %432, %429 : vector<13x128xf32>
    %434 = arith.mulf %433, %429 : vector<13x128xf32>
    %435 = arith.mulf %434, %429 : vector<13x128xf32>
    %436 = arith.addf %429, %435 : vector<13x128xf32>
    %cst_167 = arith.constant 0.797884583 : f32
    %437 = vector.broadcast %cst_167 : f32 to vector<13x128xf32>
    %438 = arith.mulf %437, %436 : vector<13x128xf32>
    %439 = math.tanh %438 : vector<13x128xf32>
    %cst_168 = arith.constant 1.000000e+00 : f32
    %440 = vector.broadcast %cst_168 : f32 to vector<13x128xf32>
    %441 = arith.addf %440, %439 : vector<13x128xf32>
    %442 = arith.mulf %431, %441 : vector<13x128xf32>
    %443 = arith.truncf %442 : vector<13x128xf32> to vector<13x128xbf16>
    %cst_169 = arith.constant dense<0.000000e+00> : vector<13x32xf32>
    %444 = tpu.matmul %443, %269, %cst_169 {dimension_numbers = #tpu.dot_dimension_numbers<[1], [0], [0], [1], [0, 0, 1, 1], [], []>} : vector<13x128xbf16>, vector<128x32xbf16>, vector<13x32xf32> -> vector<13x32xf32>
    %445 = vector.broadcast %271 : vector<1x32xf32> to vector<13x32xf32>
    %446 = arith.addf %444, %445 : vector<13x32xf32>
    %447 = arith.addf %425, %446 : vector<13x32xf32>
    %cst_170 = arith.constant dense<0.000000e+00> : vector<13xf32>
    %448 = vector.multi_reduction <add>, %447, %cst_170 [1] : vector<13x32xf32> to vector<13xf32>
    %449 = vector.shape_cast %448 : vector<13xf32> to vector<13x1xf32>
    %cst_171 = arith.constant 3.200000e+01 : f32
    %450 = vector.broadcast %cst_171 : f32 to vector<13x1xf32>
    %451 = arith.divf %449, %450 : vector<13x1xf32>
    %452 = vector.broadcast %451 : vector<13x1xf32> to vector<13x32xf32>
    %453 = arith.subf %447, %452 : vector<13x32xf32>
    %454 = arith.mulf %453, %453 : vector<13x32xf32>
    %cst_172 = arith.constant dense<0.000000e+00> : vector<13xf32>
    %455 = vector.multi_reduction <add>, %454, %cst_172 [1] : vector<13x32xf32> to vector<13xf32>
    %456 = vector.shape_cast %455 : vector<13xf32> to vector<13x1xf32>
    %cst_173 = arith.constant 3.200000e+01 : f32
    %457 = vector.broadcast %cst_173 : f32 to vector<13x1xf32>
    %458 = arith.divf %456, %457 : vector<13x1xf32>
    %459 = vector.broadcast %451 : vector<13x1xf32> to vector<13x32xf32>
    %460 = arith.subf %447, %459 : vector<13x32xf32>
    %cst_174 = arith.constant 9.99999996E-13 : f32
    %461 = vector.broadcast %cst_174 : f32 to vector<13x1xf32>
    %462 = arith.addf %458, %461 : vector<13x1xf32>
    %463 = math.rsqrt %462 : vector<13x1xf32>
    %464 = vector.broadcast %463 : vector<13x1xf32> to vector<13x32xf32>
    %465 = arith.mulf %460, %464 : vector<13x32xf32>
    %466 = vector.broadcast %273 : vector<1x32xf32> to vector<13x32xf32>
    %467 = arith.mulf %465, %466 : vector<13x32xf32>
    %468 = vector.broadcast %275 : vector<1x32xf32> to vector<13x32xf32>
    %469 = arith.addf %467, %468 : vector<13x32xf32>
    %470 = vector.extract_strided_slice %469 {offsets = [0, 0], sizes = [1, 32], strides = [1, 1]} : vector<13x32xf32> to vector<1x32xf32>
    %c0_175 = arith.constant 0 : index
    %c0_176 = arith.constant 0 : index
    %471 = vector.load %arg17[%c0_175, %c0_176] : memref<32x32xbf16, #tpu.memory_space<vmem>>, vector<32x32xbf16>
    %472 = arith.truncf %470 : vector<1x32xf32> to vector<1x32xbf16>
    %cst_177 = arith.constant dense<0.000000e+00> : vector<1x32xf32>
    %473 = tpu.matmul %472, %471, %cst_177 {dimension_numbers = #tpu.dot_dimension_numbers<[1], [0], [0], [1], [0, 0, 1, 1], [], []>} : vector<1x32xbf16>, vector<32x32xbf16>, vector<1x32xf32> -> vector<1x32xf32>
    %c0_178 = arith.constant 0 : index
    %c0_179 = arith.constant 0 : index
    %474 = vector.load %arg18[%c0_178, %c0_179] : memref<1x32xf32, #tpu.memory_space<vmem>>, vector<1x32xf32>
    %475 = arith.addf %473, %474 : vector<1x32xf32>
    %476 = math.tanh %475 : vector<1x32xf32>
    %c0_180 = arith.constant 0 : index
    %c0_181 = arith.constant 0 : index
    %477 = vector.load %arg19[%c0_180, %c0_181] : memref<32x64xbf16, #tpu.memory_space<vmem>>, vector<32x64xbf16>
    %478 = arith.truncf %476 : vector<1x32xf32> to vector<1x32xbf16>
    %cst_182 = arith.constant dense<0.000000e+00> : vector<1x64xf32>
    %479 = tpu.matmul %478, %477, %cst_182 {dimension_numbers = #tpu.dot_dimension_numbers<[1], [0], [0], [1], [0, 0, 1, 1], [], []>} : vector<1x32xbf16>, vector<32x64xbf16>, vector<1x64xf32> -> vector<1x64xf32>
    %c0_183 = arith.constant 0 : index
    %c0_184 = arith.constant 0 : index
    %480 = vector.load %arg20[%c0_183, %c0_184] : memref<1x64xf32, #tpu.memory_space<vmem>>, vector<1x64xf32>
    %481 = arith.addf %479, %480 : vector<1x64xf32>
    %cst_185 = arith.constant 5.000000e-01 : f32
    %482 = vector.broadcast %cst_185 : f32 to vector<1x64xf32>
    %483 = arith.mulf %482, %481 : vector<1x64xf32>
    %cst_186 = arith.constant 4.471500e-02 : f32
    %484 = vector.broadcast %cst_186 : f32 to vector<1x64xf32>
    %485 = arith.mulf %484, %481 : vector<1x64xf32>
    %486 = arith.mulf %485, %481 : vector<1x64xf32>
    %487 = arith.mulf %486, %481 : vector<1x64xf32>
    %488 = arith.addf %481, %487 : vector<1x64xf32>
    %cst_187 = arith.constant 0.797884583 : f32
    %489 = vector.broadcast %cst_187 : f32 to vector<1x64xf32>
    %490 = arith.mulf %489, %488 : vector<1x64xf32>
    %491 = math.tanh %490 : vector<1x64xf32>
    %cst_188 = arith.constant 1.000000e+00 : f32
    %492 = vector.broadcast %cst_188 : f32 to vector<1x64xf32>
    %493 = arith.addf %492, %491 : vector<1x64xf32>
    %494 = arith.mulf %483, %493 : vector<1x64xf32>
    %c0_189 = arith.constant 0 : index
    %c0_190 = arith.constant 0 : index
    %495 = vector.load %arg21[%c0_189, %c0_190] : memref<1x64xf32, #tpu.memory_space<vmem>>, vector<1x64xf32>
    %c0_191 = arith.constant 0 : index
    %c0_192 = arith.constant 0 : index
    %496 = vector.load %arg22[%c0_191, %c0_192] : memref<1x64xf32, #tpu.memory_space<vmem>>, vector<1x64xf32>
    %cst_193 = arith.constant dense<0.000000e+00> : vector<1xf32>
    %497 = vector.multi_reduction <add>, %494, %cst_193 [1] : vector<1x64xf32> to vector<1xf32>
    %498 = vector.shape_cast %497 : vector<1xf32> to vector<1x1xf32>
    %cst_194 = arith.constant 6.400000e+01 : f32
    %499 = vector.broadcast %cst_194 : f32 to vector<1x1xf32>
    %500 = arith.divf %498, %499 : vector<1x1xf32>
    %501 = vector.broadcast %500 : vector<1x1xf32> to vector<1x64xf32>
    %502 = arith.subf %494, %501 : vector<1x64xf32>
    %503 = arith.mulf %502, %502 : vector<1x64xf32>
    %cst_195 = arith.constant dense<0.000000e+00> : vector<1xf32>
    %504 = vector.multi_reduction <add>, %503, %cst_195 [1] : vector<1x64xf32> to vector<1xf32>
    %505 = vector.shape_cast %504 : vector<1xf32> to vector<1x1xf32>
    %cst_196 = arith.constant 6.400000e+01 : f32
    %506 = vector.broadcast %cst_196 : f32 to vector<1x1xf32>
    %507 = arith.divf %505, %506 : vector<1x1xf32>
    %508 = vector.broadcast %500 : vector<1x1xf32> to vector<1x64xf32>
    %509 = arith.subf %494, %508 : vector<1x64xf32>
    %cst_197 = arith.constant 9.99999996E-13 : f32
    %510 = vector.broadcast %cst_197 : f32 to vector<1x1xf32>
    %511 = arith.addf %507, %510 : vector<1x1xf32>
    %512 = math.rsqrt %511 : vector<1x1xf32>
    %513 = vector.broadcast %512 : vector<1x1xf32> to vector<1x64xf32>
    %514 = arith.mulf %509, %513 : vector<1x64xf32>
    %515 = arith.mulf %514, %495 : vector<1x64xf32>
    %516 = arith.addf %515, %496 : vector<1x64xf32>
    %c0_198 = arith.constant 0 : index
    %c0_199 = arith.constant 0 : index
    %517 = vector.load %arg23[%c0_198, %c0_199] : memref<64x3xbf16, #tpu.memory_space<vmem>>, vector<64x3xbf16>
    %518 = arith.truncf %516 : vector<1x64xf32> to vector<1x64xbf16>
    %cst_200 = arith.constant dense<0.000000e+00> : vector<1x3xf32>
    %519 = tpu.matmul %518, %517, %cst_200 {dimension_numbers = #tpu.dot_dimension_numbers<[1], [0], [0], [1], [0, 0, 1, 1], [], []>} : vector<1x64xbf16>, vector<64x3xbf16>, vector<1x3xf32> -> vector<1x3xf32>
    %c0_201 = arith.constant 0 : index
    %c0_202 = arith.constant 0 : index
    %520 = vector.load %arg24[%c0_201, %c0_202] : memref<1x3xf32, #tpu.memory_space<vmem>>, vector<1x3xf32>
    %521 = arith.addf %519, %520 : vector<1x3xf32>
    %c0_203 = arith.constant 0 : index
    %c0_204 = arith.constant 0 : index
    %c0_205 = arith.constant 0 : index
    %522 = vector.load %arg25[%c0_203, %c0_204, %c0_205] : memref<1x1x3xf32, #tpu.memory_space<vmem>>, vector<1x1x3xf32>
    %523 = vector.shape_cast %522 : vector<1x1x3xf32> to vector<1x3xf32>
    %524 = vector.shape_cast %521 : vector<1x3xf32> to vector<1x1x3xf32>
    tpu.vector_store %arg25[%c0_203, %c0_204, %c0_205], %524 {strides = array<i32>} : memref<1x1x3xf32, #tpu.memory_space<vmem>>, vector<1x1x3xf32>,
    return
  }
  func.func @transform_0(%arg0: i32) -> (i32, i32, i32) {
    %c0_i32 = arith.constant 0 : i32
    %c0_i32_0 = arith.constant 0 : i32
    %c0_i32_1 = arith.constant 0 : i32
    return %arg0, %c0_i32, %c0_i32_0 : i32, i32, i32
  }
  func.func @transform_1(%arg0: i32) -> (i32, i32, i32) {
    %c0_i32 = arith.constant 0 : i32
    %c0_i32_0 = arith.constant 0 : i32
    %c0_i32_1 = arith.constant 0 : i32
    return %arg0, %c0_i32, %c0_i32_0 : i32, i32, i32
  }
  func.func @transform_2(%arg0: i32) -> (i32, i32) {
    %c0_i32 = arith.constant 0 : i32
    %c0_i32_0 = arith.constant 0 : i32
    %c0_i32_1 = arith.constant 0 : i32
    return %c0_i32, %c0_i32_0 : i32, i32
  }
  func.func @transform_3(%arg0: i32) -> (i32, i32) {
    %c0_i32 = arith.constant 0 : i32
    %c0_i32_0 = arith.constant 0 : i32
    %c0_i32_1 = arith.constant 0 : i32
    return %c0_i32, %c0_i32_0 : i32, i32
  }
  func.func @transform_4(%arg0: i32) -> (i32, i32, i32) {
    %c0_i32 = arith.constant 0 : i32
    %c0_i32_0 = arith.constant 0 : i32
    %c0_i32_1 = arith.constant 0 : i32
    %c0_i32_2 = arith.constant 0 : i32
    return %c0_i32, %c0_i32_0, %c0_i32_1 : i32, i32, i32
  }
  func.func @transform_5(%arg0: i32) -> (i32, i32, i32) {
    %c0_i32 = arith.constant 0 : i32
    %c0_i32_0 = arith.constant 0 : i32
    %c0_i32_1 = arith.constant 0 : i32
    %c0_i32_2 = arith.constant 0 : i32
    return %c0_i32, %c0_i32_0, %c0_i32_1 : i32, i32, i32
  }
  func.func @transform_6(%arg0: i32) -> (i32, i32, i32) {
    %c0_i32 = arith.constant 0 : i32
    %c0_i32_0 = arith.constant 0 : i32
    %c0_i32_1 = arith.constant 0 : i32
    %c0_i32_2 = arith.constant 0 : i32
    return %c0_i32, %c0_i32_0, %c0_i32_1 : i32, i32, i32
  }
  func.func @transform_7(%arg0: i32) -> (i32, i32, i32) {
    %c0_i32 = arith.constant 0 : i32
    %c0_i32_0 = arith.constant 0 : i32
    %c0_i32_1 = arith.constant 0 : i32
    %c0_i32_2 = arith.constant 0 : i32
    return %c0_i32, %c0_i32_0, %c0_i32_1 : i32, i32, i32
  }
  func.func @transform_8(%arg0: i32) -> (i32, i32, i32) {
    %c0_i32 = arith.constant 0 : i32
    %c0_i32_0 = arith.constant 0 : i32
    %c0_i32_1 = arith.constant 0 : i32
    %c0_i32_2 = arith.constant 0 : i32
    return %c0_i32, %c0_i32_0, %c0_i32_1 : i32, i32, i32
  }
  func.func @transform_9(%arg0: i32) -> (i32, i32, i32) {
    %c0_i32 = arith.constant 0 : i32
    %c0_i32_0 = arith.constant 0 : i32
    %c0_i32_1 = arith.constant 0 : i32
    %c0_i32_2 = arith.constant 0 : i32
    return %c0_i32, %c0_i32_0, %c0_i32_1 : i32, i32, i32
  }
  func.func @transform_10(%arg0: i32) -> (i32, i32, i32) {
    %c0_i32 = arith.constant 0 : i32
    %c0_i32_0 = arith.constant 0 : i32
    %c0_i32_1 = arith.constant 0 : i32
    %c0_i32_2 = arith.constant 0 : i32
    return %c0_i32, %c0_i32_0, %c0_i32_1 : i32, i32, i32
  }
  func.func @transform_11(%arg0: i32) -> (i32, i32, i32) {
    %c0_i32 = arith.constant 0 : i32
    %c0_i32_0 = arith.constant 0 : i32
    %c0_i32_1 = arith.constant 0 : i32
    %c0_i32_2 = arith.constant 0 : i32
    return %c0_i32, %c0_i32_0, %c0_i32_1 : i32, i32, i32
  }
  func.func @transform_12(%arg0: i32) -> (i32, i32, i32) {
    %c0_i32 = arith.constant 0 : i32
    %c0_i32_0 = arith.constant 0 : i32
    %c0_i32_1 = arith.constant 0 : i32
    %c0_i32_2 = arith.constant 0 : i32
    return %c0_i32, %c0_i32_0, %c0_i32_1 : i32, i32, i32
  }
  func.func @transform_13(%arg0: i32) -> (i32, i32, i32) {
    %c0_i32 = arith.constant 0 : i32
    %c0_i32_0 = arith.constant 0 : i32
    %c0_i32_1 = arith.constant 0 : i32
    %c0_i32_2 = arith.constant 0 : i32
    return %c0_i32, %c0_i32_0, %c0_i32_1 : i32, i32, i32
  }
  func.func @transform_14(%arg0: i32) -> (i32, i32, i32) {
    %c0_i32 = arith.constant 0 : i32
    %c0_i32_0 = arith.constant 0 : i32
    %c0_i32_1 = arith.constant 0 : i32
    %c0_i32_2 = arith.constant 0 : i32
    return %c0_i32, %c0_i32_0, %c0_i32_1 : i32, i32, i32
  }
  func.func @transform_15(%arg0: i32) -> (i32, i32, i32) {
    %c0_i32 = arith.constant 0 : i32
    %c0_i32_0 = arith.constant 0 : i32
    %c0_i32_1 = arith.constant 0 : i32
    %c0_i32_2 = arith.constant 0 : i32
    return %c0_i32, %c0_i32_0, %c0_i32_1 : i32, i32, i32
  }
  func.func @transform_16(%arg0: i32) -> (i32, i32) {
    %c0_i32 = arith.constant 0 : i32
    %c0_i32_0 = arith.constant 0 : i32
    %c0_i32_1 = arith.constant 0 : i32
    return %c0_i32, %c0_i32_0 : i32, i32
  }
  func.func @transform_17(%arg0: i32) -> (i32, i32) {
    %c0_i32 = arith.constant 0 : i32
    %c0_i32_0 = arith.constant 0 : i32
    %c0_i32_1 = arith.constant 0 : i32
    return %c0_i32, %c0_i32_0 : i32, i32
  }
  func.func @transform_18(%arg0: i32) -> (i32, i32) {
    %c0_i32 = arith.constant 0 : i32
    %c0_i32_0 = arith.constant 0 : i32
    %c0_i32_1 = arith.constant 0 : i32
    return %c0_i32, %c0_i32_0 : i32, i32
  }
  func.func @transform_19(%arg0: i32) -> (i32, i32) {
    %c0_i32 = arith.constant 0 : i32
    %c0_i32_0 = arith.constant 0 : i32
    %c0_i32_1 = arith.constant 0 : i32
    return %c0_i32, %c0_i32_0 : i32, i32
  }
  func.func @transform_20(%arg0: i32) -> (i32, i32) {
    %c0_i32 = arith.constant 0 : i32
    %c0_i32_0 = arith.constant 0 : i32
    %c0_i32_1 = arith.constant 0 : i32
    return %c0_i32, %c0_i32_0 : i32, i32
  }
  func.func @transform_21(%arg0: i32) -> (i32, i32) {
    %c0_i32 = arith.constant 0 : i32
    %c0_i32_0 = arith.constant 0 : i32
    %c0_i32_1 = arith.constant 0 : i32
    return %c0_i32, %c0_i32_0 : i32, i32
  }
  func.func @transform_22(%arg0: i32) -> (i32, i32) {
    %c0_i32 = arith.constant 0 : i32
    %c0_i32_0 = arith.constant 0 : i32
    %c0_i32_1 = arith.constant 0 : i32
    return %c0_i32, %c0_i32_0 : i32, i32
  }
  func.func @transform_23(%arg0: i32) -> (i32, i32) {
    %c0_i32 = arith.constant 0 : i32
    %c0_i32_0 = arith.constant 0 : i32
    %c0_i32_1 = arith.constant 0 : i32
    return %c0_i32, %c0_i32_0 : i32, i32
  }
  func.func @transform_24(%arg0: i32) -> (i32, i32, i32) {
    %c0_i32 = arith.constant 0 : i32
    %c0_i32_0 = arith.constant 0 : i32
    %c0_i32_1 = arith.constant 0 : i32
    return %arg0, %c0_i32, %c0_i32_0 : i32, i32, i32
  }
}

</mosaic_0001>

<bundles_post_ra>
// kernel: chartfc_forward.2
= control target key start
LH: loop header
LB: loop body
LE: loop exit
PB: predicated region body
PF: predicated region fallthrough
CT: control target
= control target key end

     0   :  { %s3632_s24 = smov 0   ;;  %s4203_s0 = inlined_call_operand.vmem [shape: bf16[2,5,768], index: 0, kind: input, shape index: {}]   ;;  %s4204_s1 = inlined_call_operand.vmem [shape: f32[1,5,32], index: 1, kind: input, shape index: {}]   ;;  %s4205_s2 = inlined_call_operand.vmem [shape: bf16[768,32], index: 2, kind: input, shape index: {}]   ;;  %s4206_s3 = inlined_call_operand.vmem [shape: bf16[2,32,96], index: 3, kind: input, shape index: {}]   ;;  %s4207_s4 = inlined_call_operand.vmem [shape: f32[2,1,96], index: 4, kind: input, shape index: {}]   ;;  %s4208_s5 = inlined_call_operand.vmem [shape: bf16[2,32,32], index: 5, kind: input, shape index: {}]   ;;  %s4209_s6 = inlined_call_operand.vmem [shape: f32[2,1,32], index: 6, kind: input, shape index: {}]   ;;  %s4210_s7 = inlined_call_operand.vmem [shape: f32[2,1,32], index: 7, kind: input, shape index: {}]   ;;  %s4211_s8 = inlined_call_operand.vmem [shape: f32[2,1,32], index: 8, kind: input, shape index: {}]   ;;  %s4212_s9 = inlined_call_operand.vmem [shape: bf16[2,32,128], index: 9, kind: input, shape index: {}]   ;;  %s4213_s10 = inlined_call_operand.vmem [shape: f32[2,1,128], index: 10, kind: input, shape index: {}]   ;;  %s4214_s11 = inlined_call_operand.vmem [shape: bf16[2,128,32], index: 11, kind: input, shape index: {}]   ;;  %s4215_s12 = inlined_call_operand.vmem [shape: f32[2,1,32], index: 12, kind: input, shape index: {}]   ;;  %s4216_s13 = inlined_call_operand.vmem [shape: f32[2,1,32], index: 13, kind: input, shape index: {}]   ;;  %s4217_s14 = inlined_call_operand.vmem [shape: f32[2,1,32], index: 14, kind: input, shape index: {}]   ;;  %s4218_s15 = inlined_call_operand.vmem [shape: f32[1,32], index: 15, kind: input, shape index: {}]   ;;  %s4219_s16 = inlined_call_operand.vmem [shape: f32[1,32], index: 16, kind: input, shape index: {}]   ;;  %s4220_s17 = inlined_call_operand.vmem [shape: f32[2,5,32], index: 17, kind: output, shape index: {}]  }
   0x1   :  { %4224 = sst [smem:[#allocation2_spill]] %s4203_s0 }
   0x2   :  { %4225 = sst [smem:[#allocation3_spill]] %s4204_s1 }
   0x3 LB: > { %s2866_s25 = sadd.s32 4294967295, %s3529_s24   ;;  %p2870_p0 = scmp.ge.s32.totalorder %s3529_s24, 1  ;;  %s3529_s24 = sphi %s3632_s24, %s27_s24  }
   0x4   : > { %p487_p1 = scmp.lt.s32.totalorder %s3529_s24, 3 }
   0x6   : > { %p488_p2 = pnand %p2870_p0, %p487_p1 }
   0x7   : > { %v3395_v0 = vld [vmem:[%s4205_s2 + $0x40] sm:$0xff] (!%p488_p2)   ;;  %v3399_v4 = vld [vmem:[%s4205_s2 + $0x48] sm:$0xff] (!%p488_p2)   ;;  %v3403_v8 = vld [vmem:[%s4205_s2 + $0x50] sm:$0xff] (!%p488_p2)   ;;  %p538_p3 = scmp.lt.s32.totalorder (!%p488_p2), %s2866_s25, 1  ;;  %s4226_s20 = sld [smem:[#allocation2_spill]] (!%p488_p2)  ;;  %vm1113_vm0 = vcmask (!%p488_p2), 258048  }
   0x8   : > { %491 = sbr.rel (%p488_p2) target bundleno = 6507 (0x196b), region = 88  ;;  %v3396_v1 = vld [vmem:[%s4205_s2] sm:$0xff] (!%p488_p2)   ;;  %3033 = vmatprep.subr.bf16.mxu0 (!%p488_p2), %v3395_v0  ;;  %v3400_v5 = vld [vmem:[%s4205_s2 + $0x8] sm:$0xff] (!%p488_p2)   ;;  %v3404_v9 = vld [vmem:[%s4205_s2 + $0x10] sm:$0xff] (!%p488_p2)   ;;  %s4227_s28 = sld [smem:[#allocation3_spill]] (!%p488_p2)  ;;  %vm3532_vm1 = vmmov (!%p488_p2), 0  }
   0x9   : > { %v3397_v2 = vld [vmem:[%s4205_s2 + $0xc0] sm:$0xff] (!%p488_p2)   ;;  %3034 = vmatpush3.bf16.msra.mxu0 (!%p488_p2), %v3396_v1  ;;  %v3401_v6 = vld [vmem:[%s4205_s2 + $0xc8] sm:$0xff] (!%p488_p2)   ;;  %v3405_v10 = vld [vmem:[%s4205_s2 + $0xd0] sm:$0xff] (!%p488_p2)   ;;  %vm1161_vm2 = vcmask (!%p488_p2), 261120   ;;  %s3533_s26 = smov (!%p488_p2), 96   ;;  %s3534_s27 = smov (!%p488_p2), 120  }
   0xa   : > { %v3398_v3 = vld [vmem:[%s4205_s2 + $0x80] sm:$0xff] (!%p488_p2)   ;;  %3055 = vmatprep.subr.bf16.mxu1 (!%p488_p2), %v3397_v2  ;;  %3035 = vmatprep.subr.bf16.mxu0 (!%p488_p2), %v3399_v4  ;;  %v3402_v7 = vld [vmem:[%s4205_s2 + $0x88] sm:$0xff] (!%p488_p2)   ;;  %v3406_v11 = vld [vmem:[%s4205_s2 + $0x90] sm:$0xff] (!%p488_p2)   ;;  %vm1213_vm3 = vcmask (!%p488_p2), 64512   ;;  %vm1260_vm4 = vcmask (!%p488_p2), 36864   ;;  %s3536_s29 = smov (!%p488_p2), 80  }
   0xb   : > { %3056 = vmatpush3.bf16.msra.mxu1 (!%p488_p2), %v3398_v3  ;;  %v3407_v12 = vld [vmem:[%s4205_s2 + $0x58] sm:$0xff] (!%p488_p2)   ;;  %v3411_v16 = vld [vmem:[%s4205_s2 + $0x60] sm:$0xff] (!%p488_p2)   ;;  %v3415_v20 = vld [vmem:[%s4205_s2 + $0x68] sm:$0xff] (!%p488_p2)   ;;  %s4223_s0 = smov (!%p488_p2), 112   ;;  %vm1358_vm7 = vcmask (!%p488_p2), 1041408   ;;  %vm1359_vm9 = vcmask (!%p488_p2), 1042432  }
   0xc   : > { %3057 = vmatprep.subr.bf16.mxu1 (!%p488_p2), %v3401_v6  ;;  %v3408_v13 = vld [vmem:[%s4205_s2 + $0x18] sm:$0xff] (!%p488_p2)   ;;  %v3412_v17 = vld [vmem:[%s4205_s2 + $0x20] sm:$0xff] (!%p488_p2)   ;;  %v3416_v21 = vld [vmem:[%s4205_s2 + $0x28] sm:$0xff] (!%p488_p2)   ;;  %vm1354_vm11 = vcmask (!%p488_p2), 39936   ;;  %s3540_s30 = smov (!%p488_p2), 72   ;;  %s4222_s18 = smov (!%p488_p2), 104  }
   0xd   : > { %3036 = vmatpush3.bf16.msra.mxu0 (!%p488_p2), %v3400_v5  ;;  %v3409_v14 = vld [vmem:[%s4205_s2 + $0xd8] sm:$0xff] (!%p488_p2)   ;;  %v3413_v18 = vld [vmem:[%s4205_s2 + $0xe0] sm:$0xff] (!%p488_p2)   ;;  %v3417_v22 = vld [vmem:[%s4205_s2 + $0xe8] sm:$0xff] (!%p488_p2)  }
   0xe   : > { %3037 = vmatprep.subr.bf16.mxu0 (!%p488_p2), %v3403_v8  ;;  %v3410_v15 = vld [vmem:[%s4205_s2 + $0x98] sm:$0xff] (!%p488_p2)   ;;  %v3414_v19 = vld [vmem:[%s4205_s2 + $0xa0] sm:$0xff] (!%p488_p2)   ;;  %v3418_v23 = vld [vmem:[%s4205_s2 + $0xa8] sm:$0xff] (!%p488_p2)  }
   0xf   : > { %3058 = vmatpush3.bf16.msra.mxu1 %v3402_v7  ;;  %s4238_s25 = smov (!%p538_p3, %s2866_s25), 1  ;;  %v3419_v24 = vld [vmem:[%s4205_s2 + $0x70] sm:$0xff]   ;;  %v3423_v28 = vld [vmem:[%s4205_s2 + $0x78] sm:$0xff]   ;;  %v3429_v35 = vld [vmem:[%s4205_s2 + $0x140] sm:$0xff]  }
  0x10   : > { %3059 = vmatprep.subr.bf16.mxu1 %v3405_v10  ;;  %s3375_s22 = smul.u32 24, %s4238_s25  ;;  %v3420_v25 = vld [vmem:[%s4205_s2 + $0x30] sm:$0xff]   ;;  %v3424_v29 = vld [vmem:[%s4205_s2 + $0x38] sm:$0xff]   ;;  %v3432_v39 = vld [vmem:[%s4205_s2 + $0x100] sm:$0xff]  }
  0x11   : > { %3038 = vmatpush3.bf16.msra.mxu0 %v3404_v9  ;;  %v3421_v26 = vld [vmem:[%s4205_s2 + $0xf0] sm:$0xff]   ;;  %v3425_v30 = vld [vmem:[%s4205_s2 + $0xf8] sm:$0xff]   ;;  %v3433_v40 = vld [vmem:[%s4205_s2 + $0x148] sm:$0xff]  }
  0x12   : > { %3039 = vmatprep.subr.bf16.mxu0 %v3407_v12  ;;  %v3422_v27 = vld [vmem:[%s4205_s2 + $0xb0] sm:$0xff]   ;;  %s3737_s21 = scalar_lea.vmem %s4226_s20, %s3375_s22  ;;  %v3428_v34 = vld [vmem:[%s4205_s2 + $0xb8] sm:$0xff]   ;;  %v3434_v41 = vld [vmem:[%s4205_s2 + $0x108] sm:$0xff]   ;;  %s4221_s22 = smov 64  }
  0x13   : > { %3060 = vmatpush3.bf16.msra.mxu1 %v3406_v11  ;;  %v548_v31 = vld [vmem:[%s3737_s21] sm:$0x77]  ;;  %v549_v36 = vld [vmem:[%s3737_s21 + $0x8] sm:$0x77]  ;;  %v3435_v42 = vld [vmem:[%s4205_s2 + $0x150] sm:$0xff]  }
  0x14   : > { %3061 = vmatprep.subr.bf16.mxu1 %v3409_v14  ;;  %v2873_v32 = vcombine.low %v548_v31, %v548_v31  ;;  %v2874_v33 = vcombine.high %v548_v31, %v548_v31  ;;  %v2875_v37 = vcombine.low %v549_v36, %v549_v36  ;;  %v2876_v38 = vcombine.high %v549_v36, %v549_v36  ;;  %v3436_v43 = vld [vmem:[%s4205_s2 + $0x110] sm:$0xff]   ;;  %v3437_v44 = vld [vmem:[%s4205_s2 + $0x158] sm:$0xff]   ;;  %v3439_v46 = vld [vmem:[%s4205_s2 + $0x160] sm:$0xff]  }
  0x15   : > { %3040 = vmatpush3.bf16.msra.mxu0 %v3408_v13  ;;  %v3438_v45 = vld [vmem:[%s4205_s2 + $0x118] sm:$0xff]   ;;  %v3440_v47 = vld [vmem:[%s4205_s2 + $0x120] sm:$0xff]   ;;  %v3441_v48 = vld [vmem:[%s4205_s2 + $0x168] sm:$0xff]  }
  0x16   : > { %3041 = vmatprep.subr.bf16.mxu0 %v3411_v16  ;;  %989 = vmatprep.mubr.bf16.mxu0 %v2874_v33  ;;  %v550_v49 = vld [vmem:[%s3737_s21 + $0x10] sm:$0x77]  ;;  %v3442_v51 = vld [vmem:[%s4205_s2 + $0x128] sm:$0xff]   ;;  %v3445_v54 = vld [vmem:[%s4205_s2 + $0x178] sm:$0xff]   ;;  %s4234_s21 = smov 112  }
  0x17   : > { %3062 = vmatpush3.bf16.msra.mxu1 %v3410_v15  ;;  %1029 = vmatprep.mubr.bf16.mxu1 %v2876_v38  ;;  %v2878_v50 = vcombine.high %v550_v49, %v550_v49  ;;  %v3443_v52 = vld [vmem:[%s4205_s2 + $0x170] sm:$0xff]   ;;  %v3446_v55 = vld [vmem:[%s4205_s2 + $0x138] sm:$0xff]   ;;  %v2877_v56 = vcombine.low %v550_v49, %v550_v49  ;;  %v647_v58 = vld [vmem:[%s4227_s28] sm:$0x1f]  ;;  %s3535_s28 = smov 88  }
  0x18   : > { %3063 = vmatprep.subr.bf16.mxu1 %v3413_v18  ;;  %v3444_v53 = vld [vmem:[%s4205_s2 + $0x130] sm:$0xff]   ;;  %v3449_v18 = vld [vmem:[%s4206_s3] sm:$0xff]  }
  0x19   : > { %3042 = vmatpush3.bf16.msra.mxu0 %v3412_v17  ;;  %v2929_v31 = vld [vmem:[%s4207_s4] ss:$0 sm:$0xff] }
  0x1a   : > { %3043 = vmatprep.subr.bf16.mxu0 %v3415_v20  ;;  %v3450_v20 = vld [vmem:[%s4206_s3 + $0x8] sm:$0xff]  }
  0x1b   : > { %3064 = vmatpush3.bf16.msra.mxu1 %v3414_v19  ;;  %v3531_v19 = vmov 0.0  }
  0x1c   : > { %3065 = vmatprep.subr.bf16.mxu1 %v3417_v22 }
  0x1d   : > { %3044 = vmatpush3.bf16.msra.mxu0 %v3416_v21 }
  0x1e   : > { %3045 = vmatprep.subr.bf16.mxu0 %v3419_v24 }
  0x1f   : > { %3066 = vmatpush3.bf16.msra.mxu1 %v3418_v23 }
  0x20   : > { %3067 = vmatprep.subr.bf16.mxu1 %v3421_v26 }
  0x21   : > { %3046 = vmatpush3.bf16.msra.mxu0 %v3420_v25  ;;  %v2927_v25 = vld [vmem:[%s4210_s7] ss:$0 sm:$0xff] }
  0x22   : > { %3047 = vmatprep.subr.bf16.mxu0 %v3423_v28 }
  0x23   : > { %3068 = vmatpush3.bf16.msra.mxu1 %v3422_v27  ;;  %v2928_v27 = vld [vmem:[%s4211_s8] ss:$0 sm:$0xff] }
  0x24   : > { %3069 = vmatprep.subr.bf16.mxu1 %v3425_v30 }
  0x25   : > { %3048 = vmatpush3.bf16.msra.mxu0 %v3424_v29 }
  0x26   : > { %3077 = vmatprep.subr.bf16.mxu0 %v3429_v35 }
  0x27   : > { %3070 = vmatpush3.bf16.msra.mxu1 %v3428_v34 }
  0x28   : > { %990 = vmatmul.mubr.bf16.vlgmr.msra.gmra.mrb[0].mxu0 %v2873_v32  ;;  %3167 = vmatprep.subr.bf16.mxu1 %v3531_v19 }
  0x29   : > { %3078 = vmatpush3.bf16.msra.mxu0 %v3432_v39  ;;  %1069 = vmatprep.mubr.bf16.mxu0 %v2878_v50 }
  0x2a   : > { %1030 = vmatmul.mubr.bf16.vlgmr.msra.gmra.mrb[0].mxu1 %v2875_v37  ;;  %3079 = vmatprep.subr.bf16.mxu0 %v3433_v40 }
  0x2b   : > { %3168 = vmatpush3.bf16.msra.mxu1 %v3449_v18  ;;  %3171 = vmatprep.mubr.msk.bf16.mxu1 %vm3532_vm1, %v3531_v19 }
  0x2c   : > { %3169 = vmatprep.subr.bf16.mxu1 %v3531_v19 }
  0x2d   : > { %3080 = vmatpush3.bf16.msra.mxu0 %v3434_v41 }
  0x2e   : > { %3081 = vmatprep.subr.bf16.mxu0 %v3435_v42 }
  0x2f   : > { %3170 = vmatpush3.bf16.msra.mxu1 %v3450_v20 }
  0x30   : > { %3175 = vmatprep.subr.bf16.mxu1 %v3531_v19 }
  0x31   : > { %3082 = vmatpush3.bf16.msra.mxu0 %v3436_v43 }
  0x32   : > { %3083 = vmatprep.subr.bf16.mxu0 %v3437_v44 }
  0x35   : > { %3084 = vmatpush3.bf16.msra.mxu0 %v3438_v45 }
  0x36   : > { %3085 = vmatprep.subr.bf16.mxu0 %v3439_v46 }
  0x39   : > { %3086 = vmatpush3.bf16.msra.mxu0 %v3440_v47 }
  0x3a   : > { %3087 = vmatprep.subr.bf16.mxu0 %v3441_v48 }
  0x3d   : > { %3088 = vmatpush3.bf16.msra.mxu0 %v3442_v51 }
  0x3e   : > { %3089 = vmatprep.subr.bf16.mxu0 %v3443_v52 }
  0x41   : > { %3090 = vmatpush3.bf16.msra.mxu0 %v3444_v53 }
  0x42   : > { %3091 = vmatprep.subr.bf16.mxu0 %v3445_v54 }
  0x45   : > { %3092 = vmatpush3.bf16.msra.mxu0 %v3446_v55 }
  0x46   : > { %3223 = vmatprep.subr.bf16.mxu0 %v3531_v19 }
  0x48   : > { %1070 = vmatmul.mubr.bf16.vlgmr.msra.gmra.mrb[4].mxu0 %v2877_v56 }
  0x49   : > { %3227 = vmatprep.mubr.msk.bf16.mxu0 %vm3532_vm1, %v3531_v19 }
  0xfb   : > { %v3049_v57 = vpop.f32.mrb[0].mxu0 }
  0xfc   : > { %v3050_v59 = vpop.f32.mrb[1].mxu0 }
  0xfd   : > { %v3051_v60 = vadd.f32 %v3050_v59, %v3049_v57  ;;  %v3052_v61 = vpop.f32.mrb[2].mxu0  ;;  %v3071_v62 = vpop.f32.mrb[0].mxu1 }
  0xfe   : > { %v3053_v63 = vpop.f32.mrb[3].mxu0  ;;  %v3072_v0 = vpop.f32.mrb[1].mxu1 }
  0xff   : > { %v992_v1 = vadd.f32 %v3051_v60, %v647_v58  ;;  %v3073_v2 = vadd.f32 %v3072_v0, %v3071_v62  ;;  %v3074_v3 = vpop.f32.mrb[2].mxu1 }
 0x100   : > { %v3075_v4 = vpop.f32.mrb[3].mxu1 }
 0x101   : > { %v1032_v5 = vadd.f32 %v3073_v2, %v992_v1  ;;  %v1208_v1 = vlaneseq }
 0x103   : > { %v3864_v2 = vand.u32 127, %v1208_v1 }
 0x105   : > { %vm1346_vm5 = vcmp.ge.s32.totalorder %v3864_v2, 8  ;;  %vm1347_vm6 = vcmp.lt.s32.totalorder %v3864_v2, 16  ;;  %vm1273_vm10 = vcmp.lt.s32.totalorder %v3864_v2, 8  ;;  %vm1512_vm12 = vcmp.ge.s32.totalorder %v3864_v2, 16 }
 0x106   : > { %vm3868_vm8 = vmand %vm1346_vm5, %vm1347_vm6  ;;  %vm1513_vm13 = vcmp.lt.s32.totalorder %v3864_v2, 24  ;;  %vm1628_vm15 = vcmp.ge.s32.totalorder %v3864_v2, 24  ;;  %vm1629_vm5 = vcmp.lt.s32.totalorder %v3864_v2, 32 }
 0x107   : > { %vm3892_vm14 = vmand %vm1512_vm12, %vm1513_vm13 }
 0x108   : > { %vm3917_vm6 = vmand %vm1628_vm15, %vm1629_vm5 }
 0x11b   : > { %v3093_v6 = vpop.f32.mrb[4].mxu0 }
 0x11c   : > { %v3094_v7 = vpop.f32.mrb[5].mxu0 }
 0x11d   : > { %v3095_v8 = vadd.f32 %v3094_v7, %v3093_v6  ;;  %v3096_v9 = vpop.f32.mrb[6].mxu0  ;;  %v3539_v6 = vmov 65535  }
 0x11e   : > { %v3097_v10 = vpop.f32.mrb[7].mxu0  ;;  %v1360_v7 = vsel %vm1358_vm7, 4294967295, %v3539_v6 }
 0x11f   : > { %v3802_v11 = vadd.f32 %v3095_v8, %v1032_v5  ;;  %v3878_v10 = vsel %vm1359_vm9, %v1360_v7, 0 }
 0x121   : > { %v1114_v12 = vsel %vm1113_vm0, %v3802_v11, 0.0 }
 0x122   : > { %1115 = vadd.xlane.f32.xlu0 %v1114_v12 }
 0x1af   : > { %v1116_v13 = vpop.xlane.xlu0 %1115 }
 0x1b0   : > { %v1118_v14 = vmul.f32 0.03125, %v1116_v13 }
 0x1b2   : > { %v1119_v15 = vsub.f32 %v3802_v11, %v1118_v14 }
 0x1b4   : > { %v1120_v16 = vmul.f32 %v1119_v15, %v1119_v15 }
 0x1b6   : > { %v1121_v17 = vsel %vm1113_vm0, %v1120_v16, 0.0 }
 0x1b7   : > { %1122 = vadd.xlane.f32.xlu0 %v1121_v17 }
 0x244   : > { %v1123_v21 = vpop.xlane.xlu0 %1122 }
 0x245   : > { %v1124_v22 = vmul.f32 0.03125, %v1123_v21 }
 0x247   : > { %v1125_v23 = vadd.f32 1e-12, %v1124_v22 }
 0x249   : > { %3477 = vrsqrt.f32 %v1125_v23 }
 0x253   : > { %v3478_v24 = vpop.eup %3477 }
 0x254   : > { %v1127_v26 = vmul.f32 %v3478_v24, %v1119_v15 }
 0x256   : > { %v1134_v28 = vmul.f32 %v2927_v25, %v1127_v26 }
 0x258   : > { %v1141_v29 = vadd.f32 %v2928_v27, %v1134_v28 }
 0x25a   : > { %v1142_v30 = vpack.c.bf16 %v1141_v29, %v1141_v29 }
 0x25c   : > { %3172 = vmatmul.mubr.msk.bf16.vlgmr.msra.gmra.mrb[4].mxu1 %vm1161_vm2, %v1142_v30 }
 0x25d   : > { %3177 = vmatprep.mubr.msk.bf16.mxu1 %vm3532_vm1, %v3531_v19 }
 0x32f   : > { %v1199_v32 = vpop.f32.mrb[4].mxu1 }
 0x330   : > { %v1200_v33 = vadd.f32 %v2929_v31, %v1199_v32  ;;  %v3173_v34 = vpop.f32.mrb[5].mxu1 }
 0x331   : > { %v1202_v35 = vpop.f32.mrb[6].mxu1 }
 0x332   : > { %v1205_v36 = vmul.f32 0.35355338, %v1200_v33  ;;  %v3834_v37 = vpack.c.bf16 %v1200_v33, %v1200_v33  ;;  %v3174_v38 = vpop.f32.mrb[7].mxu1 }
 0x334   : > { %v3836_v39 = vpack.c.bf16 %v1205_v36, %v1205_v36  ;;  %1211 = vrot.lane.b32.xlu1 %v3834_v37, %s3533_s26 }
 0x336   : > { %1285 = vrot.lane.b32.xlu0 %v3836_v39, %s3534_s27 }
 0x338   : > { %1287 = vrot.lane.b32.xlu1 %v3834_v37, %s3535_s28 }
 0x3a6   : > { %v1212_v40 = vpop.permute.xlu1 %1211 }
 0x3a7   : > { %v1218_v41 = vsel %vm1213_vm3, %v1212_v40, 0 }
 0x3a8   : > { %3176 = vmatpush3.bf16.xpose.msra.mxu1 %v1218_v41  ;;  %v1286_v44 = vpop.permute.xlu0 %1285 }
 0x3a9   : > { %3181 = vmatprep.subr.bf16.mxu1 %v3531_v19 }
 0x3aa   : > { %v1288_v42 = vpop.permute.xlu1 %1287 }
 0x3ab   : > { %v1293_v43 = vsel %vm1213_vm3, %v1288_v42, 0 }
 0x3af   : > { %3178 = vmatmul.mubr.msk.bf16.vlgmr.msra.gmra.mrb[8].mxu1 %vm1213_vm3, %v3836_v39 }
 0x3b0   : > { %3182 = vmatpush3.bf16.xpose.msra.mxu1 %v1293_v43  ;;  %3183 = vmatprep.mubr.msk.bf16.mxu1 %vm3532_vm1, %v3531_v19 }
 0x3b1   : > { %3187 = vmatprep.subr.bf16.mxu1 %v3531_v19 }
 0x3b7   : > { %3184 = vmatmul.mubr.msk.bf16.vlgmr.msra.gmra.mrb[12].mxu1 %vm1213_vm3, %v1286_v44 }
 0x3b8   : > { %3189 = vmatprep.mubr.msk.bf16.mxu1 %vm3532_vm1, %v3531_v19 }
 0x482   : > { %v1254_v45 = vpop.f32.mrb[8].mxu1 }
 0x483   : > { %v3179_v46 = vpop.f32.mrb[9].mxu1  ;;  %v1261_v47 = vsel %vm1260_vm4, %v1254_v45, -inf }
 0x484   : > { %1262 = vmax.xlane.f32.xlu0 %v1261_v47  ;;  %v1257_v48 = vpop.f32.mrb[10].mxu1 }
 0x485   : > { %v3180_v49 = vpop.f32.mrb[11].mxu1 }
 0x48a   : > { %v1329_v50 = vpop.f32.mrb[12].mxu1 }
 0x48b   : > { %v3185_v51 = vpop.f32.mrb[13].mxu1  ;;  %v1335_v52 = vsel %vm1260_vm4, %v1329_v50, -inf }
 0x48c   : > { %1336 = vmax.xlane.f32.xlu1 %v1335_v52  ;;  %v1332_v53 = vpop.f32.mrb[14].mxu1 }
 0x48d   : > { %v3186_v54 = vpop.f32.mrb[15].mxu1 }
 0x49a   : > { %1453 = vrot.lane.b32.xlu0 %v3834_v37, %s3536_s29 }
 0x511   : > { %v1263_v55 = vpop.xlane.xlu0 %1262 }
 0x512   : > { %v1264_v56 = vsub.f32 %v1254_v45, %v1263_v55 }
 0x514   : > { %v1265_v57 = vmul.f32 1.442695, %v1264_v56 }
 0x515   : > { %v1454_v23 = vpop.permute.xlu0 %1453 }
 0x516   : > { %3479 = vpow2.f32 %v1265_v57  ;;  %v1459_v26 = vsel %vm1213_vm3, %v1454_v23, 0 }
 0x519   : > { %v1337_v58 = vpop.xlane.xlu1 %1336 }
 0x51a   : > { %v1338_v59 = vsub.f32 %v1329_v50, %v1337_v58 }
 0x51c   : > { %v1339_v60 = vmul.f32 1.442695, %v1338_v59 }
 0x51e   : > { %3481 = vpow2.f32 %v1339_v60 }
 0x520   : > { %v3480_v61 = vpop.eup %3479 }
 0x521   : > { %v1267_v62 = vsel %vm1260_vm4, %v3480_v61, 0.0 }
 0x522   : > { %1268 = vadd.xlane.f32.xlu1 %v1267_v62  ;;  %v3451_v62 = vld [vmem:[%s4208_s5] sm:$0xff]  }
 0x523   : > { %3224 = vmatpush3.bf16.msra.mxu0 %v3451_v62 }
 0x524   : > { %3225 = vmatprep.subr.bf16.mxu0 %v3531_v19 }
 0x528   : > { %v3482_v63 = vpop.eup %3481 }
 0x529   : > { %v1341_v0 = vsel %vm1260_vm4, %v3482_v63, 0.0 }
 0x52a   : > { %1342 = vadd.xlane.f32.xlu1 %v1341_v0 }
 0x53b   : > { %1278 = vrot.lane.b32.xlu1 %v1200_v33, %s4221_s22 }
 0x53f   : > { %1451 = vrot.lane.b32.xlu1 %v3836_v39, %s4223_s0  ;;  %s4235_s0 = smov 104  }
 0x5af   : > { %v1269_v3 = vpop.xlane.xlu1 %1268 }
 0x5b7   : > { %v1343_v4 = vpop.xlane.xlu1 %1342 }
 0x5b8   : > { %3483 = vrcp.f32 %v1343_v4  ;;  %v3452_v4 = vld [vmem:[%s4208_s5 + $0x8] sm:$0xff]  }
 0x5b9   : > { %3485 = vrcp.f32 %v1269_v3  ;;  %3226 = vmatpush3.bf16.msra.mxu0 %v3452_v4 }
 0x5ba   : > { %3231 = vmatprep.subr.bf16.mxu0 %v3531_v19 }
 0x5bb   : > { %v3872_v8 = vpop.permute.xlu1 %1278 }
 0x5bc   : > { %v1351_v9 = vsel %vm3868_vm8, %v3872_v8, 0.0  ;;  %v1281_v13 = vsel %vm1273_vm10, %v3872_v8, 0.0  ;;  %v1517_v27 = vsel %vm3892_vm14, %v3872_v8, 0.0  ;;  %v1633_v48 = vsel %vm3917_vm6, %v3872_v8, 0.0 }
 0x5bd   : > { %v1353_v12 = vpack.c.bf16 %v1351_v9, %v1351_v9  ;;  %v1283_v16 = vpack.c.bf16 %v1281_v13, %v1281_v13  ;;  %v1519_v28 = vpack.c.bf16 %v1517_v27, %v1517_v27  ;;  %v1635_v49 = vpack.c.bf16 %v1633_v48, %v1633_v48  ;;  %v2941_v13 = vld [vmem:[%s4209_s6] ss:$0 sm:$0xff]  ;;  %v3462_v48 = vld [vmem:[%s4214_s11 + $0x38] sm:$0xff]  }
 0x5bf   : > { %v1363_v14 = vand.u32 %v3878_v10, %v1353_v12  ;;  %v1409_v20 = vand.u32 %v3878_v10, %v1283_v16  ;;  %v1452_v29 = vpop.permute.xlu1 %1451  ;;  %v1524_v30 = vand.u32 %v1519_v28, %v3878_v10  ;;  %v1640_v51 = vand.u32 %v1635_v49, %v3878_v10  ;;  %v3453_v28 = vld [vmem:[%s4212_s9] sm:$0xff]  }
 0x5c1   : > { %3188 = vmatpush3.bf16.msra.mxu1 %v1363_v14 }
 0x5c2   : > { %v3484_v15 = vpop.eup %3483  ;;  %3193 = vmatprep.subr.bf16.mxu1 %v3531_v19 }
 0x5c3   : > { %v1345_v17 = vmul.f32 %v3484_v15, %v3482_v63  ;;  %v3486_v21 = vpop.eup %3485 }
 0x5c4   : > { %v1271_v22 = vmul.f32 %v3486_v21, %v3480_v61 }
 0x5c5   : > { %v1352_v18 = vpack.c.bf16 %v1345_v17, %v1345_v17 }
 0x5c6   : > { %v1282_v25 = vpack.c.bf16 %v1271_v22, %v1271_v22 }
 0x5c7   : > { %3190 = vmatmul.mubr.msk.bf16.vlgmr.msra.gmra.mrb[16].mxu1 %vm1354_vm11, %v1352_v18 }
 0x5c8   : > { %3194 = vmatpush3.bf16.msra.mxu1 %v1409_v20  ;;  %3195 = vmatprep.mubr.msk.bf16.mxu1 %vm3532_vm1, %v3531_v19 }
 0x5c9   : > { %3199 = vmatprep.subr.bf16.mxu1 %v3531_v19 }
 0x5d3   : > { %3196 = vmatmul.mubr.msk.bf16.vlgmr.msra.gmra.mrb[16].mxu1 %vm1354_vm11, %v1282_v25 }
 0x5d4   : > { %3200 = vmatpush3.bf16.xpose.msra.mxu1 %v1459_v26  ;;  %3201 = vmatprep.mubr.msk.bf16.mxu1 %vm3532_vm1, %v3531_v19 }
 0x5d5   : > { %3205 = vmatprep.subr.bf16.mxu1 %v3531_v19 }
 0x5db   : > { %3202 = vmatmul.mubr.msk.bf16.vlgmr.msra.gmra.mrb[20].mxu1 %vm1213_vm3, %v1452_v29  ;;  %v3455_v29 = vld [vmem:[%s4214_s11] sm:$0xff]  }
 0x5dc   : > { %3206 = vmatpush3.bf16.msra.mxu1 %v1524_v30  ;;  %3207 = vmatprep.mubr.msk.bf16.mxu1 %vm3532_vm1, %v3531_v19 }
 0x5dd   : > { %3211 = vmatprep.subr.bf16.mxu1 %v3531_v19 }
 0x6ae   : > { %v1495_v31 = vpop.f32.mrb[20].mxu1 }
 0x6af   : > { %v3203_v32 = vpop.f32.mrb[21].mxu1  ;;  %v1501_v33 = vsel %vm1260_vm4, %v1495_v31, -inf }
 0x6b0   : > { %1502 = vmax.xlane.f32.xlu1 %v1501_v33  ;;  %v1498_v34 = vpop.f32.mrb[22].mxu1 }
 0x6b1   : > { %v3204_v35 = vpop.f32.mrb[23].mxu1  ;;  %v2945_v34 = vld [vmem:[%s4216_s13] ss:$0 sm:$0xff] }
 0x6c1   : > { %1569 = vrot.lane.b32.xlu1 %v3834_v37, %s3540_s30 }
 0x73d   : > { %v1503_v36 = vpop.xlane.xlu1 %1502 }
 0x73e   : > { %v1504_v38 = vsub.f32 %v1495_v31, %v1503_v36  ;;  %v2946_v36 = vld [vmem:[%s4217_s14] ss:$0 sm:$0xff] }
 0x740   : > { %v1505_v40 = vmul.f32 1.442695, %v1504_v38 }
 0x741   : > { %v1570_v46 = vpop.permute.xlu1 %1569 }
 0x742   : > { %3487 = vpow2.f32 %v1505_v40 }
 0x74c   : > { %v3488_v41 = vpop.eup %3487 }
 0x74d   : > { %v1507_v42 = vsel %vm1260_vm4, %v3488_v41, 0.0 }
 0x74e   : > { %1508 = vadd.xlane.f32.xlu0 %v1507_v42  ;;  %v3456_v42 = vld [vmem:[%s4214_s11 + $0x8] sm:$0xff]  }
 0x764   : > { %1567 = vrot.lane.b32.xlu0 %v3836_v39, %s4222_s18  ;;  %v1575_v39 = vsel %vm1213_vm3, %v1570_v46, 0  ;;  %v3460_v46 = vld [vmem:[%s4214_s11 + $0x28] sm:$0xff]  }
 0x7db   : > { %v1509_v43 = vpop.xlane.xlu0 %1508 }
 0x7dc   : > { %3489 = vrcp.f32 %v1509_v43  ;;  %v3457_v43 = vld [vmem:[%s4214_s11 + $0x10] sm:$0xff]  }
 0x7df   : > { %v1568_v50 = vpop.permute.xlu0 %1567 }
 0x7e6   : > { %v3490_v44 = vpop.eup %3489 }
 0x7e7   : > { %v1511_v37 = vmul.f32 %v3490_v44, %v3488_v41  ;;  %v3458_v44 = vld [vmem:[%s4214_s11 + $0x18] sm:$0xff]  }
 0x7e9   : > { %v1518_v47 = vpack.c.bf16 %v1511_v37, %v1511_v37  ;;  %v3459_v37 = vld [vmem:[%s4214_s11 + $0x20] sm:$0xff]  }
 0x7eb   : > { %3208 = vmatmul.mubr.msk.bf16.vlgmr.msra.gmra.mrb[16].mxu1 %vm1354_vm11, %v1518_v47  ;;  %v3461_v47 = vld [vmem:[%s4214_s11 + $0x30] sm:$0xff]  }
 0x7ec   : > { %3212 = vmatpush3.bf16.xpose.msra.mxu1 %v1575_v39  ;;  %3213 = vmatprep.mubr.msk.bf16.mxu1 %vm3532_vm1, %v3531_v19  ;;  %v2947_v39 = vld [vmem:[%s4213_s10] ss:$0 sm:$0xff] }
 0x7ed   : > { %3217 = vmatprep.subr.bf16.mxu1 %v3531_v19 }
 0x7f3   : > { %3214 = vmatmul.mubr.msk.bf16.vlgmr.msra.gmra.mrb[24].mxu1 %vm1213_vm3, %v1568_v50 }
 0x7f4   : > { %3218 = vmatpush3.bf16.msra.mxu1 %v1640_v51  ;;  %3219 = vmatprep.mubr.msk.bf16.mxu1 %vm3532_vm1, %v3531_v19 }
 0x7f5   : > { %3239 = vmatprep.subr.bf16.mxu1 %v3531_v19 }
 0x8c6   : > { %v1611_v52 = vpop.f32.mrb[24].mxu1 }
 0x8c7   : > { %v3215_v53 = vpop.f32.mrb[25].mxu1  ;;  %v1617_v54 = vsel %vm1260_vm4, %v1611_v52, -inf }
 0x8c8   : > { %1618 = vmax.xlane.f32.xlu1 %v1617_v54  ;;  %v1614_v55 = vpop.f32.mrb[26].mxu1 }
 0x8c9   : > { %v3216_v56 = vpop.f32.mrb[27].mxu1 }
 0x955   : > { %v1619_v57 = vpop.xlane.xlu1 %1618 }
 0x956   : > { %v1620_v58 = vsub.f32 %v1611_v52, %v1619_v57 }
 0x958   : > { %v1621_v59 = vmul.f32 1.442695, %v1620_v58 }
 0x95a   : > { %3491 = vpow2.f32 %v1621_v59 }
 0x964   : > { %v3492_v60 = vpop.eup %3491 }
 0x965   : > { %v1623_v61 = vsel %vm1260_vm4, %v3492_v60, 0.0 }
 0x966   : > { %1624 = vadd.xlane.f32.xlu0 %v1623_v61 }
 0x9f3   : > { %v1625_v63 = vpop.xlane.xlu0 %1624 }
 0x9f4   : > { %3493 = vrcp.f32 %v1625_v63 }
 0x9fe   : > { %v3494_v0 = vpop.eup %3493 }
 0x9ff   : > { %v1627_v1 = vmul.f32 %v3494_v0, %v3492_v60  ;;  %v2951_v0 = vld [vmem:[%s4215_s12] ss:$0 sm:$0xff] }
 0xa01   : > { %v1634_v3 = vpack.c.bf16 %v1627_v1, %v1627_v1 }
 0xa03   : > { %3220 = vmatmul.mubr.msk.bf16.vlgmr.msra.gmra.mrb[16].mxu1 %vm1354_vm11, %v1634_v3 }
 0xa04   : > { %3255 = vmatprep.mubr.msk.bf16.mxu1 %vm3532_vm1, %v3531_v19  ;;  %3240 = vmatpush3.bf16.msra.mxu1 %v3455_v29 }
 0xa05   : > { %3241 = vmatprep.subr.bf16.mxu1 %v3531_v19 }
 0xa08   : > { %3242 = vmatpush3.bf16.msra.mxu1 %v3456_v42 }
 0xa09   : > { %3243 = vmatprep.subr.bf16.mxu1 %v3531_v19 }
 0xa0c   : > { %3244 = vmatpush3.bf16.msra.mxu1 %v3457_v43 }
 0xa0d   : > { %3245 = vmatprep.subr.bf16.mxu1 %v3531_v19 }
 0xa10   : > { %3246 = vmatpush3.bf16.msra.mxu1 %v3458_v44 }
 0xa11   : > { %3247 = vmatprep.subr.bf16.mxu1 %v3531_v19 }
 0xa14   : > { %3248 = vmatpush3.bf16.msra.mxu1 %v3459_v37 }
 0xa15   : > { %3249 = vmatprep.subr.bf16.mxu1 %v3531_v19 }
 0xa18   : > { %3250 = vmatpush3.bf16.msra.mxu1 %v3460_v46 }
 0xa19   : > { %3251 = vmatprep.subr.bf16.mxu1 %v3531_v19 }
 0xa1c   : > { %3252 = vmatpush3.bf16.msra.mxu1 %v3461_v47 }
 0xa1d   : > { %3253 = vmatprep.subr.bf16.mxu1 %v3531_v19 }
 0xa20   : > { %3254 = vmatpush3.bf16.msra.mxu1 %v3462_v48 }
 0xa21   : > { %3291 = vmatprep.subr.bf16.mxu1 %v3531_v19 }
 0xad6   : > { %v1676_v6 = vpop.f32.mrb[16].mxu1 }
 0xad7   : > { %v1683_v7 = vpack.c.bf16 %v1676_v6, %v1676_v6  ;;  %v3221_v8 = vpop.f32.mrb[17].mxu1 }
 0xad8   : > { %v1679_v9 = vpop.f32.mrb[18].mxu1 }
 0xad9   : > { %v3222_v12 = vpop.f32.mrb[19].mxu1  ;;  %3228 = vmatmul.mubr.msk.bf16.vlgmr.msra.gmra.mrb[8].mxu0 %vm1161_vm2, %v1683_v7 }
 0xada   : > { %3235 = vmatprep.mubr.msk.bf16.mxu0 %vm3532_vm1, %v3531_v19  ;;  %3232 = vmatpush3.bf16.msra.mxu0 %v3453_v28 }
 0xadb   : > { %3233 = vmatprep.subr.bf16.mxu0 %v3531_v19 }
 0xbac   : > { %v1739_v14 = vpop.f32.mrb[8].mxu0 }
 0xbad   : > { %v1740_v15 = vadd.f32 %v2941_v13, %v1739_v14  ;;  %v3229_v16 = vpop.f32.mrb[9].mxu0 }
 0xbae   : > { %v1742_v17 = vpop.f32.mrb[10].mxu0 }
 0xbaf   : > { %v3954_v18 = vadd.f32 %v1740_v15, %v3802_v11  ;;  %v3230_v20 = vpop.f32.mrb[11].mxu0  ;;  %v3454_v11 = vld [vmem:[%s4212_s9 + $0x8] sm:$0xff]   ;;  %v3463_v17 = vld [vmem:[%s4206_s3 + $0x10] sm:$0xff]  }
 0xbb0   : > { %3234 = vmatpush3.bf16.msra.mxu0 %v3454_v11 }
 0xbb1   : > { %v1746_v21 = vsel %vm1113_vm0, %v3954_v18, 0.0  ;;  %3259 = vmatprep.subr.bf16.mxu0 %v3531_v19 }
 0xbb2   : > { %1747 = vadd.xlane.f32.xlu1 %v1746_v21 }
 0xc3f   : > { %v1748_v22 = vpop.xlane.xlu1 %1747 }
 0xc40   : > { %v1749_v23 = vmul.f32 0.03125, %v1748_v22 }
 0xc42   : > { %v1750_v25 = vsub.f32 %v3954_v18, %v1749_v23 }
 0xc44   : > { %v1751_v26 = vmul.f32 %v1750_v25, %v1750_v25 }
 0xc46   : > { %v1752_v27 = vsel %vm1113_vm0, %v1751_v26, 0.0 }
 0xc47   : > { %1753 = vadd.xlane.f32.xlu1 %v1752_v27  ;;  %v2997_v27 = vld [vmem:[%s4211_s8 + $0x1] ss:$0 sm:$0xff] }
 0xcd4   : > { %v1754_v30 = vpop.xlane.xlu1 %1753 }
 0xcd5   : > { %v1755_v31 = vmul.f32 0.03125, %v1754_v30  ;;  %v2998_v30 = vld [vmem:[%s4207_s4 + $0x1] ss:$0 sm:$0xff] }
 0xcd7   : > { %v1756_v32 = vadd.f32 1e-12, %v1755_v31 }
 0xcd9   : > { %3495 = vrsqrt.f32 %v1756_v32 }
 0xce3   : > { %v3496_v33 = vpop.eup %3495 }
 0xce4   : > { %v1758_v35 = vmul.f32 %v3496_v33, %v1750_v25  ;;  %v2996_v25 = vld [vmem:[%s4210_s7 + $0x1] ss:$0 sm:$0xff] }
 0xce6   : > { %v1765_v38 = vmul.f32 %v2945_v34, %v1758_v35 }
 0xce8   : > { %v1772_v40 = vadd.f32 %v2946_v36, %v1765_v38 }
 0xcea   : > { %v1773_v41 = vpack.c.bf16 %v1772_v40, %v1772_v40 }
 0xcec   : > { %3236 = vmatmul.mubr.msk.bf16.vlgmr.msra.gmra.mrb[12].mxu0 %vm1161_vm2, %v1773_v41 }
 0xced   : > { %3263 = vmatprep.mubr.msk.bf16.mxu0 %vm3532_vm1, %v3531_v19  ;;  %3260 = vmatpush3.bf16.msra.mxu0 %v3463_v17 }
 0xcee   : > { %3261 = vmatprep.subr.bf16.mxu0 %v3531_v19 }
 0xdbf   : > { %v1829_v49 = vpop.f32.mrb[12].mxu0 }
 0xdc0   : > { %v1830_v50 = vadd.f32 %v2947_v39, %v1829_v49  ;;  %v3237_v51 = vpop.f32.mrb[13].mxu0 }
 0xdc1   : > { %v1832_v52 = vpop.f32.mrb[14].mxu0 }
 0xdc2   : > { %v1836_v53 = vmul.f32 0.044715, %v1830_v50  ;;  %v3238_v54 = vpop.f32.mrb[15].mxu0  ;;  %v1835_v60 = vmul.f32 0.5, %v1830_v50 }
 0xdc4   : > { %v1837_v55 = vmul.f32 %v1836_v53, %v1830_v50 }
 0xdc6   : > { %v1838_v56 = vmul.f32 %v1837_v55, %v1830_v50 }
 0xdc8   : > { %v1839_v57 = vadd.f32 %v1838_v56, %v1830_v50 }
 0xdca   : > { %v1840_v58 = vmul.f32 0.7978846, %v1839_v57 }
 0xdcc   : > { %3497 = vtanh.f32 %v1840_v58 }
 0xdd6   : > { %v3498_v59 = vpop.eup %3497 }
 0xdd7   : > { %v1842_v61 = vadd.f32 1.0, %v3498_v59 }
 0xdd9   : > { %v1843_v62 = vmul.f32 %v1842_v61, %v1835_v60 }
 0xddb   : > { %v1844_v63 = vpack.c.bf16 %v1843_v62, %v1843_v62 }
 0xddd   : > { %3256 = vmatmul.mubr.bf16.vlgmr.msra.gmra.mrb[28].mxu1 %v1844_v63 }
 0xdde   : > { %3293 = vmatprep.mubr.msk.bf16.mxu1 %vm3532_vm1, %v3531_v19 }
 0xeb0   : > { %v1933_v1 = vpop.f32.mrb[28].mxu1 }
 0xeb1   : > { %v1934_v3 = vadd.f32 %v2951_v0, %v1933_v1  ;;  %v3257_v4 = vpop.f32.mrb[29].mxu1 }
 0xeb2   : > { %v1936_v6 = vpop.f32.mrb[30].mxu1 }
 0xeb3   : > { %v4018_v7 = vadd.f32 %v1934_v3, %v3954_v18  ;;  %v3258_v8 = vpop.f32.mrb[31].mxu1  ;;  %v3464_v18 = vld [vmem:[%s4206_s3 + $0x18] sm:$0xff]  }
 0xeb4   : > { %3262 = vmatpush3.bf16.msra.mxu0 %v3464_v18 }
 0xeb5   : > { %v1988_v9 = vsel %vm1113_vm0, %v4018_v7, 0.0  ;;  %3267 = vmatprep.subr.bf16.mxu0 %v3531_v19 }
 0xeb6   : > { %1989 = vadd.xlane.f32.xlu0 %v1988_v9 }
 0xf43   : > { %v1990_v12 = vpop.xlane.xlu0 %1989 }
 0xf44   : > { %v1991_v13 = vmul.f32 0.03125, %v1990_v12 }
 0xf46   : > { %v1992_v14 = vsub.f32 %v4018_v7, %v1991_v13 }
 0xf48   : > { %v1993_v15 = vmul.f32 %v1992_v14, %v1992_v14 }
 0xf4a   : > { %v1994_v16 = vsel %vm1113_vm0, %v1993_v15, 0.0 }
 0xf4b   : > { %1995 = vadd.xlane.f32.xlu1 %v1994_v16 }
 0xfd8   : > { %v1996_v20 = vpop.xlane.xlu1 %1995 }
 0xfd9   : > { %v1997_v21 = vmul.f32 0.03125, %v1996_v20 }
 0xfdb   : > { %v1998_v22 = vadd.f32 1e-12, %v1997_v21 }
 0xfdd   : > { %3499 = vrsqrt.f32 %v1998_v22 }
 0xfe7   : > { %v3500_v23 = vpop.eup %3499 }
 0xfe8   : > { %v2000_v26 = vmul.f32 %v3500_v23, %v1992_v14 }
 0xfea   : > { %v2007_v28 = vmul.f32 %v2996_v25, %v2000_v26 }
 0xfec   : > { %v2014_v11 = vadd.f32 %v2997_v27, %v2007_v28 }
 0xfee   : > { %v2015_v29 = vpack.c.bf16 %v2014_v11, %v2014_v11 }
 0xff0   : > { %3264 = vmatmul.mubr.msk.bf16.vlgmr.msra.gmra.mrb[16].mxu0 %vm1161_vm2, %v2015_v29 }
 0xff1   : > { %3269 = vmatprep.mubr.msk.bf16.mxu0 %vm3532_vm1, %v3531_v19 }
0x10c3   : > { %v2071_v31 = vpop.f32.mrb[16].mxu0 }
0x10c4   : > { %v4044_v32 = vadd.f32 %v2998_v30, %v2071_v31  ;;  %v3265_v33 = vpop.f32.mrb[17].mxu0 }
0x10c5   : > { %v2074_v34 = vpop.f32.mrb[18].mxu0 }
0x10c6   : > { %v2077_v35 = vmul.f32 0.35355338, %v4044_v32  ;;  %v2079_v36 = vpack.c.bf16 %v4044_v32, %v4044_v32  ;;  %v3266_v38 = vpop.f32.mrb[19].mxu0  ;;  %v3465_v34 = vld [vmem:[%s4208_s5 + $0x10] sm:$0xff]  }
0x10c8   : > { %2150 = vrot.lane.b32.xlu1 %v2079_v36, %s3535_s28  ;;  %2081 = vrot.lane.b32.xlu0 %v2079_v36, %s3533_s26  ;;  %v2078_v40 = vpack.c.bf16 %v2077_v35, %v2077_v35  ;;  %s4236_s26 = smov 64  }
0x10cc   : > { %2306 = vrot.lane.b32.xlu0 %v2079_v36, %s3536_s29  ;;  %2148 = vrot.lane.b32.xlu1 %v2078_v40, %s3534_s27 }
0x10d0   : > { %2417 = vrot.lane.b32.xlu0 %v2079_v36, %s3540_s30  ;;  %2304 = vrot.lane.b32.xlu1 %v2078_v40, %s4234_s21  ;;  %s2872_s21 = sshll.u32 %s4238_s25, 3 }
0x10d1   : > { %s546_s29 = scalar_lea.vmem %s4220_s17, %s2872_s21 }
0x10d4   : > { %2415 = vrot.lane.b32.xlu1 %v2078_v40, %s4235_s0 }
0x113a   : > { %v2151_v41 = vpop.permute.xlu1 %2150  ;;  %v2082_v42 = vpop.permute.xlu0 %2081 }
0x113b   : > { %v2087_v43 = vsel %vm1213_vm3, %v2082_v42, 0  ;;  %v2156_v47 = vsel %vm1213_vm3, %v2151_v41, 0 }
0x113c   : > { %3268 = vmatpush3.bf16.xpose.msra.mxu0 %v2087_v43 }
0x113d   : > { %3273 = vmatprep.subr.bf16.mxu0 %v3531_v19 }
0x113e   : > { %v2307_v44 = vpop.permute.xlu0 %2306  ;;  %v2149_v46 = vpop.permute.xlu1 %2148 }
0x113f   : > { %v2312_v37 = vsel %vm1213_vm3, %v2307_v44, 0 }
0x1140   : > { %3292 = vmatpush3.bf16.xpose.msra.mxu1 %v2312_v37 }
0x1141   : > { %3303 = vmatprep.subr.bf16.mxu1 %v3531_v19 }
0x1142   : > { %v2418_v48 = vpop.permute.xlu0 %2417  ;;  %v2305_v39 = vpop.permute.xlu1 %2304 }
0x1143   : > { %3270 = vmatmul.mubr.msk.bf16.vlgmr.msra.gmra.mrb[20].mxu0 %vm1213_vm3, %v2078_v40  ;;  %v2423_v49 = vsel %vm1213_vm3, %v2418_v48, 0 }
0x1144   : > { %3274 = vmatpush3.bf16.xpose.msra.mxu0 %v2156_v47  ;;  %3275 = vmatprep.mubr.msk.bf16.mxu0 %vm3532_vm1, %v3531_v19 }
0x1145   : > { %3279 = vmatprep.subr.bf16.mxu0 %v3531_v19 }
0x1146   : > { %v2416_v50 = vpop.permute.xlu1 %2415 }
0x1147   : > { %3294 = vmatmul.mubr.msk.bf16.vlgmr.msra.gmra.mrb[32].mxu1 %vm1213_vm3, %v2305_v39 }
0x1148   : > { %3304 = vmatpush3.bf16.xpose.msra.mxu1 %v2423_v49  ;;  %3305 = vmatprep.mubr.msk.bf16.mxu1 %vm3532_vm1, %v3531_v19 }
0x1149   : > { %3315 = vmatprep.subr.bf16.mxu1 %v3531_v19 }
0x114b   : > { %3276 = vmatmul.mubr.msk.bf16.vlgmr.msra.gmra.mrb[24].mxu0 %vm1213_vm3, %v2149_v46 }
0x114c   : > { %3281 = vmatprep.mubr.msk.bf16.mxu0 %vm3532_vm1, %v3531_v19 }
0x114f   : > { %3306 = vmatmul.mubr.msk.bf16.vlgmr.msra.gmra.mrb[36].mxu1 %vm1213_vm3, %v2416_v50 }
0x1150   : > { %3319 = vmatprep.mubr.msk.bf16.mxu1 %vm3532_vm1, %v3531_v19  ;;  %3316 = vmatpush3.bf16.msra.mxu1 %v3465_v34  ;;  %v3471_v34 = vld [vmem:[%s4214_s11 + $0x50] sm:$0xff]  }
0x1151   : > { %3317 = vmatprep.subr.bf16.mxu1 %v3531_v19 }
0x1216   : > { %v2123_v51 = vpop.f32.mrb[20].mxu0 }
0x1217   : > { %v3271_v52 = vpop.f32.mrb[21].mxu0  ;;  %v2129_v53 = vsel %vm1260_vm4, %v2123_v51, -inf }
0x1218   : > { %2130 = vmax.xlane.f32.xlu1 %v2129_v53  ;;  %v2126_v54 = vpop.f32.mrb[22].mxu0 }
0x1219   : > { %v3272_v55 = vpop.f32.mrb[23].mxu0 }
0x121a   : > { %v2348_v56 = vpop.f32.mrb[32].mxu1 }
0x121b   : > { %v3295_v57 = vpop.f32.mrb[33].mxu1  ;;  %v2354_v4 = vsel %vm1260_vm4, %v2348_v56, -inf }
0x121c   : > { %v2351_v58 = vpop.f32.mrb[34].mxu1 }
0x121d   : > { %v3296_v59 = vpop.f32.mrb[35].mxu1 }
0x121e   : > { %v2192_v60 = vpop.f32.mrb[24].mxu0 }
0x121f   : > { %v3277_v61 = vpop.f32.mrb[25].mxu0  ;;  %v2198_v62 = vsel %vm1260_vm4, %v2192_v60, -inf }
0x1220   : > { %2199 = vmax.xlane.f32.xlu0 %v2198_v62  ;;  %v2195_v63 = vpop.f32.mrb[26].mxu0 }
0x1221   : > { %v3278_v0 = vpop.f32.mrb[27].mxu0 }
0x1222   : > { %v2459_v1 = vpop.f32.mrb[36].mxu1 }
0x1223   : > { %v3307_v3 = vpop.f32.mrb[37].mxu1  ;;  %v2465_v9 = vsel %vm1260_vm4, %v2459_v1, -inf }
0x1224   : > { %2355 = vmax.xlane.f32.xlu0 %v2354_v4  ;;  %v2462_v6 = vpop.f32.mrb[38].mxu1 }
0x1225   : > { %v3308_v8 = vpop.f32.mrb[39].mxu1 }
0x1228   : > { %2466 = vmax.xlane.f32.xlu0 %v2465_v9 }
0x12a5   : > { %v2131_v12 = vpop.xlane.xlu1 %2130 }
0x12a6   : > { %v2132_v13 = vsub.f32 %v2123_v51, %v2131_v12 }
0x12a8   : > { %v2133_v14 = vmul.f32 1.442695, %v2132_v13 }
0x12aa   : > { %3501 = vpow2.f32 %v2133_v14 }
0x12ad   : > { %v2200_v15 = vpop.xlane.xlu0 %2199 }
0x12ae   : > { %v2201_v16 = vsub.f32 %v2192_v60, %v2200_v15 }
0x12b0   : > { %v2202_v17 = vmul.f32 1.442695, %v2201_v16 }
0x12b1   : > { %v2356_v18 = vpop.xlane.xlu0 %2355 }
0x12b2   : > { %3503 = vpow2.f32 %v2202_v17  ;;  %v2357_v20 = vsub.f32 %v2348_v56, %v2356_v18 }
0x12b4   : > { %v3502_v21 = vpop.eup %3501  ;;  %v2358_v22 = vmul.f32 1.442695, %v2357_v20  ;;  %v3467_v20 = vld [vmem:[%s4212_s9 + $0x10] sm:$0xff]  }
0x12b5   : > { %v2467_v23 = vpop.xlane.xlu0 %2466  ;;  %v2135_v25 = vsel %vm1260_vm4, %v3502_v21, 0.0 }
0x12b6   : > { %3505 = vpow2.f32 %v2358_v22  ;;  %v2468_v26 = vsub.f32 %v2459_v1, %v2467_v23  ;;  %2136 = vadd.xlane.f32.xlu0 %v2135_v25  ;;  %v3010_v1 = vld [vmem:[%s4209_s6 + $0x1] ss:$0 sm:$0xff] }
0x12b8   : > { %v2469_v27 = vmul.f32 1.442695, %v2468_v26 }
0x12ba   : > { %3507 = vpow2.f32 %v2469_v27  ;;  %v3014_v27 = vld [vmem:[%s4216_s13 + $0x1] ss:$0 sm:$0xff] }
0x12bc   : > { %v3504_v28 = vpop.eup %3503 }
0x12bd   : > { %v2204_v11 = vsel %vm1260_vm4, %v3504_v28, 0.0 }
0x12be   : > { %2205 = vadd.xlane.f32.xlu1 %v2204_v11  ;;  %v3015_v11 = vld [vmem:[%s4217_s14 + $0x1] ss:$0 sm:$0xff] }
0x12c0   : > { %v3506_v29 = vpop.eup %3505 }
0x12c1   : > { %v2360_v30 = vsel %vm1260_vm4, %v3506_v29, 0.0 }
0x12c2   : > { %2361 = vadd.xlane.f32.xlu0 %v2360_v30 }
0x12c4   : > { %v3508_v31 = vpop.eup %3507 }
0x12c5   : > { %v2471_v33 = vsel %vm1260_vm4, %v3508_v31, 0.0 }
0x12c6   : > { %2472 = vadd.xlane.f32.xlu0 %v2471_v33  ;;  %v3470_v33 = vld [vmem:[%s4214_s11 + $0x48] sm:$0xff]  }
0x12cf   : > { %2141 = vrot.lane.b32.xlu1 %v4044_v32, %s4236_s26 }
0x1343   : > { %v2137_v40 = vpop.xlane.xlu0 %2136 }
0x134b   : > { %v2206_v35 = vpop.xlane.xlu1 %2205 }
0x134c   : > { %3509 = vrcp.f32 %v2206_v35  ;;  %v3472_v35 = vld [vmem:[%s4214_s11 + $0x58] sm:$0xff]  }
0x134d   : > { %3511 = vrcp.f32 %v2137_v40  ;;  %v3475_v40 = vld [vmem:[%s4214_s11 + $0x70] sm:$0xff]  }
0x134f   : > { %v2142_v36 = vpop.permute.xlu1 %2141  ;;  %v2362_v2 = vpop.xlane.xlu0 %2361 }
0x1350   : > { %v2209_v38 = vsel %vm3868_vm8, %v2142_v36, 0.0  ;;  %v2144_v42 = vsel %vm1273_vm10, %v2142_v36, 0.0  ;;  %v2365_v48 = vsel %vm3892_vm14, %v2142_v36, 0.0  ;;  %3513 = vrcp.f32 %v2362_v2 }
0x1351   : > { %v2211_v41 = vpack.c.bf16 %v2209_v38, %v2209_v38  ;;  %v2146_v44 = vpack.c.bf16 %v2144_v42, %v2144_v42  ;;  %v2367_v49 = vpack.c.bf16 %v2365_v48, %v2365_v48  ;;  %v2476_v24 = vsel %vm3917_vm6, %v2142_v36, 0.0  ;;  %v3473_v36 = vld [vmem:[%s4214_s11 + $0x60] sm:$0xff]   ;;  %v3474_v38 = vld [vmem:[%s4214_s11 + $0x68] sm:$0xff]  }
0x1352   : > { %v2478_v55 = vpack.c.bf16 %v2476_v24, %v2476_v24  ;;  %v3016_v42 = vld [vmem:[%s4213_s10 + $0x1] ss:$0 sm:$0xff] }
0x1353   : > { %v2216_v32 = vand.u32 %v2211_v41, %v3878_v10  ;;  %v2262_v47 = vand.u32 %v2146_v44, %v3878_v10  ;;  %v2372_v51 = vand.u32 %v2367_v49, %v3878_v10  ;;  %v2473_v52 = vpop.xlane.xlu0 %2472  ;;  %v3476_v41 = vld [vmem:[%s4214_s11 + $0x78] sm:$0xff]  }
0x1354   : > { %3515 = vrcp.f32 %v2473_v52  ;;  %v2483_v57 = vand.u32 %v2478_v55, %v3878_v10  ;;  %v3466_v10 = vld [vmem:[%s4208_s5 + $0x18] sm:$0xff]  }
0x1355   : > { %3280 = vmatpush3.bf16.msra.mxu0 %v2216_v32  ;;  %3318 = vmatpush3.bf16.msra.mxu1 %v3466_v10 }
0x1356   : > { %v3510_v43 = vpop.eup %3509  ;;  %3285 = vmatprep.subr.bf16.mxu0 %v3531_v19  ;;  %3323 = vmatprep.subr.bf16.mxu1 %v3531_v19 }
0x1357   : > { %v2208_v37 = vmul.f32 %v3510_v43, %v3504_v28  ;;  %v3512_v5 = vpop.eup %3511 }
0x1358   : > { %v2139_v39 = vmul.f32 %v3512_v5, %v3502_v21  ;;  %v3469_v21 = vld [vmem:[%s4214_s11 + $0x40] sm:$0xff]  }
0x1359   : > { %v2210_v46 = vpack.c.bf16 %v2208_v37, %v2208_v37 }
0x135a   : > { %v2145_v50 = vpack.c.bf16 %v2139_v39, %v2139_v39  ;;  %v3514_v53 = vpop.eup %3513 }
0x135b   : > { %3282 = vmatmul.mubr.msk.bf16.vlgmr.msra.gmra.mrb[28].mxu0 %vm1354_vm11, %v2210_v46  ;;  %v2364_v54 = vmul.f32 %v3514_v53, %v3506_v29  ;;  %v3020_v53 = vld [vmem:[%s4215_s12 + $0x1] ss:$0 sm:$0xff] }
0x135c   : > { %3286 = vmatpush3.bf16.msra.mxu0 %v2262_v47  ;;  %3287 = vmatprep.mubr.msk.bf16.mxu0 %vm3532_vm1, %v3531_v19 }
0x135d   : > { %3297 = vmatprep.subr.bf16.mxu0 %v3531_v19  ;;  %v2366_v56 = vpack.c.bf16 %v2364_v54, %v2364_v54 }
0x135e   : > { %v3516_v58 = vpop.eup %3515 }
0x135f   : > { %v2475_v59 = vmul.f32 %v3516_v58, %v3508_v31 }
0x1361   : > { %v2477_v60 = vpack.c.bf16 %v2475_v59, %v2475_v59 }
0x1367   : > { %3288 = vmatmul.mubr.msk.bf16.vlgmr.msra.gmra.mrb[28].mxu0 %vm1354_vm11, %v2145_v50 }
0x1368   : > { %3298 = vmatpush3.bf16.msra.mxu0 %v2372_v51  ;;  %3299 = vmatprep.mubr.msk.bf16.mxu0 %vm3532_vm1, %v3531_v19 }
0x1369   : > { %3309 = vmatprep.subr.bf16.mxu0 %v3531_v19 }
0x1373   : > { %3300 = vmatmul.mubr.msk.bf16.vlgmr.msra.gmra.mrb[28].mxu0 %vm1354_vm11, %v2366_v56 }
0x1374   : > { %3310 = vmatpush3.bf16.msra.mxu0 %v2483_v57  ;;  %3311 = vmatprep.mubr.msk.bf16.mxu0 %vm3532_vm1, %v3531_v19 }
0x1375   : > { %3331 = vmatprep.subr.bf16.mxu0 %v3531_v19 }
0x137f   : > { %3312 = vmatmul.mubr.msk.bf16.vlgmr.msra.gmra.mrb[28].mxu0 %vm1354_vm11, %v2477_v60 }
0x1380   : > { %3347 = vmatprep.mubr.msk.bf16.mxu0 %vm3532_vm1, %v3531_v19  ;;  %3332 = vmatpush3.bf16.msra.mxu0 %v3469_v21 }
0x1381   : > { %3333 = vmatprep.subr.bf16.mxu0 %v3531_v19 }
0x1384   : > { %3334 = vmatpush3.bf16.msra.mxu0 %v3470_v33 }
0x1385   : > { %3335 = vmatprep.subr.bf16.mxu0 %v3531_v19 }
0x1388   : > { %3336 = vmatpush3.bf16.msra.mxu0 %v3471_v34 }
0x1389   : > { %3337 = vmatprep.subr.bf16.mxu0 %v3531_v19 }
0x138c   : > { %3338 = vmatpush3.bf16.msra.mxu0 %v3472_v35 }
0x138d   : > { %3339 = vmatprep.subr.bf16.mxu0 %v3531_v19 }
0x1390   : > { %3340 = vmatpush3.bf16.msra.mxu0 %v3473_v36 }
0x1391   : > { %3341 = vmatprep.subr.bf16.mxu0 %v3531_v19 }
0x1394   : > { %3342 = vmatpush3.bf16.msra.mxu0 %v3474_v38 }
0x1395   : > { %3343 = vmatprep.subr.bf16.mxu0 %v3531_v19 }
0x1398   : > { %3344 = vmatpush3.bf16.msra.mxu0 %v3475_v40 }
0x1399   : > { %3345 = vmatprep.subr.bf16.mxu0 %v3531_v19 }
0x139c   : > { %3346 = vmatpush3.bf16.msra.mxu0 %v3476_v41 }
0x1452   : > { %v2519_v45 = vpop.f32.mrb[28].mxu0 }
0x1453   : > { %v2526_v61 = vpack.c.bf16 %v2519_v45, %v2519_v45  ;;  %v3313_v62 = vpop.f32.mrb[29].mxu0 }
0x1454   : > { %v2522_v63 = vpop.f32.mrb[30].mxu0 }
0x1455   : > { %v3314_v0 = vpop.f32.mrb[31].mxu0  ;;  %3320 = vmatmul.mubr.msk.bf16.vlgmr.msra.gmra.mrb[40].mxu1 %vm1161_vm2, %v2526_v61 }
0x1456   : > { %3327 = vmatprep.mubr.msk.bf16.mxu1 %vm3532_vm1, %v3531_v19  ;;  %3324 = vmatpush3.bf16.msra.mxu1 %v3467_v20 }
0x1457   : > { %3325 = vmatprep.subr.bf16.mxu1 %v3531_v19 }
0x1528   : > { %v2582_v3 = vpop.f32.mrb[40].mxu1 }
0x1529   : > { %v2583_v4 = vadd.f32 %v3010_v1, %v2582_v3  ;;  %v3321_v6 = vpop.f32.mrb[41].mxu1 }
0x152a   : > { %v2585_v8 = vpop.f32.mrb[42].mxu1 }
0x152b   : > { %v4129_v9 = vadd.f32 %v2583_v4, %v4018_v7  ;;  %v3322_v12 = vpop.f32.mrb[43].mxu1  ;;  %v3468_v7 = vld [vmem:[%s4212_s9 + $0x18] sm:$0xff]   ;;  %v3029_v4 = vld [vmem:[%s4218_s15] ss:$0 sm:$0xff] }
0x152c   : > { %3326 = vmatpush3.bf16.msra.mxu1 %v3468_v7  ;;  %v3030_v8 = vld [vmem:[%s4219_s16] ss:$0 sm:$0xff] }
0x152d   : > { %v2589_v13 = vsel %vm1113_vm0, %v4129_v9, 0.0 }
0x152e   : > { %2590 = vadd.xlane.f32.xlu0 %v2589_v13 }
0x15bb   : > { %v2591_v14 = vpop.xlane.xlu0 %2590 }
0x15bc   : > { %v2592_v15 = vmul.f32 0.03125, %v2591_v14 }
0x15be   : > { %v2593_v16 = vsub.f32 %v4129_v9, %v2592_v15 }
0x15c0   : > { %v2594_v17 = vmul.f32 %v2593_v16, %v2593_v16 }
0x15c2   : > { %v2595_v18 = vsel %vm1113_vm0, %v2594_v17, 0.0 }
0x15c3   : > { %2596 = vadd.xlane.f32.xlu0 %v2595_v18 }
0x1650   : > { %v2597_v22 = vpop.xlane.xlu0 %2596 }
0x1651   : > { %v2598_v23 = vmul.f32 0.03125, %v2597_v22 }
0x1653   : > { %v2599_v25 = vadd.f32 1e-12, %v2598_v23 }
0x1655   : > { %3517 = vrsqrt.f32 %v2599_v25 }
0x165f   : > { %v3518_v26 = vpop.eup %3517 }
0x1660   : > { %v2601_v28 = vmul.f32 %v3518_v26, %v2593_v16 }
0x1662   : > { %v2608_v29 = vmul.f32 %v3014_v27, %v2601_v28 }
0x1664   : > { %v2615_v30 = vadd.f32 %v3015_v11, %v2608_v29 }
0x1666   : > { %v2616_v31 = vpack.c.bf16 %v2615_v30, %v2615_v30 }
0x1668   : > { %3328 = vmatmul.mubr.msk.bf16.vlgmr.msra.gmra.mrb[44].mxu1 %vm1161_vm2, %v2616_v31 }
0x173b   : > { %v2672_v32 = vpop.f32.mrb[44].mxu1 }
0x173c   : > { %v2673_v43 = vadd.f32 %v3016_v42, %v2672_v32  ;;  %v3329_v44 = vpop.f32.mrb[45].mxu1 }
0x173d   : > { %v2675_v37 = vpop.f32.mrb[46].mxu1 }
0x173e   : > { %v2679_v46 = vmul.f32 0.044715, %v2673_v43  ;;  %v3330_v47 = vpop.f32.mrb[47].mxu1  ;;  %v2678_v50 = vmul.f32 0.5, %v2673_v43 }
0x1740   : > { %v2680_v2 = vmul.f32 %v2679_v46, %v2673_v43 }
0x1742   : > { %v2681_v5 = vmul.f32 %v2680_v2, %v2673_v43 }
0x1744   : > { %v2682_v48 = vadd.f32 %v2681_v5, %v2673_v43 }
0x1746   : > { %v2683_v39 = vmul.f32 0.7978846, %v2682_v48 }
0x1748   : > { %3519 = vtanh.f32 %v2683_v39 }
0x1752   : > { %v3520_v49 = vpop.eup %3519 }
0x1753   : > { %v2685_v51 = vadd.f32 1.0, %v3520_v49 }
0x1755   : > { %v2686_v19 = vmul.f32 %v2685_v51, %v2678_v50 }
0x1757   : > { %v2687_v52 = vpack.c.bf16 %v2686_v19, %v2686_v19 }
0x1759   : > { %3348 = vmatmul.mubr.bf16.vlgmr.msra.gmra.mrb[32].mxu0 %v2687_v52 }
0x182c   : > { %v2776_v24 = vpop.f32.mrb[32].mxu0 }
0x182d   : > { %v2777_v54 = vadd.f32 %v3020_v53, %v2776_v24  ;;  %v3349_v55 = vpop.f32.mrb[33].mxu0 }
0x182e   : > { %v2779_v56 = vpop.f32.mrb[34].mxu0 }
0x182f   : > { %v3350_v57 = vpop.f32.mrb[35].mxu0  ;;  %v2782_v58 = vadd.f32 %v2777_v54, %v4129_v9 }
0x1831   : > { %v2785_v59 = vsel %vm1113_vm0, %v2782_v58, 0.0 }
0x1832   : > { %2786 = vadd.xlane.f32.xlu0 %v2785_v59 }
0x18bf   : > { %v2787_v60 = vpop.xlane.xlu0 %2786 }
0x18c0   : > { %v2788_v10 = vmul.f32 0.03125, %v2787_v60 }
0x18c2   : > { %v2789_v45 = vsub.f32 %v2782_v58, %v2788_v10 }
0x18c4   : > { %v2790_v61 = vmul.f32 %v2789_v45, %v2789_v45 }
0x18c6   : > { %v2791_v62 = vsel %vm1113_vm0, %v2790_v61, 0.0 }
0x18c7   : > { %2792 = vadd.xlane.f32.xlu1 %v2791_v62 }
0x1954   : > { %v2793_v63 = vpop.xlane.xlu1 %2792 }
0x1955   : > { %v2794_v0 = vmul.f32 0.03125, %v2793_v63 }
0x1957   : > { %v2795_v1 = vadd.f32 1e-12, %v2794_v0 }
0x1959   : > { %3521 = vrsqrt.f32 %v2795_v1 }
0x1963   : > { %v3522_v3 = vpop.eup %3521 }
0x1964   : > { %v2797_v6 = vmul.f32 %v3522_v3, %v2789_v45 }
0x1966   : > { %v2804_v9 = vmul.f32 %v3029_v4, %v2797_v6 }
0x1968   : > { %v2811_v12 = vadd.f32 %v3030_v8, %v2804_v9 }
0x196a   : > { %2812 = vst.msk [vmem:[%s546_s29] sm:$0x1f] %vm1113_vm0, %v2811_v12 }
0x196b PF: > { %s27_s24 = sadd.s32 1, %s3529_s24  }
0x196c   : > { %p24_p4 = scmp.ge.s32.totalorder %s27_s24, 4  }
0x196e   :  { %26 = sbr.rel (!%p24_p4) target bundleno = 3 (0x3), region = 130 }

// kernel: chartfc_forward.3
= control target key start
LH: loop header
LB: loop body
LE: loop exit
PB: predicated region body
PF: predicated region fallthrough
CT: control target
= control target key end

     0   :  { %s4538_s0 = inlined_call_operand.vmem [shape: f32[2,13,32], index: 0, kind: input, shape index: {}]   ;;  %s4539_s1 = inlined_call_operand.vmem [shape: f32[2,1,13], index: 1, kind: input, shape index: {}]   ;;  %s4540_s2 = inlined_call_operand.vmem [shape: f32[1,32], index: 2, kind: input, shape index: {}]   ;;  %s4541_s3 = inlined_call_operand.vmem [shape: f32[1,32], index: 3, kind: input, shape index: {}]   ;;  %s4542_s4 = inlined_call_operand.vmem [shape: bf16[2,32,96], index: 4, kind: input, shape index: {}]   ;;  %s4543_s5 = inlined_call_operand.vmem [shape: f32[2,1,96], index: 5, kind: input, shape index: {}]   ;;  %s4544_s6 = inlined_call_operand.vmem [shape: bf16[2,32,32], index: 6, kind: input, shape index: {}]   ;;  %s4545_s7 = inlined_call_operand.vmem [shape: f32[2,1,32], index: 7, kind: input, shape index: {}]   ;;  %s4546_s8 = inlined_call_operand.vmem [shape: f32[2,1,32], index: 8, kind: input, shape index: {}]   ;;  %s4547_s9 = inlined_call_operand.vmem [shape: f32[2,1,32], index: 9, kind: input, shape index: {}]   ;;  %s4548_s10 = inlined_call_operand.vmem [shape: bf16[2,32,128], index: 10, kind: input, shape index: {}]   ;;  %s4549_s11 = inlined_call_operand.vmem [shape: f32[2,1,128], index: 11, kind: input, shape index: {}]   ;;  %s4550_s12 = inlined_call_operand.vmem [shape: bf16[2,128,32], index: 12, kind: input, shape index: {}]   ;;  %s4551_s13 = inlined_call_operand.vmem [shape: f32[2,1,32], index: 13, kind: input, shape index: {}]   ;;  %s4552_s14 = inlined_call_operand.vmem [shape: f32[2,1,32], index: 14, kind: input, shape index: {}]   ;;  %s4553_s15 = inlined_call_operand.vmem [shape: f32[2,1,32], index: 15, kind: input, shape index: {}]   ;;  %s4554_s16 = inlined_call_operand.vmem [shape: bf16[32,32], index: 16, kind: input, shape index: {}]   ;;  %s4555_s17 = inlined_call_operand.vmem [shape: f32[1,32], index: 17, kind: input, shape index: {}]   ;;  %s4556_s18 = inlined_call_operand.vmem [shape: bf16[32,64], index: 18, kind: input, shape index: {}]   ;;  %s4557_s19 = inlined_call_operand.vmem [shape: f32[1,64], index: 19, kind: input, shape index: {}]   ;;  %s4558_s20 = inlined_call_operand.vmem [shape: f32[1,64], index: 20, kind: input, shape index: {}]   ;;  %s4559_s21 = inlined_call_operand.vmem [shape: f32[1,64], index: 21, kind: input, shape index: {}]   ;;  %s4560_s22 = inlined_call_operand.vmem [shape: bf16[64,3], index: 22, kind: input, shape index: {}]   ;;  %s4561_s23 = inlined_call_operand.vmem [shape: f32[1,3], index: 23, kind: input, shape index: {}]   ;;  %s4562_s24 = inlined_call_operand.hbm [shape: f32[2,1,3], index: 24, kind: output, shape index: {}]  }
   0x1   :  { %4586 = sst [smem:[#allocation11_spill]] %s4538_s0 }
   0x2   :  { %4587 = sst [smem:[#allocation12_spill]] %s4539_s1 }
   0x3   :  { %4588 = sst [smem:[#allocation13_spill]] %s4540_s2 }
   0x4   :  { %4589 = sst [smem:[#allocation14_spill]] %s4541_s3 }
   0x5   :  { %4590 = sst [smem:[#allocation15_spill]] %s4542_s4 }
   0x6   :  { %4591 = sst [smem:[#allocation16_spill]] %s4543_s5 }
   0x7   :  { %4592 = sst [smem:[#allocation17_spill]] %s4544_s6 }
   0x8   :  { %4593 = sst [smem:[#allocation18_spill]] %s4545_s7 }
   0x9   :  { %4594 = sst [smem:[#allocation19_spill]] %s4546_s8 }
   0xa   :  { %4595 = sst [smem:[#allocation20_spill]] %s4562_s24 }
   0xb   :  { %29 = vsyncpa [#allocation3], 0 }
   0xc   :  { %31 = vsyncpa [#allocation3 + $0x1], 0  ;;  %s3861_s5 = smov 0   ;;  %s3863_s26 = smov 0  }
   0xd   :  { %s3865_s27 = smov 0   ;;  %s3867_s28 = smov 0  }
   0xe LB: > { %4596 = sst [smem:[#allocation5_spill]] %s3710_s5  ;;  %s3882_s6 = sadd.s32 4294967295, %s3722_s28   ;;  %s3722_s28 = sphi %s3867_s28, %s4631_s28   ;;  %s3718_s27 = sphi %s3865_s27, %s4633_s27   ;;  %s3714_s26 = sphi %s3863_s26, %s4635_s26   ;;  %s3710_s5 = sphi %s3861_s5, %s4634_s5  }
   0xf   : > { %4597 = sst [smem:[#allocation6_spill]] %s3718_s27  ;;  %s3027_s2 = sadd.s32 4294967294, %s3722_s28  }
  0x10   : > { %4598 = sst [smem:[#allocation7_spill]] %s3722_s28  ;;  %s3886_s29 = sadd.s32 1, %s3722_s28  }
  0x11   : > { %4599 = sst [smem:[#allocation8_spill]] %s3886_s29  ;;  %s558_s0 = sadd.s32 1, %s3718_s27 }
  0x12   : > { %s555_s7 = ssub.s32 %s3722_s28, %s3886_s29  ;;  %p568_p0 = scmp.ne.s32.totalorder %s3718_s27, %s3714_s26 }
  0x13   : > { %p556_p1 = scmp.eq.s32.totalorder %s555_s7, 0  ;;  %p569_p2 = scmp.eq.s32.totalorder %s3882_s6, 1 }
  0x14   : > { %p574_p3 = scmp.ne.s32.totalorder %s3714_s26, %s3710_s5  ;;  %p575_p4 = scmp.eq.s32.totalorder %s3027_s2, 1 }
  0x15   : > { %s3897_s30 = scalar_select %p556_p1, %s3718_s27, %s558_s0  }
  0x16   : > { %p3899_p5 = por %p569_p2, %p568_p0  ;;  %p3903_p6 = por %p575_p4, %p574_p3 }
  0x17   : > { %4600 = sst [smem:[#allocation9_spill]] %s3897_s30  ;;  %p3030_p7 = scmp.ge.s32.totalorder %s3722_s28, 1 }
  0x18   : > { %s4602_s25 = scalar_select %p3903_p6, 1, 0 }
  0x19   : > { %p673_p8 = scmp.lt.s32.totalorder %s3722_s28, 3 }
  0x1a   : > { %4603 = sst [smem:[#allocation10_spill]] %s4602_s25 }
  0x1b   : > { %p674_p9 = pnand %p3030_p7, %p673_p8 }
  0x1c   : > { %p741_p10 = scmp.lt.s32.totalorder (!%p674_p9), %s3882_s6, 1  ;;  %vm758_vm0 = vcmask (!%p674_p9), 261120   ;;  %vm762_vm1 = vcmask (!%p674_p9), 258048   ;;  %s4604_s0 = sld [smem:[#allocation11_spill]] (!%p674_p9)  ;;  %v3724_v15 = vmov (!%p674_p9), 0.0   ;;  %vm3725_vm2 = vmmov (!%p674_p9), 0  }
  0x1d   : > { %677 = sbr.rel (%p674_p9) target bundleno = 6255 (0x186f), region = 116  ;;  %s4605_s2 = sld [smem:[#allocation15_spill]] (!%p674_p9)  ;;  %3232 = vmatprep.subr.bf16.mxu0 (!%p674_p9), %v3724_v15  ;;  %3240 = vmatprep.subr.bf16.mxu1 (!%p674_p9), %v3724_v15  ;;  %v753_v23 = vlaneseq (!%p674_p9)  ;;  %vm925_vm4 = vcmask (!%p674_p9), 64512   ;;  %vm973_vm5 = vcmask (!%p674_p9), 105472   ;;  %vm977_vm6 = vcmask (!%p674_p9), 102400  }
  0x1e   : > { %3236 = vmatprep.mubr.msk.bf16.mxu0 (!%p674_p9), %vm3725_vm2, %v3724_v15  ;;  %3242 = vmatprep.mubr.msk.bf16.mxu1 (!%p674_p9), %vm3725_vm2, %v3724_v15  ;;  %s4607_s27 = sld [smem:[#allocation14_spill]] (!%p674_p9)  ;;  %s4579_s1 = smov (!%p674_p9), 88   ;;  %vm1100_vm9 = vcmask (!%p674_p9), 1045504   ;;  %vm1101_vm12 = vcmask (!%p674_p9), 1046528  }
  0x1f   : > { %v754_v27 = vshrl.u32 (!%p674_p9), %v753_v23, 7  ;;  %s4578_s30 = smov (!%p674_p9), 96   ;;  %s4577_s29 = smov (!%p674_p9), 80  }
  0x20   : > { %s4574_s25 = smov (!%p674_p9), 72   ;;  %s4619_s28 = smov (!%p674_p9), 88  }
  0x21   : > { %vm803_vm3 = vcmp.ge.s32.totalorder (!%p674_p9), %v754_v27, 5  ;;  %s4621_s24 = smov (!%p674_p9), 80   ;;  %s4625_s5 = smov (!%p674_p9), 104  }
  0x23   : > { %v3528_v14 = vld [vmem:[%s4605_s2] sm:$0xff] (!%p674_p9)   ;;  %v3529_v16 = vld [vmem:[%s4605_s2 + $0x8] sm:$0xff] (!%p674_p9)  }
  0x24   : > { %s3911_s8 = scalar_select %p741_p10, %s3882_s6, 1  ;;  %3233 = vmatpush3.bf16.msra.mxu0 %v3528_v14  ;;  %v3034_v28 = vld [vmem:[%s4607_s27] ss:$0 sm:$0xff] }
  0x25   : > { %3234 = vmatprep.subr.bf16.mxu0 %v3724_v15  ;;  %s4572_s27 = smov 104  }
  0x26   : > { %s3152_s4 = sshll.u32 %s3911_s8, 4 }
  0x27   : > { %s745_s7 = scalar_lea.vmem %s4604_s0, %s3152_s4  ;;  %s4606_s0 = sld [smem:[#allocation13_spill]] }
  0x28   : > { %v750_v0 = vld [vmem:[%s745_s7] sm:$0xff]  ;;  %v751_v1 = vld [vmem:[%s745_s7 + $0x8] sm:$0x1f]  ;;  %3235 = vmatpush3.bf16.msra.mxu0 %v3529_v16  ;;  %s4608_s4 = sld [smem:[#allocation16_spill]]  ;;  %s4573_s7 = smov 112  }
  0x29   : > { %v759_v2 = vsel %vm758_vm0, %v750_v0, 0.0  ;;  %v763_v3 = vsel %vm762_vm1, %v751_v1, 0.0  ;;  %3246 = vmatprep.subr.bf16.mxu0 %v3724_v15 }
  0x2a   : > { %760 = vadd.xlane.f32.xlu0 %v759_v2 }
  0x2d   : > { %v3033_v25 = vld [vmem:[%s4606_s0] ss:$0 sm:$0xff]  ;;  %s4575_s0 = smov 120  }
  0x2e   : > { %764 = vadd.xlane.f32.xlu0 %v763_v3  ;;  %v3035_v37 = vld [vmem:[%s4608_s4] ss:$0 sm:$0xff] }
  0xb7   : > { %v761_v4 = vpop.xlane.xlu0 %760 }
  0xb8   : > { %v767_v5 = vmul.f32 0.03125, %v761_v4 }
  0xba   : > { %v769_v6 = vsub.f32 %v750_v0, %v767_v5 }
  0xbb   : > { %v765_v7 = vpop.xlane.xlu0 %764 }
  0xbc   : > { %v768_v8 = vmul.f32 0.03125, %v765_v7  ;;  %v771_v9 = vmul.f32 %v769_v6, %v769_v6 }
  0xbe   : > { %v770_v10 = vsub.f32 %v751_v1, %v768_v8  ;;  %v773_v11 = vsel %vm758_vm0, %v771_v9, 0.0 }
  0xbf   : > { %774 = vadd.xlane.f32.xlu1 %v773_v11 }
  0xc0   : > { %v772_v12 = vmul.f32 %v770_v10, %v770_v10 }
  0xc2   : > { %v776_v13 = vsel %vm762_vm1, %v772_v12, 0.0 }
  0xc3   : > { %777 = vadd.xlane.f32.xlu1 %v776_v13 }
 0x14c   : > { %v775_v17 = vpop.xlane.xlu1 %774 }
 0x14d   : > { %v779_v18 = vmul.f32 0.03125, %v775_v17 }
 0x14f   : > { %v781_v19 = vadd.f32 1e-12, %v779_v18 }
 0x150   : > { %v778_v20 = vpop.xlane.xlu1 %777 }
 0x151   : > { %3564 = vrsqrt.f32 %v781_v19  ;;  %v780_v21 = vmul.f32 0.03125, %v778_v20 }
 0x153   : > { %v782_v22 = vadd.f32 1e-12, %v780_v21 }
 0x155   : > { %3566 = vrsqrt.f32 %v782_v22 }
 0x15b   : > { %v3565_v24 = vpop.eup %3564 }
 0x15c   : > { %v785_v26 = vmul.f32 %v3565_v24, %v769_v6 }
 0x15e   : > { %v793_v29 = vmul.f32 %v3033_v25, %v785_v26 }
 0x15f   : > { %v3567_v30 = vpop.eup %3566 }
 0x160   : > { %v786_v31 = vmul.f32 %v3567_v30, %v770_v10  ;;  %v801_v32 = vadd.f32 %v3034_v28, %v793_v29 }
 0x162   : > { %v794_v33 = vmul.f32 %v3033_v25, %v786_v31  ;;  %v3944_v35 = vsel %vm803_vm3, %v801_v32, %v750_v0 }
 0x164   : > { %v3942_v34 = vadd.f32 %v3034_v28, %v794_v33 }
 0x166   : > { %v847_v36 = vpack.c.bf16 %v3942_v34, %v3944_v35 }
 0x168   : > { %3237 = vmatmul.mubr.msk.bf16.vlgmr.msra.gmra.mrb[0].mxu0 %vm758_vm0, %v847_v36 }
 0x169   : > { %3248 = vmatprep.mubr.msk.bf16.mxu0 %vm3725_vm2, %v3724_v15 }
 0x23b   : > { %v903_v38 = vpop.f32.mrb[0].mxu0 }
 0x23c   : > { %v3954_v39 = vadd.f32 %v3035_v37, %v903_v38  ;;  %v3238_v40 = vpop.f32.mrb[1].mxu0 }
 0x23d   : > { %v906_v41 = vpop.f32.mrb[2].mxu0 }
 0x23e   : > { %v3956_v42 = vadd.f32 %v3035_v37, %v906_v41  ;;  %v3239_v43 = vpop.f32.mrb[3].mxu0  ;;  %v910_v44 = vmul.f32 0.35355338, %v3954_v39 }
 0x240   : > { %v911_v45 = vmul.f32 0.35355338, %v3956_v42  ;;  %v913_v46 = vpack.c.bf16 %v3956_v42, %v3954_v39  ;;  %v3518_v47 = vpack.i.bf16 %v3956_v42, %v3954_v39 }
 0x242   : > { %v912_v48 = vpack.c.bf16 %v911_v45, %v910_v44  ;;  %1017 = vrot.lane.b32.xlu0 %v913_v46, %s4579_s1  ;;  %s4626_s1 = smov 64  }
 0x244   : > { %1015 = vrot.lane.b32.xlu1 %v912_v48, %s4575_s0 }
 0x246   : > { %1195 = vrot.lane.b32.xlu0 %v912_v48, %s4573_s7  ;;  %s4610_s7 = sld [smem:[#allocation17_spill]] }
 0x248   : > { %923 = vrot.lane.b32.xlu1 %v913_v46, %s4578_s30  ;;  %s4618_s30 = sld [smem:[#allocation19_spill]] }
 0x24a   : > { %1326 = vrot.lane.b32.xlu0 %v912_v48, %s4572_s27  ;;  %s4622_s27 = smov 120  }
 0x24c   : > { %1197 = vrot.lane.b32.xlu1 %v913_v46, %s4577_s29  ;;  %s4617_s29 = sld [smem:[#allocation18_spill]] }
 0x250   : > { %1328 = vrot.lane.b32.xlu1 %v913_v46, %s4574_s25  ;;  %s4609_s25 = sld [smem:[#allocation12_spill]] }
 0x256   : > { %s748_s0 = scalar_lea.vmem %s4609_s25, %s3911_s8  ;;  %s4576_s25 = smov 64  }
 0x257   : > { %v3995_v60 = vld [vmem:[%s748_s0] ss:$0 sm:$0xff]  ;;  %s4623_s8 = smov 72   ;;  %s4624_s0 = smov 112  }
 0x2b4   : > { %v1018_v49 = vpop.permute.xlu0 %1017 }
 0x2b5   : > { %v1023_v50 = vsel %vm925_vm4, %v1018_v49, 0 }
 0x2b6   : > { %3247 = vmatpush3.bf16.xpose.msra.mxu0 %v1023_v50  ;;  %v1016_v51 = vpop.permute.xlu1 %1015 }
 0x2b7   : > { %3264 = vmatprep.subr.bf16.mxu0 %v3724_v15 }
 0x2b8   : > { %v1196_v57 = vpop.permute.xlu0 %1195 }
 0x2ba   : > { %v924_v52 = vpop.permute.xlu1 %923 }
 0x2bb   : > { %v930_v53 = vsel %vm925_vm4, %v924_v52, 0 }
 0x2bc   : > { %3241 = vmatpush3.bf16.xpose.msra.mxu1 %v930_v53  ;;  %v1327_v59 = vpop.permute.xlu0 %1326 }
 0x2bd   : > { %3249 = vmatmul.mubr.msk.bf16.vlgmr.msra.gmra.mrb[4].mxu0 %vm925_vm4, %v1016_v51  ;;  %3252 = vmatprep.subr.bf16.mxu1 %v3724_v15 }
 0x2be   : > { %v1198_v54 = vpop.permute.xlu1 %1197  ;;  %3266 = vmatprep.mubr.msk.bf16.mxu0 %vm3725_vm2, %v3724_v15 }
 0x2bf   : > { %v1203_v55 = vsel %vm925_vm4, %v1198_v54, 0 }
 0x2c0   : > { %3265 = vmatpush3.bf16.xpose.msra.mxu0 %v1203_v55 }
 0x2c1   : > { %3276 = vmatprep.subr.bf16.mxu0 %v3724_v15 }
 0x2c2   : > { %v1329_v56 = vpop.permute.xlu1 %1328 }
 0x2c3   : > { %3243 = vmatmul.mubr.msk.bf16.vlgmr.msra.gmra.mrb[0].mxu1 %vm925_vm4, %v912_v48  ;;  %v1334_v58 = vsel %vm925_vm4, %v1329_v56, 0 }
 0x2c4   : > { %3254 = vmatprep.mubr.msk.bf16.mxu1 %vm3725_vm2, %v3724_v15 }
 0x2c7   : > { %3267 = vmatmul.mubr.msk.bf16.vlgmr.msra.gmra.mrb[8].mxu0 %vm925_vm4, %v1196_v57 }
 0x2c8   : > { %3277 = vmatpush3.bf16.xpose.msra.mxu0 %v1334_v58  ;;  %3278 = vmatprep.mubr.msk.bf16.mxu0 %vm3725_vm2, %v3724_v15 }
 0x2c9   : > { %3288 = vmatprep.subr.bf16.mxu0 %v3724_v15 }
 0x2cf   : > { %3279 = vmatmul.mubr.msk.bf16.vlgmr.msra.gmra.mrb[12].mxu0 %vm925_vm4, %v1327_v59 }
 0x2d0   : > { %3292 = vmatprep.mubr.msk.bf16.mxu0 %vm3725_vm2, %v3724_v15 }
 0x390   : > { %v1059_v61 = vpop.f32.mrb[4].mxu0 }
 0x391   : > { %v1060_v62 = vadd.f32 %v3995_v60, %v1059_v61  ;;  %v3250_v63 = vpop.f32.mrb[5].mxu0 }
 0x392   : > { %v1062_v0 = vpop.f32.mrb[6].mxu0 }
 0x393   : > { %v1063_v1 = vadd.f32 %v3995_v60, %v1062_v0  ;;  %v3251_v2 = vpop.f32.mrb[7].mxu0  ;;  %v1066_v3 = vsel %vm973_vm5, %v1060_v62, -inf }
 0x394   : > { %1067 = vmax.xlane.f32.xlu1 %v1066_v3 }
 0x395   : > { %v1069_v4 = vsel %vm977_vm6, %v1063_v1, -inf }
 0x396   : > { %v966_v5 = vpop.f32.mrb[0].mxu1  ;;  %1070 = vmax.xlane.f32.xlu0 %v1069_v4 }
 0x397   : > { %v967_v6 = vadd.f32 %v3995_v60, %v966_v5  ;;  %v3244_v7 = vpop.f32.mrb[1].mxu1 }
 0x398   : > { %v969_v8 = vpop.f32.mrb[2].mxu1 }
 0x399   : > { %v970_v9 = vadd.f32 %v3995_v60, %v969_v8  ;;  %v3245_v10 = vpop.f32.mrb[3].mxu1  ;;  %v974_v11 = vsel %vm973_vm5, %v967_v6, -inf }
 0x39a   : > { %975 = vmax.xlane.f32.xlu0 %v974_v11  ;;  %v1239_v12 = vpop.f32.mrb[8].mxu0 }
 0x39b   : > { %v1240_v13 = vadd.f32 %v3995_v60, %v1239_v12  ;;  %v3268_v14 = vpop.f32.mrb[9].mxu0  ;;  %v978_v19 = vsel %vm977_vm6, %v970_v9, -inf }
 0x39c   : > { %v1242_v16 = vpop.f32.mrb[10].mxu0 }
 0x39d   : > { %v1243_v17 = vadd.f32 %v3995_v60, %v1242_v16  ;;  %v3269_v18 = vpop.f32.mrb[11].mxu0  ;;  %v1246_v20 = vsel %vm973_vm5, %v1240_v13, -inf }
 0x39e   : > { %979 = vmax.xlane.f32.xlu0 %v978_v19  ;;  %1247 = vmax.xlane.f32.xlu1 %v1246_v20 }
 0x39f   : > { %v1249_v21 = vsel %vm977_vm6, %v1243_v17, -inf }
 0x3a2   : > { %1250 = vmax.xlane.f32.xlu0 %v1249_v21  ;;  %v1370_v22 = vpop.f32.mrb[12].mxu0 }
 0x3a3   : > { %v1371_v24 = vadd.f32 %v3995_v60, %v1370_v22  ;;  %v3280_v25 = vpop.f32.mrb[13].mxu0 }
 0x3a4   : > { %v1373_v26 = vpop.f32.mrb[14].mxu0 }
 0x3a5   : > { %v1374_v27 = vadd.f32 %v3995_v60, %v1373_v26  ;;  %v3281_v28 = vpop.f32.mrb[15].mxu0  ;;  %v1377_v29 = vsel %vm973_vm5, %v1371_v24, -inf }
 0x3a6   : > { %1378 = vmax.xlane.f32.xlu1 %v1377_v29 }
 0x3a7   : > { %v1380_v30 = vsel %vm977_vm6, %v1374_v27, -inf }
 0x3a8   : > { %1381 = vmax.xlane.f32.xlu0 %v1380_v30 }
 0x421   : > { %v1068_v31 = vpop.xlane.xlu1 %1067 }
 0x422   : > { %v1072_v32 = vsub.f32 %v1060_v62, %v1068_v31 }
 0x423   : > { %v1071_v33 = vpop.xlane.xlu0 %1070 }
 0x424   : > { %v1074_v36 = vmul.f32 1.442695, %v1072_v32  ;;  %v1073_v37 = vsub.f32 %v1063_v1, %v1071_v33 }
 0x426   : > { %3568 = vpow2.f32 %v1074_v36  ;;  %v1076_v38 = vmul.f32 1.442695, %v1073_v37 }
 0x427   : > { %v976_v40 = vpop.xlane.xlu0 %975 }
 0x428   : > { %3570 = vpow2.f32 %v1076_v38  ;;  %v981_v41 = vsub.f32 %v967_v6, %v976_v40 }
 0x42a   : > { %v983_v43 = vmul.f32 1.442695, %v981_v41 }
 0x42b   : > { %v980_v44 = vpop.xlane.xlu0 %979  ;;  %v1248_v45 = vpop.xlane.xlu1 %1247 }
 0x42c   : > { %3572 = vpow2.f32 %v983_v43  ;;  %v982_v46 = vsub.f32 %v970_v9, %v980_v44  ;;  %v1252_v48 = vsub.f32 %v1240_v13, %v1248_v45  ;;  %v3530_v13 = vld [vmem:[%s4610_s7] sm:$0xff]  }
 0x42d   : > { %3289 = vmatpush3.bf16.msra.mxu0 %v3530_v13 }
 0x42e   : > { %v985_v49 = vmul.f32 1.442695, %v982_v46  ;;  %v1254_v50 = vmul.f32 1.442695, %v1252_v48  ;;  %3290 = vmatprep.subr.bf16.mxu0 %v3724_v15 }
 0x42f   : > { %v1251_v51 = vpop.xlane.xlu0 %1250 }
 0x430   : > { %v4013_v52 = vpop.eup %3568  ;;  %3574 = vpow2.f32 %v985_v49  ;;  %v1253_v53 = vsub.f32 %v1243_v17, %v1251_v51  ;;  %v4054_v17 = vand.u32 127, %v753_v23  ;;  %v3734_v23 = vmov 65535  }
 0x431   : > { %v1078_v54 = vsel %vm973_vm5, %v4013_v52, 0.0  ;;  %3576 = vpow2.f32 %v1254_v50  ;;  %v1102_v20 = vsel %vm1100_vm9, 4294967295, %v3734_v23 }
 0x432   : > { %v4017_v55 = vpop.eup %3570  ;;  %v1256_v56 = vmul.f32 1.442695, %v1253_v53  ;;  %1079 = vadd.xlane.f32.xlu1 %v1078_v54  ;;  %vm1088_vm7 = vcmp.ge.s32.totalorder %v4054_v17, 8  ;;  %vm1089_vm8 = vcmp.lt.s32.totalorder %v4054_v17, 16  ;;  %vm998_vm10 = vcmp.lt.s32.totalorder %v4054_v17, 8 }
 0x433   : > { %v1379_v57 = vpop.xlane.xlu1 %1378  ;;  %v1081_v58 = vsel %vm977_vm6, %v4017_v55, 0.0  ;;  %vm4059_vm11 = vmand %vm1088_vm7, %vm1089_vm8  ;;  %v4071_v28 = vsel %vm1101_vm12, %v1102_v20, 0  ;;  %vm1268_vm13 = vcmp.ge.s32.totalorder %v4054_v17, 16  ;;  %vm1269_vm14 = vcmp.lt.s32.totalorder %v4054_v17, 24 }
 0x434   : > { %v1383_v59 = vsub.f32 %v1371_v24, %v1379_v57  ;;  %1082 = vadd.xlane.f32.xlu0 %v1081_v58  ;;  %3578 = vpow2.f32 %v1256_v56  ;;  %vm4081_vm15 = vmand %vm1268_vm13, %vm1269_vm14  ;;  %vm1399_vm3 = vcmp.ge.s32.totalorder %v4054_v17, 24  ;;  %vm1400_vm7 = vcmp.lt.s32.totalorder %v4054_v17, 32 }
 0x435   : > { %v1382_v61 = vpop.xlane.xlu0 %1381  ;;  %vm4098_vm8 = vmand %vm1399_vm3, %vm1400_vm7 }
 0x436   : > { %v4021_v62 = vpop.eup %3572  ;;  %v1385_v63 = vmul.f32 1.442695, %v1383_v59  ;;  %v1384_v0 = vsub.f32 %v1374_v27, %v1382_v61 }
 0x437   : > { %v987_v1 = vsel %vm973_vm5, %v4021_v62, 0.0 }
 0x438   : > { %988 = vadd.xlane.f32.xlu1 %v987_v1  ;;  %3580 = vpow2.f32 %v1385_v63  ;;  %v1387_v3 = vmul.f32 1.442695, %v1384_v0 }
 0x43a   : > { %v4025_v2 = vpop.eup %3574  ;;  %3582 = vpow2.f32 %v1387_v3 }
 0x43b   : > { %v990_v4 = vsel %vm977_vm6, %v4025_v2, 0.0  ;;  %v4029_v5 = vpop.eup %3576 }
 0x43c   : > { %991 = vadd.xlane.f32.xlu0 %v990_v4  ;;  %v1258_v6 = vsel %vm973_vm5, %v4029_v5, 0.0 }
 0x43e   : > { %v4033_v7 = vpop.eup %3578 }
 0x43f   : > { %v1261_v8 = vsel %vm977_vm6, %v4033_v7, 0.0 }
 0x440   : > { %1259 = vadd.xlane.f32.xlu0 %v1258_v6 }
 0x442   : > { %v4037_v9 = vpop.eup %3580 }
 0x443   : > { %v1389_v10 = vsel %vm973_vm5, %v4037_v9, 0.0 }
 0x444   : > { %1262 = vadd.xlane.f32.xlu0 %v1261_v8  ;;  %v4041_v11 = vpop.eup %3582 }
 0x445   : > { %v1392_v12 = vsel %vm977_vm6, %v4041_v11, 0.0 }
 0x448   : > { %1390 = vadd.xlane.f32.xlu0 %v1389_v10 }
 0x449   : > { %3519 = vrot.lane.b32.xlu1 %v3518_v47, %s4576_s25  ;;  %s4620_s25 = smov 96  }
 0x44c   : > { %1393 = vadd.xlane.f32.xlu0 %v1392_v12 }
 0x4bf   : > { %v1080_v14 = vpop.xlane.xlu1 %1079 }
 0x4c1   : > { %v1083_v16 = vpop.xlane.xlu0 %1082 }
 0x4c2   : > { %3584 = vrcp.f32 %v1083_v16 }
 0x4c3   : > { %3586 = vrcp.f32 %v1080_v14 }
 0x4c5   : > { %v989_v39 = vpop.xlane.xlu1 %988 }
 0x4c9   : > { %v3520_v47 = vpop.permute.xlu1 %3519  ;;  %v992_v21 = vpop.xlane.xlu0 %991 }
 0x4ca   : > { %v3522_v18 = vunpack.i.h.bf16 %v3520_v47  ;;  %v3521_v19 = vunpack.i.l.bf16 %v3520_v47  ;;  %3588 = vrcp.f32 %v992_v21 }
 0x4cb   : > { %3590 = vrcp.f32 %v989_v39 }
 0x4cc   : > { %v3585_v22 = vpop.eup %3584  ;;  %v1094_v24 = vsel %vm4059_vm11, %v3522_v18, 0.0  ;;  %v1011_v25 = vsel %vm998_vm10, %v3522_v18, 0.0  ;;  %v1010_v26 = vsel %vm998_vm10, %v3521_v19, 0.0  ;;  %v1093_v27 = vsel %vm4059_vm11, %v3521_v19, 0.0 }
 0x4cd   : > { %v3587_v29 = vpop.eup %3586  ;;  %v1096_v30 = vpack.c.bf16 %v1094_v24, %v1093_v27  ;;  %v1087_v31 = vmul.f32 %v3585_v22, %v4017_v55  ;;  %v1013_v33 = vpack.c.bf16 %v1011_v25, %v1010_v26  ;;  %v1260_v37 = vpop.xlane.xlu0 %1259  ;;  %v1274_v45 = vsel %vm4081_vm15, %v3522_v18, 0.0 }
 0x4ce   : > { %v1086_v36 = vmul.f32 %v3587_v29, %v4013_v52  ;;  %v1273_v46 = vsel %vm4081_vm15, %v3521_v19, 0.0  ;;  %v1405_v58 = vsel %vm4098_vm8, %v3522_v18, 0.0  ;;  %v1404_v59 = vsel %vm4098_vm8, %v3521_v19, 0.0 }
 0x4cf   : > { %v1105_v32 = vand.u32 %v4071_v28, %v1096_v30  ;;  %v1152_v40 = vand.u32 %v4071_v28, %v1013_v33  ;;  %v1276_v50 = vpack.c.bf16 %v1274_v45, %v1273_v46  ;;  %v1407_v63 = vpack.c.bf16 %v1405_v58, %v1404_v59 }
 0x4d0   : > { %v1095_v38 = vpack.c.bf16 %v1087_v31, %v1086_v36 }
 0x4d1   : > { %3253 = vmatpush3.bf16.msra.mxu1 %v1105_v32  ;;  %v1263_v43 = vpop.xlane.xlu0 %1262  ;;  %v1281_v54 = vand.u32 %v1276_v50, %v4071_v28  ;;  %v3052_v50 = vld [vmem:[%s4618_s30] ss:$0 sm:$0xff] }
 0x4d2   : > { %3258 = vmatprep.subr.bf16.mxu1 %v3724_v15  ;;  %3592 = vrcp.f32 %v1263_v43 }
 0x4d3   : > { %3594 = vrcp.f32 %v1260_v37  ;;  %v3533_v37 = vld [vmem:[%s4548_s10 + $0x8] sm:$0xff]  }
 0x4d4   : > { %3255 = vmatmul.mubr.msk.bf16.vlgmr.msra.gmra.mrb[4].mxu1 %vm973_vm5, %v1095_v38  ;;  %v3589_v44 = vpop.eup %3588 }
 0x4d5   : > { %3259 = vmatpush3.bf16.msra.mxu1 %v1152_v40  ;;  %3260 = vmatprep.mubr.msk.bf16.mxu1 %vm3725_vm2, %v3724_v15  ;;  %v3591_v48 = vpop.eup %3590  ;;  %v996_v49 = vmul.f32 %v3589_v44, %v4025_v2  ;;  %v1391_v52 = vpop.xlane.xlu0 %1390  ;;  %v1412_v2 = vand.u32 %v1407_v63, %v4071_v28  ;;  %v3536_v63 = vld [vmem:[%s4550_s12 + $0x10] sm:$0xff]  }
 0x4d6   : > { %3270 = vmatprep.subr.bf16.mxu1 %v3724_v15  ;;  %v995_v51 = vmul.f32 %v3591_v48, %v4021_v62 }
 0x4d8   : > { %v1012_v53 = vpack.c.bf16 %v996_v49, %v995_v51 }
 0x4d9   : > { %v1394_v56 = vpop.xlane.xlu0 %1393 }
 0x4da   : > { %3596 = vrcp.f32 %v1394_v56 }
 0x4db   : > { %3598 = vrcp.f32 %v1391_v52 }
 0x4dc   : > { %v3593_v57 = vpop.eup %3592 }
 0x4dd   : > { %v3595_v61 = vpop.eup %3594  ;;  %v1267_v62 = vmul.f32 %v3593_v57, %v4033_v7 }
 0x4de   : > { %v1266_v0 = vmul.f32 %v3595_v61, %v4029_v5  ;;  %v3531_v5 = vld [vmem:[%s4610_s7 + $0x8] sm:$0xff]   ;;  %v3534_v61 = vld [vmem:[%s4550_s12] sm:$0xff]  }
 0x4df   : > { %3291 = vmatpush3.bf16.msra.mxu0 %v3531_v5 }
 0x4e0   : > { %3261 = vmatmul.mubr.msk.bf16.vlgmr.msra.gmra.mrb[4].mxu1 %vm973_vm5, %v1012_v53  ;;  %v1275_v1 = vpack.c.bf16 %v1267_v62, %v1266_v0  ;;  %3296 = vmatprep.subr.bf16.mxu0 %v3724_v15  ;;  %v3535_v62 = vld [vmem:[%s4550_s12 + $0x8] sm:$0xff]   ;;  %v3537_v0 = vld [vmem:[%s4550_s12 + $0x18] sm:$0xff]  }
 0x4e1   : > { %3271 = vmatpush3.bf16.msra.mxu1 %v1281_v54  ;;  %3272 = vmatprep.mubr.msk.bf16.mxu1 %vm3725_vm2, %v3724_v15  ;;  %v3053_v54 = vld [vmem:[%s4547_s9] ss:$0 sm:$0xff] }
 0x4e2   : > { %3282 = vmatprep.subr.bf16.mxu1 %v3724_v15 }
 0x4e4   : > { %v3597_v3 = vpop.eup %3596 }
 0x4e5   : > { %v3599_v4 = vpop.eup %3598  ;;  %v1398_v6 = vmul.f32 %v3597_v3, %v4041_v11  ;;  %v3540_v3 = vld [vmem:[%s4550_s12 + $0x30] sm:$0xff]  }
 0x4e6   : > { %v1397_v7 = vmul.f32 %v3599_v4, %v4037_v9  ;;  %v3048_v9 = vld [vmem:[%s4617_s29] ss:$0 sm:$0xff]  ;;  %v3541_v4 = vld [vmem:[%s4550_s12 + $0x38] sm:$0xff]  }
 0x4e8   : > { %v1406_v8 = vpack.c.bf16 %v1398_v6, %v1397_v7  ;;  %v3054_v6 = vld [vmem:[%s4549_s11] ss:$0 sm:$0xff] }
 0x4ec   : > { %3273 = vmatmul.mubr.msk.bf16.vlgmr.msra.gmra.mrb[4].mxu1 %vm973_vm5, %v1275_v1  ;;  %v3538_v1 = vld [vmem:[%s4550_s12 + $0x20] sm:$0xff]  }
 0x4ed   : > { %3283 = vmatpush3.bf16.msra.mxu1 %v1412_v2  ;;  %3284 = vmatprep.mubr.msk.bf16.mxu1 %vm3725_vm2, %v3724_v15  ;;  %v3539_v2 = vld [vmem:[%s4550_s12 + $0x28] sm:$0xff]  }
 0x4ee   : > { %3304 = vmatprep.subr.bf16.mxu1 %v3724_v15 }
 0x4f8   : > { %3285 = vmatmul.mubr.msk.bf16.vlgmr.msra.gmra.mrb[4].mxu1 %vm973_vm5, %v1406_v8 }
 0x4f9   : > { %3320 = vmatprep.mubr.msk.bf16.mxu1 %vm3725_vm2, %v3724_v15  ;;  %3305 = vmatpush3.bf16.msra.mxu1 %v3534_v61 }
 0x4fa   : > { %3306 = vmatprep.subr.bf16.mxu1 %v3724_v15 }
 0x4fd   : > { %3307 = vmatpush3.bf16.msra.mxu1 %v3535_v62 }
 0x4fe   : > { %3308 = vmatprep.subr.bf16.mxu1 %v3724_v15 }
 0x501   : > { %3309 = vmatpush3.bf16.msra.mxu1 %v3536_v63 }
 0x502   : > { %3310 = vmatprep.subr.bf16.mxu1 %v3724_v15 }
 0x505   : > { %3311 = vmatpush3.bf16.msra.mxu1 %v3537_v0 }
 0x506   : > { %3312 = vmatprep.subr.bf16.mxu1 %v3724_v15 }
 0x509   : > { %3313 = vmatpush3.bf16.msra.mxu1 %v3538_v1 }
 0x50a   : > { %3314 = vmatprep.subr.bf16.mxu1 %v3724_v15 }
 0x50d   : > { %3315 = vmatpush3.bf16.msra.mxu1 %v3539_v2 }
 0x50e   : > { %3316 = vmatprep.subr.bf16.mxu1 %v3724_v15 }
 0x511   : > { %3317 = vmatpush3.bf16.msra.mxu1 %v3540_v3 }
 0x512   : > { %3318 = vmatprep.subr.bf16.mxu1 %v3724_v15 }
 0x515   : > { %3319 = vmatpush3.bf16.msra.mxu1 %v3541_v4 }
 0x516   : > { %3356 = vmatprep.subr.bf16.mxu1 %v3724_v15 }
 0x5cb   : > { %v1448_v10 = vpop.f32.mrb[4].mxu1 }
 0x5cc   : > { %v3286_v12 = vpop.f32.mrb[5].mxu1 }
 0x5cd   : > { %v1451_v13 = vpop.f32.mrb[6].mxu1 }
 0x5ce   : > { %v1457_v14 = vpack.c.bf16 %v1451_v13, %v1448_v10  ;;  %v3287_v11 = vpop.f32.mrb[7].mxu1 }
 0x5d0   : > { %3293 = vmatmul.mubr.msk.bf16.vlgmr.msra.gmra.mrb[16].mxu0 %vm758_vm0, %v1457_v14 }
 0x5d1   : > { %3300 = vmatprep.mubr.msk.bf16.mxu0 %vm3725_vm2, %v3724_v15 }
 0x6a3   : > { %v1513_v16 = vpop.f32.mrb[16].mxu0 }
 0x6a4   : > { %v1514_v39 = vadd.f32 %v3048_v9, %v1513_v16  ;;  %v3294_v47 = vpop.f32.mrb[17].mxu0 }
 0x6a5   : > { %v1516_v18 = vpop.f32.mrb[18].mxu0 }
 0x6a6   : > { %v1517_v19 = vadd.f32 %v3048_v9, %v1516_v18  ;;  %v3295_v23 = vpop.f32.mrb[19].mxu0  ;;  %v1520_v20 = vadd.f32 %v1514_v39, %v3944_v35 }
 0x6a8   : > { %v1522_v21 = vsel %vm758_vm0, %v1520_v20, 0.0  ;;  %v1521_v22 = vadd.f32 %v1517_v19, %v3942_v34  ;;  %v3532_v34 = vld [vmem:[%s4548_s10] sm:$0xff]  }
 0x6a9   : > { %1523 = vadd.xlane.f32.xlu1 %v1522_v21  ;;  %3297 = vmatpush3.bf16.msra.mxu0 %v3532_v34 }
 0x6aa   : > { %v1525_v24 = vsel %vm762_vm1, %v1521_v22, 0.0  ;;  %3298 = vmatprep.subr.bf16.mxu0 %v3724_v15 }
 0x6ab   : > { %1526 = vadd.xlane.f32.xlu0 %v1525_v24 }
 0x6ad   : > { %3299 = vmatpush3.bf16.msra.mxu0 %v3533_v37 }
 0x6ae   : > { %3324 = vmatprep.subr.bf16.mxu0 %v3724_v15 }
 0x736   : > { %v1524_v25 = vpop.xlane.xlu1 %1523 }
 0x737   : > { %v1528_v26 = vmul.f32 0.03125, %v1524_v25 }
 0x738   : > { %v1527_v27 = vpop.xlane.xlu0 %1526 }
 0x739   : > { %v1530_v29 = vsub.f32 %v1520_v20, %v1528_v26  ;;  %v1529_v30 = vmul.f32 0.03125, %v1527_v27 }
 0x73b   : > { %v1531_v31 = vsub.f32 %v1521_v22, %v1529_v30  ;;  %v1532_v32 = vmul.f32 %v1530_v29, %v1530_v29 }
 0x73d   : > { %v1534_v33 = vsel %vm758_vm0, %v1532_v32, 0.0  ;;  %v1533_v36 = vmul.f32 %v1531_v31, %v1531_v31  ;;  %v3058_v32 = vld [vmem:[%s4551_s13] ss:$0 sm:$0xff] }
 0x73e   : > { %1535 = vadd.xlane.f32.xlu0 %v1534_v33 }
 0x73f   : > { %v1537_v35 = vsel %vm762_vm1, %v1533_v36, 0.0 }
 0x742   : > { %1538 = vadd.xlane.f32.xlu0 %v1537_v35 }
 0x7cb   : > { %v1536_v38 = vpop.xlane.xlu0 %1535 }
 0x7cc   : > { %v1540_v40 = vmul.f32 0.03125, %v1536_v38 }
 0x7ce   : > { %v1542_v43 = vadd.f32 1e-12, %v1540_v40 }
 0x7cf   : > { %v1539_v44 = vpop.xlane.xlu0 %1538 }
 0x7d0   : > { %3600 = vrsqrt.f32 %v1542_v43  ;;  %v1541_v45 = vmul.f32 0.03125, %v1539_v44 }
 0x7d2   : > { %v1543_v46 = vadd.f32 1e-12, %v1541_v45 }
 0x7d4   : > { %3602 = vrsqrt.f32 %v1543_v46 }
 0x7da   : > { %v3601_v48 = vpop.eup %3600 }
 0x7db   : > { %v1546_v49 = vmul.f32 %v3601_v48, %v1530_v29 }
 0x7dd   : > { %v1554_v52 = vmul.f32 %v3052_v50, %v1546_v49 }
 0x7de   : > { %v3603_v51 = vpop.eup %3602 }
 0x7df   : > { %v1547_v53 = vmul.f32 %v3603_v51, %v1531_v31  ;;  %v4151_v57 = vadd.f32 %v3053_v54, %v1554_v52 }
 0x7e1   : > { %v1555_v56 = vmul.f32 %v3052_v50, %v1547_v53 }
 0x7e3   : > { %v4153_v58 = vadd.f32 %v3053_v54, %v1555_v56 }
 0x7e5   : > { %v1564_v59 = vpack.c.bf16 %v4153_v58, %v4151_v57 }
 0x7e7   : > { %3301 = vmatmul.mubr.msk.bf16.vlgmr.msra.gmra.mrb[20].mxu0 %vm758_vm0, %v1564_v59  ;;  %v3543_v59 = vld [vmem:[%s4605_s2 + $0x18] sm:$0xff]  }
 0x7e8   : > { %3328 = vmatprep.mubr.msk.bf16.mxu0 %vm3725_vm2, %v3724_v15 }
 0x8ba   : > { %v1620_v7 = vpop.f32.mrb[20].mxu0 }
 0x8bb   : > { %v1621_v8 = vadd.f32 %v3054_v6, %v1620_v7  ;;  %v3302_v5 = vpop.f32.mrb[21].mxu0 }
 0x8bc   : > { %v1623_v10 = vpop.f32.mrb[22].mxu0 }
 0x8bd   : > { %v1629_v12 = vmul.f32 0.044715, %v1621_v8  ;;  %v1624_v13 = vadd.f32 %v3054_v6, %v1623_v10  ;;  %v3303_v14 = vpop.f32.mrb[23].mxu0  ;;  %v1627_v25 = vmul.f32 0.5, %v1621_v8  ;;  %v3067_v6 = vld [vmem:[%s4552_s14] ss:$0 sm:$0xff] }
 0x8be   : > { %v3068_v10 = vld [vmem:[%s4553_s15] ss:$0 sm:$0xff] }
 0x8bf   : > { %v1631_v11 = vmul.f32 %v1629_v12, %v1621_v8  ;;  %v1630_v9 = vmul.f32 0.044715, %v1624_v13  ;;  %v1628_v26 = vmul.f32 0.5, %v1624_v13 }
 0x8c1   : > { %v1633_v16 = vmul.f32 %v1631_v11, %v1621_v8  ;;  %v1632_v39 = vmul.f32 %v1630_v9, %v1624_v13  ;;  %v3105_v9 = vld [vmem:[%s4608_s4 + $0x1] ss:$0 sm:$0xff] }
 0x8c3   : > { %v1635_v47 = vadd.f32 %v1633_v16, %v1621_v8  ;;  %v1634_v18 = vmul.f32 %v1632_v39, %v1624_v13 }
 0x8c5   : > { %v1637_v19 = vmul.f32 0.7978846, %v1635_v47  ;;  %v1636_v23 = vadd.f32 %v1634_v18, %v1624_v13 }
 0x8c7   : > { %3604 = vtanh.f32 %v1637_v19  ;;  %v1638_v20 = vmul.f32 0.7978846, %v1636_v23 }
 0x8c9   : > { %3606 = vtanh.f32 %v1638_v20 }
 0x8d1   : > { %v3605_v21 = vpop.eup %3604 }
 0x8d2   : > { %v1641_v22 = vadd.f32 1.0, %v3605_v21 }
 0x8d3   : > { %v3607_v24 = vpop.eup %3606 }
 0x8d4   : > { %v1642_v27 = vadd.f32 1.0, %v3607_v24  ;;  %v1643_v29 = vmul.f32 %v1641_v22, %v1627_v25 }
 0x8d6   : > { %v1644_v30 = vmul.f32 %v1642_v27, %v1628_v26 }
 0x8d8   : > { %v1645_v31 = vpack.c.bf16 %v1644_v30, %v1643_v29 }
 0x8da   : > { %3321 = vmatmul.mubr.bf16.vlgmr.msra.gmra.mrb[8].mxu1 %v1645_v31 }
 0x8db   : > { %3358 = vmatprep.mubr.msk.bf16.mxu1 %vm3725_vm2, %v3724_v15 }
 0x9ad   : > { %v1734_v33 = vpop.f32.mrb[8].mxu1 }
 0x9ae   : > { %v1735_v36 = vadd.f32 %v3058_v32, %v1734_v33  ;;  %v3322_v35 = vpop.f32.mrb[9].mxu1 }
 0x9af   : > { %v1737_v34 = vpop.f32.mrb[10].mxu1 }
 0x9b0   : > { %v1738_v37 = vadd.f32 %v3058_v32, %v1737_v34  ;;  %v3323_v38 = vpop.f32.mrb[11].mxu1  ;;  %v1741_v40 = vadd.f32 %v1735_v36, %v4151_v57 }
 0x9b2   : > { %v1743_v43 = vsel %vm758_vm0, %v1741_v40, 0.0  ;;  %v1742_v44 = vadd.f32 %v1738_v37, %v4153_v58  ;;  %v3542_v58 = vld [vmem:[%s4605_s2 + $0x10] sm:$0xff]  }
 0x9b3   : > { %1744 = vadd.xlane.f32.xlu0 %v1743_v43  ;;  %3325 = vmatpush3.bf16.msra.mxu0 %v3542_v58 }
 0x9b4   : > { %v1746_v45 = vsel %vm762_vm1, %v1742_v44, 0.0  ;;  %3326 = vmatprep.subr.bf16.mxu0 %v3724_v15 }
 0x9b7   : > { %1747 = vadd.xlane.f32.xlu0 %v1746_v45  ;;  %3327 = vmatpush3.bf16.msra.mxu0 %v3543_v59 }
 0x9b8   : > { %3332 = vmatprep.subr.bf16.mxu0 %v3724_v15 }
 0xa40   : > { %v1745_v46 = vpop.xlane.xlu0 %1744 }
 0xa41   : > { %v1749_v48 = vmul.f32 0.03125, %v1745_v46 }
 0xa43   : > { %v1751_v49 = vsub.f32 %v1741_v40, %v1749_v48 }
 0xa44   : > { %v1748_v50 = vpop.xlane.xlu0 %1747 }
 0xa45   : > { %v1750_v51 = vmul.f32 0.03125, %v1748_v50  ;;  %v1753_v52 = vmul.f32 %v1751_v49, %v1751_v49 }
 0xa47   : > { %v1752_v53 = vsub.f32 %v1742_v44, %v1750_v51  ;;  %v1755_v54 = vsel %vm758_vm0, %v1753_v52, 0.0 }
 0xa48   : > { %1756 = vadd.xlane.f32.xlu0 %v1755_v54 }
 0xa49   : > { %v1754_v56 = vmul.f32 %v1752_v53, %v1752_v53 }
 0xa4b   : > { %v1758_v57 = vsel %vm762_vm1, %v1754_v56, 0.0 }
 0xa4c   : > { %1759 = vadd.xlane.f32.xlu0 %v1758_v57 }
 0xad5   : > { %v1757_v61 = vpop.xlane.xlu0 %1756 }
 0xad6   : > { %v1761_v62 = vmul.f32 0.03125, %v1757_v61 }
 0xad8   : > { %v1763_v63 = vadd.f32 1e-12, %v1761_v62 }
 0xad9   : > { %v1760_v0 = vpop.xlane.xlu0 %1759 }
 0xada   : > { %3608 = vrsqrt.f32 %v1763_v63  ;;  %v1762_v1 = vmul.f32 0.03125, %v1760_v0 }
 0xadc   : > { %v1764_v2 = vadd.f32 1e-12, %v1762_v1 }
 0xade   : > { %3610 = vrsqrt.f32 %v1764_v2 }
 0xae4   : > { %v3609_v3 = vpop.eup %3608 }
 0xae5   : > { %v1767_v4 = vmul.f32 %v3609_v3, %v1751_v49 }
 0xae7   : > { %v1775_v8 = vmul.f32 %v3067_v6, %v1767_v4 }
 0xae8   : > { %v3611_v7 = vpop.eup %3610 }
 0xae9   : > { %v1768_v5 = vmul.f32 %v3611_v7, %v1752_v53  ;;  %v4220_v13 = vadd.f32 %v3068_v10, %v1775_v8 }
 0xaeb   : > { %v1776_v12 = vmul.f32 %v3067_v6, %v1768_v5 }
 0xaed   : > { %v4222_v14 = vadd.f32 %v3068_v10, %v1776_v12 }
 0xaef   : > { %v1833_v11 = vpack.c.bf16 %v4222_v14, %v4220_v13 }
 0xaf1   : > { %3329 = vmatmul.mubr.msk.bf16.vlgmr.msra.gmra.mrb[24].mxu0 %vm758_vm0, %v1833_v11 }
 0xaf2   : > { %3334 = vmatprep.mubr.msk.bf16.mxu0 %vm3725_vm2, %v3724_v15 }
 0xbc4   : > { %v1889_v16 = vpop.f32.mrb[24].mxu0 }
 0xbc5   : > { %v4232_v39 = vadd.f32 %v3105_v9, %v1889_v16  ;;  %v3330_v47 = vpop.f32.mrb[25].mxu0 }
 0xbc6   : > { %v1892_v18 = vpop.f32.mrb[26].mxu0 }
 0xbc7   : > { %v4234_v19 = vadd.f32 %v3105_v9, %v1892_v18  ;;  %v3331_v23 = vpop.f32.mrb[27].mxu0  ;;  %v1896_v20 = vmul.f32 0.35355338, %v4232_v39 }
 0xbc9   : > { %v1897_v21 = vmul.f32 0.35355338, %v4234_v19  ;;  %v1899_v22 = vpack.c.bf16 %v4234_v19, %v4232_v39  ;;  %v3523_v24 = vpack.i.bf16 %v4234_v19, %v4232_v39 }
 0xbcb   : > { %v1898_v25 = vpack.c.bf16 %v1897_v21, %v1896_v20  ;;  %1987 = vrot.lane.b32.xlu1 %v1899_v22, %s4619_s28  ;;  %1901 = vrot.lane.b32.xlu0 %v1899_v22, %s4620_s25  ;;  %s3149_s25 = sshll.u32 %s3882_s6, 4  ;;  %s3735_s28 = smov [#allocation2]  }
 0xbcf   : > { %2158 = vrot.lane.b32.xlu1 %v1899_v22, %s4621_s24  ;;  %1985 = vrot.lane.b32.xlu0 %v1898_v25, %s4622_s27 }
 0xbd3   : > { %2284 = vrot.lane.b32.xlu1 %v1899_v22, %s4623_s8  ;;  %2156 = vrot.lane.b32.xlu0 %v1898_v25, %s4624_s0  ;;  %s4627_s0 = sld [smem:[#allocation20_spill]] }
 0xbd7   : > { %2282 = vrot.lane.b32.xlu0 %v1898_v25, %s4625_s5  ;;  %s739_s5 = sand.u32 1, %s3714_s26  }
 0xbd8   : > { %s740_s2 = scalar_lea.vmem [#allocation2], %s739_s5  ;;  %s2951_s6 = scalar_lea.sflag [#allocation3], %s739_s5 }
 0xbd9   : > { %s2963_s24 = sshll.u32 %s740_s2, 4  ;;  %s4496_s4 = scalar_lea.hbm %s4627_s0, %s3149_s25  ;;  %s4498_s24 = int_to_ptr.vmem [resolvable:$true] %s2963_s24 }
 0xc3d   : > { %v1988_v26 = vpop.permute.xlu1 %1987  ;;  %v1902_v27 = vpop.permute.xlu0 %1901 }
 0xc3e   : > { %v1907_v29 = vsel %vm925_vm4, %v1902_v27, 0  ;;  %v1993_v33 = vsel %vm925_vm4, %v1988_v26, 0 }
 0xc3f   : > { %3333 = vmatpush3.bf16.xpose.msra.mxu0 %v1907_v29 }
 0xc40   : > { %3338 = vmatprep.subr.bf16.mxu0 %v3724_v15 }
 0xc41   : > { %v2159_v30 = vpop.permute.xlu1 %2158  ;;  %v1986_v32 = vpop.permute.xlu0 %1985 }
 0xc42   : > { %v2164_v31 = vsel %vm925_vm4, %v2159_v30, 0 }
 0xc43   : > { %3357 = vmatpush3.bf16.xpose.msra.mxu1 %v2164_v31 }
 0xc44   : > { %3368 = vmatprep.subr.bf16.mxu1 %v3724_v15 }
 0xc45   : > { %v2285_v36 = vpop.permute.xlu1 %2284  ;;  %v2157_v35 = vpop.permute.xlu0 %2156 }
 0xc46   : > { %3335 = vmatmul.mubr.msk.bf16.vlgmr.msra.gmra.mrb[28].mxu0 %vm925_vm4, %v1898_v25  ;;  %v2290_v34 = vsel %vm925_vm4, %v2285_v36, 0 }
 0xc47   : > { %3339 = vmatpush3.bf16.xpose.msra.mxu0 %v1993_v33  ;;  %3340 = vmatprep.mubr.msk.bf16.mxu0 %vm3725_vm2, %v3724_v15 }
 0xc48   : > { %3344 = vmatprep.subr.bf16.mxu0 %v3724_v15 }
 0xc49   : > { %v2283_v37 = vpop.permute.xlu0 %2282 }
 0xc4a   : > { %3359 = vmatmul.mubr.msk.bf16.vlgmr.msra.gmra.mrb[12].mxu1 %vm925_vm4, %v2157_v35 }
 0xc4b   : > { %3369 = vmatpush3.bf16.xpose.msra.mxu1 %v2290_v34  ;;  %3370 = vmatprep.mubr.msk.bf16.mxu1 %vm3725_vm2, %v3724_v15 }
 0xc4c   : > { %3380 = vmatprep.subr.bf16.mxu1 %v3724_v15 }
 0xc4e   : > { %3341 = vmatmul.mubr.msk.bf16.vlgmr.msra.gmra.mrb[32].mxu0 %vm925_vm4, %v1986_v32 }
 0xc4f   : > { %3346 = vmatprep.mubr.msk.bf16.mxu0 %vm3725_vm2, %v3724_v15 }
 0xc52   : > { %3371 = vmatmul.mubr.msk.bf16.vlgmr.msra.gmra.mrb[16].mxu1 %vm925_vm4, %v2283_v37 }
 0xc53   : > { %3384 = vmatprep.mubr.msk.bf16.mxu1 %vm3725_vm2, %v3724_v15 }
 0xd19   : > { %v1943_v38 = vpop.f32.mrb[28].mxu0 }
 0xd1a   : > { %v3336_v40 = vpop.f32.mrb[29].mxu0  ;;  %v1944_v61 = vadd.f32 %v3995_v60, %v1943_v38 }
 0xd1b   : > { %v1946_v43 = vpop.f32.mrb[30].mxu0 }
 0xd1c   : > { %v3337_v44 = vpop.f32.mrb[31].mxu0  ;;  %v1947_v54 = vadd.f32 %v3995_v60, %v1946_v43  ;;  %v1950_v6 = vsel %vm973_vm5, %v1944_v61, -inf }
 0xd1d   : > { %v2200_v45 = vpop.f32.mrb[12].mxu1 }
 0xd1e   : > { %v3360_v46 = vpop.f32.mrb[13].mxu1  ;;  %v1953_v3 = vsel %vm977_vm6, %v1947_v54, -inf  ;;  %v2201_v4 = vadd.f32 %v3995_v60, %v2200_v45 }
 0xd1f   : > { %v2203_v48 = vpop.f32.mrb[14].mxu1 }
 0xd20   : > { %v3361_v49 = vpop.f32.mrb[15].mxu1  ;;  %v2204_v1 = vadd.f32 %v3995_v60, %v2203_v48  ;;  %v2207_v10 = vsel %vm973_vm5, %v2201_v4, -inf }
 0xd21   : > { %v2029_v50 = vpop.f32.mrb[32].mxu0 }
 0xd22   : > { %v2030_v51 = vadd.f32 %v3995_v60, %v2029_v50  ;;  %v3342_v52 = vpop.f32.mrb[33].mxu0  ;;  %v2210_v8 = vsel %vm977_vm6, %v2204_v1, -inf }
 0xd23   : > { %v2032_v53 = vpop.f32.mrb[34].mxu0 }
 0xd24   : > { %v2033_v56 = vadd.f32 %v3995_v60, %v2032_v53  ;;  %v3343_v57 = vpop.f32.mrb[35].mxu0  ;;  %v2036_v58 = vsel %vm973_vm5, %v2030_v51, -inf }
 0xd25   : > { %v2326_v59 = vpop.f32.mrb[16].mxu1  ;;  %2037 = vmax.xlane.f32.xlu1 %v2036_v58 }
 0xd26   : > { %v3372_v62 = vpop.f32.mrb[17].mxu1  ;;  %v2039_v63 = vsel %vm977_vm6, %v2033_v56, -inf  ;;  %v2327_v5 = vadd.f32 %v3995_v60, %v2326_v59 }
 0xd27   : > { %v2329_v0 = vpop.f32.mrb[18].mxu1  ;;  %2040 = vmax.xlane.f32.xlu0 %v2039_v63  ;;  %v3544_v63 = vld [vmem:[%s4610_s7 + $0x10] sm:$0xff]  }
 0xd28   : > { %v3373_v2 = vpop.f32.mrb[19].mxu1  ;;  %v2330_v7 = vadd.f32 %v3995_v60, %v2329_v0  ;;  %v2333_v11 = vsel %vm973_vm5, %v2327_v5, -inf  ;;  %3381 = vmatpush3.bf16.msra.mxu1 %v3544_v63 }
 0xd29   : > { %1954 = vmax.xlane.f32.xlu1 %v1953_v3  ;;  %3382 = vmatprep.subr.bf16.mxu1 %v3724_v15 }
 0xd2a   : > { %v2336_v12 = vsel %vm977_vm6, %v2330_v7, -inf }
 0xd2b   : > { %1951 = vmax.xlane.f32.xlu0 %v1950_v6 }
 0xd2d   : > { %2211 = vmax.xlane.f32.xlu1 %v2210_v8 }
 0xd2f   : > { %2208 = vmax.xlane.f32.xlu0 %v2207_v10 }
 0xd31   : > { %2337 = vmax.xlane.f32.xlu1 %v2336_v12 }
 0xd33   : > { %2334 = vmax.xlane.f32.xlu0 %v2333_v11 }
 0xdb2   : > { %v2038_v9 = vpop.xlane.xlu1 %2037 }
 0xdb3   : > { %v2042_v16 = vsub.f32 %v2030_v51, %v2038_v9 }
 0xdb4   : > { %v2041_v47 = vpop.xlane.xlu0 %2040 }
 0xdb5   : > { %v2044_v18 = vmul.f32 1.442695, %v2042_v16  ;;  %v2043_v23 = vsub.f32 %v2033_v56, %v2041_v47 }
 0xdb6   : > { %v1955_v20 = vpop.xlane.xlu1 %1954 }
 0xdb7   : > { %3612 = vpow2.f32 %v2044_v18  ;;  %v2046_v21 = vmul.f32 1.442695, %v2043_v23  ;;  %v1957_v22 = vsub.f32 %v1947_v54, %v1955_v20 }
 0xdb8   : > { %v1952_v25 = vpop.xlane.xlu0 %1951 }
 0xdb9   : > { %3614 = vpow2.f32 %v2046_v21  ;;  %v1960_v60 = vmul.f32 1.442695, %v1957_v22  ;;  %v1956_v26 = vsub.f32 %v1944_v61, %v1952_v25 }
 0xdba   : > { %v2212_v27 = vpop.xlane.xlu1 %2211 }
 0xdbb   : > { %3616 = vpow2.f32 %v1960_v60  ;;  %v1958_v29 = vmul.f32 1.442695, %v1956_v26  ;;  %v2214_v30 = vsub.f32 %v2204_v1, %v2212_v27 }
 0xdbc   : > { %v2209_v31 = vpop.xlane.xlu0 %2208 }
 0xdbd   : > { %3618 = vpow2.f32 %v1958_v29  ;;  %v2213_v32 = vsub.f32 %v2201_v4, %v2209_v31  ;;  %v2217_v33 = vmul.f32 1.442695, %v2214_v30 }
 0xdbe   : > { %v2338_v35 = vpop.xlane.xlu1 %2337 }
 0xdbf   : > { %v2215_v36 = vmul.f32 1.442695, %v2213_v32  ;;  %v2340_v44 = vsub.f32 %v2330_v7, %v2338_v35 }
 0xdc0   : > { %v2335_v34 = vpop.xlane.xlu0 %2334 }
 0xdc1   : > { %v3613_v37 = vpop.eup %3612  ;;  %3620 = vpow2.f32 %v2215_v36  ;;  %v2339_v38 = vsub.f32 %v2327_v5, %v2335_v34  ;;  %v2343_v50 = vmul.f32 1.442695, %v2340_v44 }
 0xdc2   : > { %v2048_v40 = vsel %vm973_vm5, %v3613_v37, 0.0  ;;  %3622 = vpow2.f32 %v2217_v33 }
 0xdc3   : > { %v3615_v43 = vpop.eup %3614  ;;  %v2341_v45 = vmul.f32 1.442695, %v2339_v38  ;;  %2049 = vadd.xlane.f32.xlu0 %v2048_v40 }
 0xdc4   : > { %v2051_v46 = vsel %vm977_vm6, %v3615_v43, 0.0 }
 0xdc5   : > { %v4287_v48 = vpop.eup %3616  ;;  %2052 = vadd.xlane.f32.xlu1 %v2051_v46  ;;  %3624 = vpow2.f32 %v2341_v45 }
 0xdc6   : > { %v1965_v51 = vsel %vm977_vm6, %v4287_v48, 0.0  ;;  %3626 = vpow2.f32 %v2343_v50 }
 0xdc7   : > { %v3619_v49 = vpop.eup %3618 }
 0xdc8   : > { %v1962_v52 = vsel %vm973_vm5, %v3619_v49, 0.0 }
 0xdc9   : > { %1966 = vadd.xlane.f32.xlu1 %v1965_v51  ;;  %1963 = vadd.xlane.f32.xlu0 %v1962_v52 }
 0xdcb   : > { %v4292_v53 = vpop.eup %3620 }
 0xdcc   : > { %v2219_v54 = vsel %vm973_vm5, %v4292_v53, 0.0  ;;  %v4296_v56 = vpop.eup %3622 }
 0xdcd   : > { %2220 = vadd.xlane.f32.xlu1 %v2219_v54  ;;  %v2222_v57 = vsel %vm977_vm6, %v4296_v56, 0.0  ;;  %v3117_v54 = vld [vmem:[%s4617_s29 + $0x1] ss:$0 sm:$0xff] }
 0xdcf   : > { %v4300_v58 = vpop.eup %3624 }
 0xdd0   : > { %v2345_v59 = vsel %vm973_vm5, %v4300_v58, 0.0  ;;  %v4304_v61 = vpop.eup %3626 }
 0xdd1   : > { %2223 = vadd.xlane.f32.xlu1 %v2222_v57  ;;  %v2348_v62 = vsel %vm977_vm6, %v4304_v61, 0.0 }
 0xdd5   : > { %2346 = vadd.xlane.f32.xlu1 %v2345_v59 }
 0xdd9   : > { %2349 = vadd.xlane.f32.xlu1 %v2348_v62 }
 0xddf   : > { %3524 = vrot.lane.b32.xlu0 %v3523_v24, %s4626_s1  ;;  %s3660_s1 = scalar_lea.vmem %s4498_s24, 16 }
 0xde0   : > { %p3661_p11 = scmp.ne.s32.totalorder %s4498_s24, %s3660_s1 }
 0xde2   : > { %p3662_p12 = pnand %p3661_p11, %p3899_p5 }
 0xde4   : > { %p3663_p13 = pneg %p3662_p12 }
 0xe50   : > { %v2050_v0 = vpop.xlane.xlu0 %2049 }
 0xe52   : > { %v2053_v1 = vpop.xlane.xlu1 %2052 }
 0xe53   : > { %3628 = vrcp.f32 %v2053_v1 }
 0xe54   : > { %3630 = vrcp.f32 %v2050_v0 }
 0xe56   : > { %v1964_v2 = vpop.xlane.xlu0 %1963  ;;  %v1967_v4 = vpop.xlane.xlu1 %1966 }
 0xe57   : > { %3632 = vrcp.f32 %v1967_v4 }
 0xe58   : > { %3634 = vrcp.f32 %v1964_v2 }
 0xe5a   : > { %v3525_v3 = vpop.permute.xlu0 %3524  ;;  %v2221_v18 = vpop.xlane.xlu1 %2220 }
 0xe5b   : > { %v3527_v6 = vunpack.i.h.bf16 %v3525_v3  ;;  %v3526_v7 = vunpack.i.l.bf16 %v3525_v3 }
 0xe5d   : > { %v3629_v8 = vpop.eup %3628  ;;  %v2059_v39 = vsel %vm4059_vm11, %v3527_v6, 0.0  ;;  %v1981_v19 = vsel %vm998_vm10, %v3527_v6, 0.0  ;;  %v1980_v24 = vsel %vm998_vm10, %v3526_v7, 0.0  ;;  %v2058_v5 = vsel %vm4059_vm11, %v3526_v7, 0.0 }
 0xe5e   : > { %v3631_v10 = vpop.eup %3630  ;;  %v2061_v12 = vpack.c.bf16 %v2059_v39, %v2058_v5  ;;  %v2057_v11 = vmul.f32 %v3629_v8, %v3615_v43  ;;  %v1983_v16 = vpack.c.bf16 %v1981_v19, %v1980_v24  ;;  %v2224_v42 = vpop.xlane.xlu1 %2223  ;;  %v2230_v22 = vsel %vm4081_vm15, %v3527_v6, 0.0 }
 0xe5f   : > { %v2056_v47 = vmul.f32 %v3631_v10, %v3613_v37  ;;  %v2229_v25 = vsel %vm4081_vm15, %v3526_v7, 0.0  ;;  %3636 = vrcp.f32 %v2224_v42  ;;  %v2356_v33 = vsel %vm4098_vm8, %v3527_v6, 0.0  ;;  %v3547_v10 = vld [vmem:[%s4548_s10 + $0x18] sm:$0xff]  }
 0xe60   : > { %v2066_v9 = vand.u32 %v2061_v12, %v4071_v28  ;;  %v2113_v20 = vand.u32 %v1983_v16, %v4071_v28  ;;  %3638 = vrcp.f32 %v2221_v18  ;;  %v2232_v27 = vpack.c.bf16 %v2230_v22, %v2229_v25  ;;  %v3122_v25 = vld [vmem:[%s4547_s9 + $0x1] ss:$0 sm:$0xff] }
 0xe61   : > { %v2060_v23 = vpack.c.bf16 %v2057_v11, %v2056_v47  ;;  %v3633_v17 = vpop.eup %3632  ;;  %v2355_v36 = vsel %vm4098_vm8, %v3526_v7, 0.0 }
 0xe62   : > { %3345 = vmatpush3.bf16.msra.mxu0 %v2066_v9  ;;  %v3635_v21 = vpop.eup %3634  ;;  %v1971_v60 = vmul.f32 %v3633_v17, %v4287_v48  ;;  %v2347_v29 = vpop.xlane.xlu1 %2346  ;;  %v2237_v31 = vand.u32 %v2232_v27, %v4071_v28  ;;  %v2358_v37 = vpack.c.bf16 %v2356_v33, %v2355_v36  ;;  %v3121_v17 = vld [vmem:[%s4618_s30 + $0x1] ss:$0 sm:$0xff]  ;;  %v3553_v36 = vld [vmem:[%s4550_s12 + $0x68] sm:$0xff]  }
 0xe63   : > { %3350 = vmatprep.subr.bf16.mxu0 %v3724_v15  ;;  %v1970_v26 = vmul.f32 %v3635_v21, %v3619_v49  ;;  %v3552_v33 = vld [vmem:[%s4550_s12 + $0x60] sm:$0xff]  }
 0xe64   : > { %v2363_v43 = vand.u32 %v2358_v37, %v4071_v28  ;;  %v3545_v28 = vld [vmem:[%s4610_s7 + $0x18] sm:$0xff]   ;;  %v3123_v37 = vld [vmem:[%s4549_s11 + $0x1] ss:$0 sm:$0xff]  ;;  %s3664_s7 = sshll.u32 %s3735_s28, 4  ;;  %s3665_s7 = int_to_ptr.vmem [resolvable:$false] %s3664_s7 }
 0xe65   : > { %3347 = vmatmul.mubr.msk.bf16.vlgmr.msra.gmra.mrb[36].mxu0 %vm973_vm5, %v2060_v23  ;;  %v1982_v30 = vpack.c.bf16 %v1971_v60, %v1970_v26  ;;  %3383 = vmatpush3.bf16.msra.mxu1 %v3545_v28  ;;  %s3666_s27 = scalar_lea.vmem %s3665_s7, 32  ;;  %p3667_p0 = scmp.lt.s32.totalorder %s4498_s24, %s3665_s7 }
 0xe66   : > { %3351 = vmatpush3.bf16.msra.mxu0 %v2113_v20  ;;  %3352 = vmatprep.mubr.msk.bf16.mxu0 %vm3725_vm2, %v3724_v15  ;;  %v2350_v32 = vpop.xlane.xlu1 %2349  ;;  %p3668_p1 = scmp.lt.s32.totalorder %s3666_s27, %s3660_s1 }
 0xe67   : > { %3362 = vmatprep.subr.bf16.mxu0 %v3724_v15  ;;  %3640 = vrcp.f32 %v2350_v32  ;;  %3388 = vmatprep.subr.bf16.mxu1 %v3724_v15  ;;  %v3550_v32 = vld [vmem:[%s4550_s12 + $0x50] sm:$0xff]  }
 0xe68   : > { %3642 = vrcp.f32 %v2347_v29  ;;  %p3669_p2 = por %p3668_p1, %p3667_p0 }
 0xe69   : > { %v3637_v41 = vpop.eup %3636 }
 0xe6a   : > { %v3639_v35 = vpop.eup %3638  ;;  %v2228_v34 = vmul.f32 %v3637_v41, %v4296_v56  ;;  %v3551_v41 = vld [vmem:[%s4550_s12 + $0x58] sm:$0xff]   ;;  %p3670_p3 = pnand %p3669_p2, %p3663_p13 }
 0xe6b   : > { %v2227_v38 = vmul.f32 %v3639_v35, %v4292_v53  ;;  %v3554_v35 = vld [vmem:[%s4550_s12 + $0x70] sm:$0xff]  }
 0xe6d   : > { %v2231_v40 = vpack.c.bf16 %v2228_v34, %v2227_v38  ;;  %v3555_v34 = vld [vmem:[%s4550_s12 + $0x78] sm:$0xff]  }
 0xe71   : > { %3353 = vmatmul.mubr.msk.bf16.vlgmr.msra.gmra.mrb[36].mxu0 %vm973_vm5, %v1982_v30  ;;  %v3641_v55 = vpop.eup %3640  ;;  %v3548_v30 = vld [vmem:[%s4550_s12 + $0x40] sm:$0xff]  }
 0xe72   : > { %3363 = vmatpush3.bf16.msra.mxu0 %v2237_v31  ;;  %3364 = vmatprep.mubr.msk.bf16.mxu0 %vm3725_vm2, %v3724_v15  ;;  %v3643_v44 = vpop.eup %3642  ;;  %v2354_v45 = vmul.f32 %v3641_v55, %v4304_v61  ;;  %v3549_v31 = vld [vmem:[%s4550_s12 + $0x48] sm:$0xff]  }
 0xe73   : > { %3374 = vmatprep.subr.bf16.mxu0 %v3724_v15  ;;  %v2353_v46 = vmul.f32 %v3643_v44, %v4300_v58 }
 0xe75   : > { %v2357_v48 = vpack.c.bf16 %v2354_v45, %v2353_v46 }
 0xe7d   : > { %3365 = vmatmul.mubr.msk.bf16.vlgmr.msra.gmra.mrb[36].mxu0 %vm973_vm5, %v2231_v40 }
 0xe7e   : > { %3375 = vmatpush3.bf16.msra.mxu0 %v2363_v43  ;;  %3376 = vmatprep.mubr.msk.bf16.mxu0 %vm3725_vm2, %v3724_v15 }
 0xe7f   : > { %3396 = vmatprep.subr.bf16.mxu0 %v3724_v15 }
 0xe89   : > { %3377 = vmatmul.mubr.msk.bf16.vlgmr.msra.gmra.mrb[36].mxu0 %vm973_vm5, %v2357_v48 }
 0xe8a   : > { %3412 = vmatprep.mubr.msk.bf16.mxu0 %vm3725_vm2, %v3724_v15  ;;  %3397 = vmatpush3.bf16.msra.mxu0 %v3548_v30 }
 0xe8b   : > { %3398 = vmatprep.subr.bf16.mxu0 %v3724_v15 }
 0xe8e   : > { %3399 = vmatpush3.bf16.msra.mxu0 %v3549_v31 }
 0xe8f   : > { %3400 = vmatprep.subr.bf16.mxu0 %v3724_v15 }
 0xe92   : > { %3401 = vmatpush3.bf16.msra.mxu0 %v3550_v32 }
 0xe93   : > { %3402 = vmatprep.subr.bf16.mxu0 %v3724_v15 }
 0xe96   : > { %3403 = vmatpush3.bf16.msra.mxu0 %v3551_v41 }
 0xe97   : > { %3404 = vmatprep.subr.bf16.mxu0 %v3724_v15 }
 0xe9a   : > { %3405 = vmatpush3.bf16.msra.mxu0 %v3552_v33 }
 0xe9b   : > { %3406 = vmatprep.subr.bf16.mxu0 %v3724_v15 }
 0xe9e   : > { %3407 = vmatpush3.bf16.msra.mxu0 %v3553_v36 }
 0xe9f   : > { %3408 = vmatprep.subr.bf16.mxu0 %v3724_v15 }
 0xea2   : > { %3409 = vmatpush3.bf16.msra.mxu0 %v3554_v35  ;;  %v2786_v35 = vld [vmem:[%s4557_s19] sm:$0x1] }
 0xea3   : > { %3410 = vmatprep.subr.bf16.mxu0 %v3724_v15 }
 0xea6   : > { %3411 = vmatpush3.bf16.msra.mxu0 %v3555_v34 }
 0xf5c   : > { %v2399_v49 = vpop.f32.mrb[36].mxu0 }
 0xf5d   : > { %v3378_v50 = vpop.f32.mrb[37].mxu0 }
 0xf5e   : > { %v2402_v51 = vpop.f32.mrb[38].mxu0 }
 0xf5f   : > { %v2408_v52 = vpack.c.bf16 %v2402_v51, %v2399_v49  ;;  %v3379_v53 = vpop.f32.mrb[39].mxu0 }
 0xf61   : > { %3385 = vmatmul.mubr.msk.bf16.vlgmr.msra.gmra.mrb[20].mxu1 %vm758_vm0, %v2408_v52 }
 0xf62   : > { %3392 = vmatprep.mubr.msk.bf16.mxu1 %vm3725_vm2, %v3724_v15 }
0x1034   : > { %v2464_v56 = vpop.f32.mrb[20].mxu1 }
0x1035   : > { %v2465_v57 = vadd.f32 %v3117_v54, %v2464_v56  ;;  %v3386_v58 = vpop.f32.mrb[21].mxu1 }
0x1036   : > { %v2467_v59 = vpop.f32.mrb[22].mxu1 }
0x1037   : > { %v2468_v61 = vadd.f32 %v3117_v54, %v2467_v59  ;;  %v3387_v62 = vpop.f32.mrb[23].mxu1  ;;  %v2471_v63 = vadd.f32 %v2465_v57, %v4220_v13 }
0x1039   : > { %v2473_v0 = vsel %vm758_vm0, %v2471_v63, 0.0  ;;  %v2472_v1 = vadd.f32 %v2468_v61, %v4222_v14  ;;  %v3546_v14 = vld [vmem:[%s4548_s10 + $0x10] sm:$0xff]  }
0x103a   : > { %2474 = vadd.xlane.f32.xlu1 %v2473_v0  ;;  %3389 = vmatpush3.bf16.msra.mxu1 %v3546_v14 }
0x103b   : > { %v2476_v2 = vsel %vm762_vm1, %v2472_v1, 0.0  ;;  %3390 = vmatprep.subr.bf16.mxu1 %v3724_v15 }
0x103e   : > { %2477 = vadd.xlane.f32.xlu1 %v2476_v2  ;;  %3391 = vmatpush3.bf16.msra.mxu1 %v3547_v10 }
0x103f   : > { %3416 = vmatprep.subr.bf16.mxu1 %v3724_v15 }
0x10c7   : > { %v2475_v3 = vpop.xlane.xlu1 %2474 }
0x10c8   : > { %v2479_v4 = vmul.f32 0.03125, %v2475_v3  ;;  %v3127_v3 = vld [vmem:[%s4551_s13 + $0x1] ss:$0 sm:$0xff] }
0x10ca   : > { %v2481_v6 = vsub.f32 %v2471_v63, %v2479_v4 }
0x10cb   : > { %v2478_v7 = vpop.xlane.xlu1 %2477 }
0x10cc   : > { %v2480_v8 = vmul.f32 0.03125, %v2478_v7  ;;  %v2483_v39 = vmul.f32 %v2481_v6, %v2481_v6 }
0x10ce   : > { %v2482_v19 = vsub.f32 %v2472_v1, %v2480_v8  ;;  %v2485_v24 = vsel %vm758_vm0, %v2483_v39, 0.0 }
0x10cf   : > { %2486 = vadd.xlane.f32.xlu0 %v2485_v24 }
0x10d0   : > { %v2484_v5 = vmul.f32 %v2482_v19, %v2482_v19 }
0x10d2   : > { %v2488_v13 = vsel %vm762_vm1, %v2484_v5, 0.0  ;;  %vm2904_vm1 = vcmask 523264  }
0x10d3   : > { %2489 = vadd.xlane.f32.xlu1 %v2488_v13 }
0x115c   : > { %v2487_v12 = vpop.xlane.xlu0 %2486 }
0x115d   : > { %v2491_v11 = vmul.f32 0.03125, %v2487_v12 }
0x115f   : > { %v2493_v9 = vadd.f32 1e-12, %v2491_v11  ;;  %v3556_v11 = vld [vmem:[%s4554_s16] sm:$0xff]  }
0x1160   : > { %v2490_v16 = vpop.xlane.xlu1 %2489 }
0x1161   : > { %3644 = vrsqrt.f32 %v2493_v9  ;;  %v2492_v47 = vmul.f32 0.03125, %v2490_v16  ;;  %v3557_v9 = vld [vmem:[%s4554_s16 + $0x8] sm:$0xff]  }
0x1163   : > { %v2494_v18 = vadd.f32 1e-12, %v2492_v47 }
0x1165   : > { %3646 = vrsqrt.f32 %v2494_v18 }
0x116b   : > { %v3645_v23 = vpop.eup %3644 }
0x116c   : > { %v2497_v20 = vmul.f32 %v3645_v23, %v2481_v6 }
0x116e   : > { %v2505_v21 = vmul.f32 %v3121_v17, %v2497_v20  ;;  %v3136_v20 = vld [vmem:[%s4552_s14 + $0x1] ss:$0 sm:$0xff] }
0x116f   : > { %v3647_v42 = vpop.eup %3646 }
0x1170   : > { %v2498_v22 = vmul.f32 %v3647_v42, %v2482_v19  ;;  %v4387_v26 = vadd.f32 %v3122_v25, %v2505_v21  ;;  %v3137_v42 = vld [vmem:[%s4553_s15 + $0x1] ss:$0 sm:$0xff] }
0x1172   : > { %v2506_v60 = vmul.f32 %v3121_v17, %v2498_v22 }
0x1174   : > { %v2514_v27 = vadd.f32 %v3122_v25, %v2506_v60  ;;  %v3558_v60 = vld [vmem:[%s4556_s18] sm:$0xff]  }
0x1176   : > { %v2515_v29 = vpack.c.bf16 %v2514_v27, %v4387_v26  ;;  %v2724_v27 = vld [vmem:[%s4555_s17] sm:$0x1] }
0x1178   : > { %3393 = vmatmul.mubr.msk.bf16.vlgmr.msra.gmra.mrb[24].mxu1 %vm758_vm0, %v2515_v29 }
0x1179   : > { %3420 = vmatprep.mubr.msk.bf16.mxu1 %vm3725_vm2, %v3724_v15  ;;  %3417 = vmatpush3.bf16.msra.mxu1 %v3556_v11 }
0x117a   : > { %3418 = vmatprep.subr.bf16.mxu1 %v3724_v15 }
0x117d   : > { %3419 = vmatpush3.bf16.msra.mxu1 %v3557_v9 }
0x117e   : > { %3424 = vmatprep.subr.bf16.mxu1 %v3724_v15 }
0x124b   : > { %v2571_v38 = vpop.f32.mrb[24].mxu1 }
0x124c   : > { %v2572_v40 = vadd.f32 %v3123_v37, %v2571_v38  ;;  %v3394_v43 = vpop.f32.mrb[25].mxu1 }
0x124d   : > { %v2574_v55 = vpop.f32.mrb[26].mxu1 }
0x124e   : > { %v2580_v44 = vmul.f32 0.044715, %v2572_v40  ;;  %v2575_v45 = vadd.f32 %v3123_v37, %v2574_v55  ;;  %v3395_v46 = vpop.f32.mrb[27].mxu1  ;;  %v2578_v61 = vmul.f32 0.5, %v2572_v40 }
0x1250   : > { %v2582_v48 = vmul.f32 %v2580_v44, %v2572_v40  ;;  %v2581_v28 = vmul.f32 0.044715, %v2575_v45  ;;  %v2579_v62 = vmul.f32 0.5, %v2575_v45 }
0x1252   : > { %v2584_v49 = vmul.f32 %v2582_v48, %v2572_v40  ;;  %v2583_v50 = vmul.f32 %v2581_v28, %v2575_v45 }
0x1254   : > { %v2586_v51 = vadd.f32 %v2584_v49, %v2572_v40  ;;  %v2585_v52 = vmul.f32 %v2583_v50, %v2575_v45 }
0x1256   : > { %v2588_v53 = vmul.f32 0.7978846, %v2586_v51  ;;  %v2587_v54 = vadd.f32 %v2585_v52, %v2575_v45 }
0x1258   : > { %3648 = vtanh.f32 %v2588_v53  ;;  %v2589_v56 = vmul.f32 0.7978846, %v2587_v54 }
0x125a   : > { %3650 = vtanh.f32 %v2589_v56 }
0x1262   : > { %v3649_v57 = vpop.eup %3648 }
0x1263   : > { %v2592_v58 = vadd.f32 1.0, %v3649_v57 }
0x1264   : > { %v3651_v59 = vpop.eup %3650 }
0x1265   : > { %v2593_v63 = vadd.f32 1.0, %v3651_v59  ;;  %v2594_v0 = vmul.f32 %v2592_v58, %v2578_v61  ;;  %v3560_v59 = vld [vmem:[%s4560_s22] sm:$0xff]   ;;  %v3561_v61 = vld [vmem:[%s4560_s22 + $0x8] sm:$0xff]  }
0x1267   : > { %v2595_v1 = vmul.f32 %v2593_v63, %v2579_v62  ;;  %v3562_v62 = vld [vmem:[%s4560_s22 + $0x10] sm:$0xff]   ;;  %v3563_v63 = vld [vmem:[%s4560_s22 + $0x18] sm:$0xff]  }
0x1269   : > { %v2596_v2 = vpack.c.bf16 %v2595_v1, %v2594_v0 }
0x126b   : > { %3413 = vmatmul.mubr.bf16.vlgmr.msra.gmra.mrb[40].mxu0 %v2596_v2 }
0x133e   : > { %v2685_v4 = vpop.f32.mrb[40].mxu0 }
0x133f   : > { %v2686_v6 = vadd.f32 %v3127_v3, %v2685_v4  ;;  %v3414_v7 = vpop.f32.mrb[41].mxu0  ;;  %v2851_v4 = vld [vmem:[%s4558_s20] sm:$0x1] }
0x1340   : > { %v2688_v8 = vpop.f32.mrb[42].mxu0  ;;  %v2852_v7 = vld [vmem:[%s4559_s21] sm:$0x1] }
0x1341   : > { %v3415_v39 = vpop.f32.mrb[43].mxu0  ;;  %v2691_v19 = vadd.f32 %v2686_v6, %v4387_v26  ;;  %v3559_v26 = vld [vmem:[%s4556_s18 + $0x8] sm:$0xff]  }
0x1343   : > { %v2692_v24 = vsel %vm758_vm0, %v2691_v19, 0.0 }
0x1344   : > { %2693 = vadd.xlane.f32.xlu1 %v2692_v24 }
0x13d1   : > { %v2694_v5 = vpop.xlane.xlu1 %2693 }
0x13d2   : > { %v2695_v13 = vmul.f32 0.03125, %v2694_v5 }
0x13d4   : > { %v2696_v14 = vsub.f32 %v2691_v19, %v2695_v13  ;;  %v2879_v19 = vld [vmem:[%s4561_s23] sm:$0x1] }
0x13d6   : > { %v2697_v10 = vmul.f32 %v2696_v14, %v2696_v14 }
0x13d8   : > { %v2698_v12 = vsel %vm758_vm0, %v2697_v10, 0.0 }
0x13d9   : > { %2699 = vadd.xlane.f32.xlu1 %v2698_v12 }
0x1466   : > { %v2700_v16 = vpop.xlane.xlu1 %2699 }
0x1467   : > { %v2701_v47 = vmul.f32 0.03125, %v2700_v16 }
0x1469   : > { %v2702_v18 = vadd.f32 1e-12, %v2701_v47 }
0x146b   : > { %3652 = vrsqrt.f32 %v2702_v18 }
0x1475   : > { %v3653_v23 = vpop.eup %3652 }
0x1476   : > { %v2704_v17 = vmul.f32 %v3653_v23, %v2696_v14 }
0x1478   : > { %v2711_v21 = vmul.f32 %v3136_v20, %v2704_v17 }
0x147a   : > { %v2718_v22 = vadd.f32 %v3137_v42, %v2711_v21 }
0x147c   : > { %v2723_v25 = vpack.c.bf16 %v2718_v22, %v2718_v22 }
0x147e   : > { %3421 = vmatmul.mubr.msk.bf16.vlgmr.msra.gmra.mrb[28].mxu1 %vm758_vm0, %v2723_v25 }
0x147f   : > { %3428 = vmatprep.mubr.msk.bf16.mxu1 %vm3725_vm2, %v3724_v15  ;;  %3425 = vmatpush3.bf16.msra.mxu1 %v3558_v60 }
0x1480   : > { %3426 = vmatprep.subr.bf16.mxu1 %v3724_v15 }
0x1483   : > { %3427 = vmatpush3.bf16.msra.mxu1 %v3559_v26 }
0x1484   : > { %3432 = vmatprep.subr.bf16.mxu1 %v3724_v15 }
0x1551   : > { %v2774_v29 = vpop.f32.mrb[28].mxu1 }
0x1552   : > { %v2775_v30 = vadd.f32 %v2774_v29, %v2724_v27  ;;  %v3422_v31 = vpop.f32.mrb[29].mxu1 }
0x1553   : > { %v2777_v32 = vpop.f32.mrb[30].mxu1 }
0x1554   : > { %3654 = vtanh.f32 %v2775_v30  ;;  %v3423_v41 = vpop.f32.mrb[31].mxu1 }
0x155e   : > { %v3655_v33 = vpop.eup %3654 }
0x155f   : > { %v2785_v36 = vpack.c.bf16 %v3655_v33, %v3655_v33 }
0x1561   : > { %3429 = vmatmul.mubr.msk.bf16.vlgmr.msra.gmra.mrb[32].mxu1 %vm758_vm0, %v2785_v36  ;;  %vm2853_vm0 = vcmask 516096  }
0x1562   : > { %3440 = vmatprep.mubr.msk.bf16.mxu1 %vm3725_vm2, %v3724_v15  ;;  %3433 = vmatpush3.bf16.msra.mxu1 %v3560_v59  ;;  %vm2948_vm2 = vcmask 16384  }
0x1563   : > { %3434 = vmatprep.subr.bf16.mxu1 %v3724_v15 }
0x1566   : > { %3435 = vmatpush3.bf16.msra.mxu1 %v3561_v61 }
0x1567   : > { %3436 = vmatprep.subr.bf16.mxu1 %v3724_v15 }
0x156a   : > { %3437 = vmatpush3.bf16.msra.mxu1 %v3562_v62 }
0x156b   : > { %3438 = vmatprep.subr.bf16.mxu1 %v3724_v15 }
0x156e   : > { %3439 = vmatpush3.bf16.msra.mxu1 %v3563_v63 }
0x1634   : > { %v2836_v34 = vpop.f32.mrb[32].mxu1 }
0x1635   : > { %v2837_v37 = vadd.f32 %v2836_v34, %v2786_v35  ;;  %v3430_v38 = vpop.f32.mrb[33].mxu1 }
0x1636   : > { %v2839_v40 = vpop.f32.mrb[34].mxu1 }
0x1637   : > { %v2843_v43 = vmul.f32 0.044715, %v2837_v37  ;;  %v3431_v55 = vpop.f32.mrb[35].mxu1  ;;  %v2842_v49 = vmul.f32 0.5, %v2837_v37 }
0x1639   : > { %v2844_v44 = vmul.f32 %v2843_v43, %v2837_v37 }
0x163b   : > { %v2845_v45 = vmul.f32 %v2844_v44, %v2837_v37 }
0x163d   : > { %v2846_v46 = vadd.f32 %v2845_v45, %v2837_v37 }
0x163f   : > { %v2847_v48 = vmul.f32 0.7978846, %v2846_v46 }
0x1641   : > { %3656 = vtanh.f32 %v2847_v48 }
0x164b   : > { %v3657_v28 = vpop.eup %3656 }
0x164c   : > { %v2849_v50 = vadd.f32 1.0, %v3657_v28 }
0x164e   : > { %v2850_v51 = vmul.f32 %v2849_v50, %v2842_v49 }
0x1650   : > { %v2854_v52 = vsel %vm2853_vm0, %v2850_v51, 0.0 }
0x1651   : > { %2855 = vadd.xlane.f32.xlu1 %v2854_v52 }
0x16de   : > { %v2856_v53 = vpop.xlane.xlu1 %2855 }
0x16df   : > { %v2858_v54 = vmul.f32 0.015625, %v2856_v53 }
0x16e1   : > { %v2859_v56 = vsub.f32 %v2850_v51, %v2858_v54 }
0x16e3   : > { %v2860_v57 = vmul.f32 %v2859_v56, %v2859_v56 }
0x16e5   : > { %v2861_v58 = vsel %vm2853_vm0, %v2860_v57, 0.0 }
0x16e6   : > { %2862 = vadd.xlane.f32.xlu1 %v2861_v58 }
0x1773   : > { %v2863_v0 = vpop.xlane.xlu1 %2862 }
0x1774   : > { %v2864_v1 = vmul.f32 0.015625, %v2863_v0 }
0x1776   : > { %v2865_v2 = vadd.f32 1e-12, %v2864_v1 }
0x1778   : > { %3658 = vrsqrt.f32 %v2865_v2 }
0x1782   : > { %v3659_v3 = vpop.eup %3658 }
0x1783   : > { %v2867_v6 = vmul.f32 %v3659_v3, %v2859_v56 }
0x1785   : > { %v2868_v8 = vmul.f32 %v2867_v6, %v2851_v4 }
0x1787   : > { %v2869_v39 = vadd.f32 %v2868_v8, %v2852_v7 }
0x1789   : > { %v2878_v15 = vpack.c.bf16 %v2869_v39, %v2869_v39 }
0x178b   : > { %3441 = vmatmul.mubr.msk.bf16.vlgmr.msra.gmra.mrb[36].mxu1 %vm2904_vm1, %v2878_v15 }
0x185e   : > { %v2942_v24 = vpop.f32.mrb[36].mxu1 }
0x185f   : > { %v2943_v5 = vadd.f32 %v2942_v24, %v2879_v19  ;;  %v3442_v13 = vpop.f32.mrb[37].mxu1 }
0x1860   : > { %v2945_v14 = vpop.f32.mrb[38].mxu1 }
0x1861   : > { %v3443_v10 = vpop.f32.mrb[39].mxu1  ;;  %2949 = vst.msk [vmem:[%s740_s2] sm:$0x1] %vm2948_vm2, %v2943_v5 }
0x1862   : > { %3673 = shalt.err (!%p3670_p3)
}
0x1863   : > { %s3674_s2 = scalar_lea.hbm %s4496_s4, 16  ;;  %s3678_s8 = scalar_lea.hbm %s4627_s0, 32 }
0x1864   : > { %p3675_p4 = scmp.ne.s32.totalorder %s4496_s4, %s3674_s2  ;;  %p3679_p9 = scmp.lt.u32.totalorder %s4496_s4, %s4627_s0 }
0x1865   : > { %p3680_p10 = scmp.lt.u32.totalorder %s3678_s8, %s3674_s2  ;;  %p3682_p12 = scmp.lt.u32.totalorder %s3674_s2, %s4496_s4 }
0x1866   : > { %p3676_p7 = pnand %p3675_p4, %p3899_p5 }
0x1867   : > { %p3681_p11 = por %p3680_p10, %p3679_p9 }
0x1868   : > { %p3677_p8 = pneg %p3676_p7 }
0x1869   : > { %p3683_p13 = por %p3682_p12, %p3681_p11 }
0x186b   : > { %p3684_p0 = pnand %p3683_p13, %p3677_p8 }
0x186d   : > { %3687 = shalt.err (!%p3684_p0)
}
0x186e   : > { %3468 = dma.vmem_to_hbm [thread:$0]  (%p3899_p5), %s4498_s24, 16, %s4496_s4, %s2951_s6  }
0x186f PF: > { %s4628_s1 = sld [smem:[#allocation7_spill]]  ;;  %s4629_s27 = sld [smem:[#allocation5_spill]] }
0x1875   : > { %p3474_p1 = scmp.ge.s32.totalorder %s4628_s1, 2  ;;  %s2975_s25 = sand.u32 1, %s4629_s27  }
0x1876   : > { %s2976_s28 = scalar_lea.sflag [#allocation3], %s2975_s25 }
0x1877   : > { %p3471_p2 = pnand %p3474_p1, %p3903_p6 }
0x1879   : > { %3705 = dma.done.wait (!%p3471_p2), %s2976_s28, 16  }
0x187a   : > { %3707 = vsyncadd (!%p3471_p2), %s2976_s28, 4294967280  ;;  %s4631_s28 = sld [smem:[#allocation8_spill]]  ;;  %s4632_s2 = sld [smem:[#allocation6_spill]] }
0x187b   : > { %s4633_s27 = sld [smem:[#allocation9_spill]]  ;;  %s4634_s5 = smov %s3714_s26 }
0x1880   : > { %p34_p3 = scmp.ge.s32.totalorder %s4631_s28, 4   ;;  %s4635_s26 = smov %s4632_s2 }
0x1882   :  { %36 = sbr.rel (!%p34_p3) target bundleno = 14 (0xe), region = 166 }
0x1889   :  { %2980 = vsyncpa [#allocation3], 1 }
0x188a   :  { %2982 = vsyncpa [#allocation3 + $0x1], 1 }

</bundles_post_ra>
